<compile_context>
chip_gen: v5e
topology: v5e:2x2
jax: 0.10.0
libtpu: 0.0.40
codegen_flags: <defaults>
</compile_context>

<pallas_src>
import functools

import jax
import jax.numpy as jnp
from jax import lax
from jax.experimental import pallas as pl
from jax.experimental.pallas import tpu as pltpu


def _round_up(n, m):
    return ((n + m - 1) // m) * m


def _num_megacore_tcs():
    """Best-effort count of TensorCores that can share one 'parallel' grid axis."""
    try:
        kind = jax.devices()[0].device_kind.lower()
    except Exception:
        return 1
    if "lite" in kind or "v5e" in kind or "v6e" in kind:
        return 1                       # single TC: grid is a serial loop
    if any(t in kind for t in ("v4", "v5p", "v7")):
        return 2                       # megacore / 2 TC per chip
    return 1


def _vmem_budget_bytes():
    """~75% of per-core VMEM, with a fallback that is safe on every generation."""
    budget = 48 << 20                  # < v7x's 64 MiB/TC, << v5e/v6e's 128 MiB
    try:
        budget = min(int(pltpu.get_tpu_info().vmem_capacity_bytes) * 3 // 4, 96 << 20)
    except Exception:
        pass
    return budget


# --------------------------------------------------------------------------------------
# Kernels
# --------------------------------------------------------------------------------------
def _mlp_resident_kernel(x_ref, y_ref, w_in_x_ref, w_in_y_ref, b_in_ref,
                         w_hid_ref, b_hid_ref, w_out_ref, b_out_ref, o_ref, *,
                         num_layers):
    """Whole hidden weight stack resident in VMEM; one batch tile per grid step."""
    bf16 = jnp.bfloat16
    # Input linear with the concat fused away:
    #   concat(x, y) @ W_in == x @ W_in[:dx] + y @ W_in[dx:]
    # TODO(synk): for tiny d_x/d_y, a single K=(d_x+d_y) pass via an in-kernel VMEM
    #             concat would halve MXU fill/drain overhead of the input layer.
    h = (jnp.dot(x_ref[...].astype(bf16), w_in_x_ref[...],
                 preferred_element_type=jnp.float32)
         + jnp.dot(y_ref[...].astype(bf16), w_in_y_ref[...],
                   preferred_element_type=jnp.float32)
         + b_in_ref[...])

    def layer(l, h):
        h = jnp.maximum(h, 0.0)                                   # Dropout(eval)=id -> ReLU
        return (jnp.dot(h.astype(bf16), w_hid_ref[l],
                        preferred_element_type=jnp.float32) + b_hid_ref[l])

    if num_layers <= 4:
        for l in range(num_layers):                               # full unroll for small L
            h = layer(l, h)
    else:
        # Deep stacks: visible loop bounds live ranges / program size (spill pressure).
        h = lax.fori_loop(0, num_layers, layer, h, unroll=2)

    out = (jnp.dot(h.astype(bf16), w_out_ref[...],
                   preferred_element_type=jnp.float32) + b_out_ref[...])
    o_ref[...] = out.astype(o_ref.dtype)                          # unpadded (tb, O) store


def _mlp_streamed_kernel(x_ref, y_ref, w_in_x_ref, w_in_y_ref, b_in_ref,
                         w_hid_ref, b_hid_ref, w_out_ref, b_out_ref, o_ref,
                         h_ref, *, num_layers):
    """One hidden layer's weights streamed per grid step (grid = (batch_tiles, L))."""
    bf16 = jnp.bfloat16
    s = pl.program_id(1)

    @pl.when(s == 0)
    def _():                                                       # input linear
        h_ref[...] = (jnp.dot(x_ref[...].astype(bf16), w_in_x_ref[...],
                              preferred_element_type=jnp.float32)
                      + jnp.dot(y_ref[...].astype(bf16), w_in_y_ref[...],
                                preferred_element_type=jnp.float32)
                      + b_in_ref[...])

    h = jnp.maximum(h_ref[...], 0.0)                               # ReLU -> Linear(layer s)
    h = (jnp.dot(h.astype(bf16), w_hid_ref[0],
                 preferred_element_type=jnp.float32) + b_hid_ref[0])
    h_ref[...] = h

    @pl.when(s == num_layers - 1)
    def _():                                                       # output linear
        o_ref[...] = (jnp.dot(h.astype(bf16), w_out_ref[...],
                              preferred_element_type=jnp.float32)
                      + b_out_ref[...]).astype(o_ref.dtype)


# --------------------------------------------------------------------------------------
# Parameter preprocessing + wrapper
# --------------------------------------------------------------------------------------
def prepare_params(params, d_x, *, lane=128):
    """One-time parameter preprocessing.

    * splits W_in at the x / outcome concat boundary (the concat never hits HBM),
    * zero-pads the hidden width H up to a multiple of 128 so every hidden matmul is
      lane-dense (padding is mathematically inert: zero weights / biases),
    * keeps the output width UNPADDED (the kernel stores (tb, O) directly),
    * casts weight matrices to bf16 (MXU-native); biases stay f32.
    """
    w_in, b_in, w_hid, b_hid, w_out, b_out = params
    H = w_in.shape[1]
    Hp = _round_up(H, lane)

    w_in_p = jnp.pad(w_in, ((0, 0), (0, Hp - H)))
    w_in_x = w_in_p[:d_x].astype(jnp.bfloat16)                     # (d_x, Hp)
    w_in_y = w_in_p[d_x:].astype(jnp.bfloat16)                     # (d_y, Hp)
    b_in_p = jnp.pad(b_in, ((0, 0), (0, Hp - H)))                  # (1, Hp)  f32

    w_hid_p = jnp.pad(w_hid, ((0, 0), (0, Hp - H), (0, Hp - H))).astype(jnp.bfloat16)
    b_hid_p = jnp.pad(b_hid, ((0, 0), (0, 0), (0, Hp - H)))        # (L, 1, Hp) f32

    w_out_p = jnp.pad(w_out, ((0, Hp - H), (0, 0))).astype(jnp.bfloat16)   # (Hp, O)
    return (w_in_x, w_in_y, b_in_p, w_hid_p, b_hid_p, w_out_p, b_out)


def gfn_mlp_forward(x, outcome, prepared_params, num_outputs, *,
                    mask=None,                     # unused in this path (as in PyTorch)
                    tile_b=512,
                    stream_layers=None,            # None = auto from VMEM estimate
                    single_buffer_weights=True,
                    vmem_limit_bytes=None):
    """Forward of GFNConditionalMLP (return_all=False)."""
    del mask
    w_in_x, w_in_y, b_in, w_hid, b_hid, w_out, b_out = prepared_params
    B, d_x = x.shape
    _, d_y = outcome.shape
    Hp = w_in_x.shape[1]
    L = int(w_hid.shape[0])
    O = w_out.shape[1]
    assert O == num_outputs and b_out.shape == (1, O)

    BF, F32 = 2, 4
    budget = _vmem_budget_bytes()

    # Grid-invariant weights (resident in both modes): split W_in, W_out, all biases.
    small_w = ((d_x + d_y) * Hp + Hp * O) * BF + (Hp + L * Hp + O) * F32
    resident_hidden = L * Hp * Hp * BF                   # whole stack, single-buffered
    streamed_hidden = 2 * (Hp * Hp * BF + Hp * F32)      # one layer, double-buffered

    if stream_layers is None:
        stream_layers = (small_w + resident_hidden) > budget // 2
    if L == 0:
        stream_layers = False
    weight_bytes = small_w + (streamed_hidden if stream_layers else resident_hidden)

    def act_bytes(tb):
        io = 2 * tb * (d_x + d_y) * F32 + 2 * tb * O * F32          # double-buffered tiles
        live = (3 + (1 if stream_layers else 0)) * tb * Hp * F32    # h + temps (+ scratch)
        return io + live

    # Batch tile: as big as the VMEM budget allows (per-grid-step overhead ~0.35 us).
    tb = _round_up(min(tile_b, _round_up(B, 8)), 8)
    while tb > 8 and weight_bytes + act_bytes(tb) > budget:
        tb = max(8, _round_up(tb // 2, 8))
    # Force >=2 grid steps only where a second TensorCore can pick them up (megacore);
    # on single-TC v5e/v6e the grid is a serial loop and the split is pure overhead.
    if _num_megacore_tcs() >= 2 and B >= 16 and pl.cdiv(B, tb) < 2:
        tb = max(8, _round_up(pl.cdiv(B, 2), 8))
    nb = pl.cdiv(B, tb)          # ragged last block: no wrapper-side jnp.pad HBM round trip

    if vmem_limit_bytes is None:
        need = weight_bytes + act_bytes(tb)
        vmem_limit_bytes = int(min(max(32 << 20, need * 5 // 4 + (4 << 20)), budget))

    out_shape = jax.ShapeDtypeStruct((B, O), jnp.float32)

    def run(single_buffer):
        n_grid = 2 if stream_layers else 1

        def const_spec(shape):
            zeros = (0,) * len(shape)
            imap = (lambda i, s: zeros) if n_grid == 2 else (lambda i: zeros)
            if single_buffer:
                # Grid-invariant blocks never use the 2nd pipeline buffer for overlap;
                # single-buffering halves their resident VMEM at zero perf cost.
                return pl.BlockSpec(shape, imap, pipeline_mode=pl.Buffered(1))
            return pl.BlockSpec(shape, imap)

        if stream_layers:
            grid = (nb, L)
            batch_map = lambda i, s: (i, 0)
            in_specs = [
                pl.BlockSpec((tb, d_x), batch_map),                 # x tile (f32)
                pl.BlockSpec((tb, d_y), batch_map),                 # outcome tile
                const_spec((d_x, Hp)),                              # W_in[:d_x]  (bf16)
                const_spec((d_y, Hp)),                              # W_in[d_x:]  (bf16)
                const_spec((1, Hp)),                                # b_in        (f32)
                pl.BlockSpec((1, Hp, Hp), lambda i, s: (s, 0, 0)),  # hidden W, streamed
                pl.BlockSpec((1, 1, Hp), lambda i, s: (s, 0, 0)),   # hidden b, streamed
                const_spec((Hp, O)),                                # W_out       (bf16)
                const_spec((1, O)),                                 # b_out       (f32)
            ]
            out_specs = pl.BlockSpec((tb, O), batch_map)            # unpadded output store
            scratch = [pltpu.VMEM((tb, Hp), jnp.float32)]           # h carried across layers
            dims = ("parallel", "arbitrary")
            kernel = functools.partial(_mlp_streamed_kernel, num_layers=L)
        else:
            grid = (nb,)
            batch_map = lambda i: (i, 0)
            in_specs = [
                pl.BlockSpec((tb, d_x), batch_map),
                pl.BlockSpec((tb, d_y), batch_map),
                const_spec((d_x, Hp)),
                const_spec((d_y, Hp)),
                const_spec((1, Hp)),
                const_spec((L, Hp, Hp)),                            # whole hidden stack
                const_spec((L, 1, Hp)),
                const_spec((Hp, O)),
                const_spec((1, O)),
            ]
            out_specs = pl.BlockSpec((tb, O), batch_map)
            scratch = []
            dims = ("parallel",)
            kernel = functools.partial(_mlp_resident_kernel, num_layers=L)

        return pl.pallas_call(
            kernel,
            out_shape=out_shape,
            grid_spec=pltpu.PrefetchScalarGridSpec(
                num_scalar_prefetch=0,
                grid=grid,
                in_specs=in_specs,
                out_specs=out_specs,
                scratch_shapes=scratch),
            compiler_params=pltpu.CompilerParams(
                dimension_semantics=dims,
                vmem_limit_bytes=vmem_limit_bytes),
        )(x, outcome, w_in_x, w_in_y, b_in, w_hid, b_hid, w_out, b_out)

    if single_buffer_weights:
        try:
            return run(True)
        except Exception:
            # If this jax build rejects pl.Buffered(1), fall back to the default
            # double-buffered weight blocks rather than failing the call.
            return run(False)
    return run(False)


# --------------------------------------------------------------------------------------
# Init + reference + demo
# --------------------------------------------------------------------------------------
def init_params(key, d_in, num_hid, num_layers, num_outputs):
    """Deterministic init mimicking torch.nn.Linear default (U[-1/sqrt(fan_in), +])."""
    ks = jax.random.split(key, 3)

    def lin(k, fan_in, fan_out):
        kw, kb = jax.random.split(k)
        bound = 1.0 / jnp.sqrt(jnp.float32(fan_in))
        w = jax.random.uniform(kw, (fan_in, fan_out), jnp.float32, -bound, bound)
        b = jax.random.uniform(kb, (1, fan_out), jnp.float32, -bound, bound)
        return w, b

    w_in, b_in = lin(ks[0], d_in, num_hid)
    khid = jax.random.split(ks[1], num_layers)
    ws, bs = zip(*(lin(khid[l], num_hid, num_hid) for l in range(num_layers)))
    w_hid = jnp.stack(ws)                       # (L, H, H)
    b_hid = jnp.stack(bs)                       # (L, 1, H)
    w_out, b_out = lin(ks[2], num_hid, num_outputs)
    return (w_in, b_in, w_hid, b_hid, w_out, b_out)


def reference_forward(x, outcome, params):
    """Pure-JAX reference with the same bf16-operand / f32-accumulate numerics."""
    w_in, b_in, w_hid, b_hid, w_out, b_out = params
    bf = lambda a: a.astype(jnp.bfloat16)
    h = jnp.dot(bf(jnp.concatenate((x, outcome), -1)), bf(w_in),
                preferred_element_type=jnp.float32) + b_in[0]
    for l in range(w_hid.shape[0]):
        h = jnp.maximum(h, 0.0)
        h = jnp.dot(bf(h), bf(w_hid[l]),
                    preferred_element_type=jnp.float32) + b_hid[l, 0]
    return jnp.dot(bf(h), bf(w_out),
                   preferred_element_type=jnp.float32) + b_out[0]


if __name__ == "__main__":
    # Module hyperparameters (small, consistent with the PyTorch __init__):
    num_tokens = 2
    max_len = 8
    num_hid = 32
    num_layers = 2
    num_outputs = 4
    batch = 500            # deliberately NOT a tile multiple: exercises the ragged last block

    d_x = num_tokens * max_len
    d_y = num_tokens * max_len
    d_in = d_x + d_y       # == num_tokens * max_len * 2

    key = jax.random.PRNGKey(0)
    kx, ky, kp = jax.random.split(key, 3)
    x = jax.random.normal(kx, (batch, d_x), jnp.float32)
    outcome = jax.random.normal(ky, (batch, d_y), jnp.float32)

    params = init_params(kp, d_in, num_hid, num_layers, num_outputs)
    prepared = prepare_params(params, d_x)
    ref = reference_forward(x, outcome, params)

    # 1) default config: resident weights, large batch tile (ragged, no padding copy).
    out = jax.block_until_ready(gfn_mlp_forward(x, outcome, prepared, num_outputs))
    assert out.shape == (batch, num_outputs)
    assert jnp.allclose(out, ref, atol=1e-2, rtol=1e-2), "resident path mismatch"

    # 2) multi-tile batch with a ragged last block (500 = 3*128 + 116).
    out2 = jax.block_until_ready(
        gfn_mlp_forward(x, outcome, prepared, num_outputs, tile_b=128))
    assert jnp.allclose(out2, ref, atol=1e-2, rtol=1e-2), "ragged-tile path mismatch"

    # 3) forced per-layer weight streaming (the large-H / v7x path), also multi-tile.
    out3 = jax.block_until_ready(
        gfn_mlp_forward(x, outcome, prepared, num_outputs, tile_b=128, stream_layers=True))
    assert jnp.allclose(out3, ref, atol=1e-2, rtol=1e-2), "streamed path mismatch"

    print("KERNEL_OK")
</pallas_src>

<mosaic_0001>
module attributes {stable_mosaic.version = 11 : i64} {
  func.func @_mlp_resident_kernel(%arg0: i32, %arg1: memref<504x16xf32, #tpu.memory_space<vmem>>, %arg2: memref<504x16xf32, #tpu.memory_space<vmem>>, %arg3: memref<16x128xbf16, #tpu.memory_space<vmem>>, %arg4: memref<16x128xbf16, #tpu.memory_space<vmem>>, %arg5: memref<1x128xf32, #tpu.memory_space<vmem>>, %arg6: memref<2x128x128xbf16, #tpu.memory_space<vmem>>, %arg7: memref<2x1x128xf32, #tpu.memory_space<vmem>>, %arg8: memref<128x4xbf16, #tpu.memory_space<vmem>>, %arg9: memref<1x4xf32, #tpu.memory_space<vmem>>, %arg10: memref<504x4xf32, #tpu.memory_space<vmem>>) attributes {dimension_semantics = [#tpu.dimension_semantics<parallel>], iteration_bounds = array<i64: 1>, scalar_prefetch = 0 : i64, scratch_operands = 0 : i64, tpu.core_type = #tpu.core_type<tc>, window_params = [{transform_indices = @transform_0, window_bounds = array<i64: 504, 16>}, {transform_indices = @transform_1, window_bounds = array<i64: 504, 16>}, {pipeline_mode = #tpu.pipeline_mode<synchronous>, transform_indices = @transform_2, window_bounds = array<i64: 16, 128>}, {pipeline_mode = #tpu.pipeline_mode<synchronous>, transform_indices = @transform_3, window_bounds = array<i64: 16, 128>}, {pipeline_mode = #tpu.pipeline_mode<synchronous>, transform_indices = @transform_4, window_bounds = array<i64: 1, 128>}, {pipeline_mode = #tpu.pipeline_mode<synchronous>, transform_indices = @transform_5, window_bounds = array<i64: 2, 128, 128>}, {pipeline_mode = #tpu.pipeline_mode<synchronous>, transform_indices = @transform_6, window_bounds = array<i64: 2, 1, 128>}, {pipeline_mode = #tpu.pipeline_mode<synchronous>, transform_indices = @transform_7, window_bounds = array<i64: 128, 4>}, {pipeline_mode = #tpu.pipeline_mode<synchronous>, transform_indices = @transform_8, window_bounds = array<i64: 1, 4>}, {transform_indices = @transform_9, window_bounds = array<i64: 504, 4>}]} {
    %c0 = arith.constant 0 : index
    %c0_0 = arith.constant 0 : index
    %0 = vector.load %arg1[%c0, %c0_0] : memref<504x16xf32, #tpu.memory_space<vmem>>, vector<504x16xf32>
    %1 = arith.truncf %0 : vector<504x16xf32> to vector<504x16xbf16>
    %c0_1 = arith.constant 0 : index
    %c0_2 = arith.constant 0 : index
    %2 = vector.load %arg3[%c0_1, %c0_2] : memref<16x128xbf16, #tpu.memory_space<vmem>>, vector<16x128xbf16>
    %cst = arith.constant dense<0.000000e+00> : vector<504x128xf32>
    %3 = tpu.matmul %1, %2, %cst {dimension_numbers = #tpu.dot_dimension_numbers<[1], [0], [0], [1], [0, 0, 1, 1], [], []>} : vector<504x16xbf16>, vector<16x128xbf16>, vector<504x128xf32> -> vector<504x128xf32>
    %c0_3 = arith.constant 0 : index
    %c0_4 = arith.constant 0 : index
    %4 = vector.load %arg2[%c0_3, %c0_4] : memref<504x16xf32, #tpu.memory_space<vmem>>, vector<504x16xf32>
    %5 = arith.truncf %4 : vector<504x16xf32> to vector<504x16xbf16>
    %c0_5 = arith.constant 0 : index
    %c0_6 = arith.constant 0 : index
    %6 = vector.load %arg4[%c0_5, %c0_6] : memref<16x128xbf16, #tpu.memory_space<vmem>>, vector<16x128xbf16>
    %cst_7 = arith.constant dense<0.000000e+00> : vector<504x128xf32>
    %7 = tpu.matmul %5, %6, %cst_7 {dimension_numbers = #tpu.dot_dimension_numbers<[1], [0], [0], [1], [0, 0, 1, 1], [], []>} : vector<504x16xbf16>, vector<16x128xbf16>, vector<504x128xf32> -> vector<504x128xf32>
    %8 = arith.addf %3, %7 : vector<504x128xf32>
    %c0_8 = arith.constant 0 : index
    %c0_9 = arith.constant 0 : index
    %9 = vector.load %arg5[%c0_8, %c0_9] : memref<1x128xf32, #tpu.memory_space<vmem>>, vector<1x128xf32>
    %10 = vector.broadcast %9 : vector<1x128xf32> to vector<504x128xf32>
    %11 = arith.addf %8, %10 : vector<504x128xf32>
    %cst_10 = arith.constant 0.000000e+00 : f32
    %12 = vector.broadcast %cst_10 : f32 to vector<504x128xf32>
    %13 = arith.maximumf %11, %12 : vector<504x128xf32>
    %14 = arith.truncf %13 : vector<504x128xf32> to vector<504x128xbf16>
    %c0_11 = arith.constant 0 : index
    %c0_12 = arith.constant 0 : index
    %c0_13 = arith.constant 0 : index
    %15 = vector.load %arg6[%c0_11, %c0_12, %c0_13] : memref<2x128x128xbf16, #tpu.memory_space<vmem>>, vector<1x128x128xbf16>
    %16 = vector.shape_cast %15 : vector<1x128x128xbf16> to vector<128x128xbf16>
    %cst_14 = arith.constant dense<0.000000e+00> : vector<504x128xf32>
    %17 = tpu.matmul %14, %16, %cst_14 {dimension_numbers = #tpu.dot_dimension_numbers<[1], [0], [0], [1], [0, 0, 1, 1], [], []>} : vector<504x128xbf16>, vector<128x128xbf16>, vector<504x128xf32> -> vector<504x128xf32>
    %c0_15 = arith.constant 0 : index
    %c0_16 = arith.constant 0 : index
    %c0_17 = arith.constant 0 : index
    %18 = vector.load %arg7[%c0_15, %c0_16, %c0_17] : memref<2x1x128xf32, #tpu.memory_space<vmem>>, vector<1x1x128xf32>
    %19 = vector.shape_cast %18 : vector<1x1x128xf32> to vector<1x128xf32>
    %20 = vector.broadcast %19 : vector<1x128xf32> to vector<504x128xf32>
    %21 = arith.addf %17, %20 : vector<504x128xf32>
    %cst_18 = arith.constant 0.000000e+00 : f32
    %22 = vector.broadcast %cst_18 : f32 to vector<504x128xf32>
    %23 = arith.maximumf %21, %22 : vector<504x128xf32>
    %24 = arith.truncf %23 : vector<504x128xf32> to vector<504x128xbf16>
    %c1 = arith.constant 1 : index
    %c0_19 = arith.constant 0 : index
    %c0_20 = arith.constant 0 : index
    %25 = vector.load %arg6[%c1, %c0_19, %c0_20] : memref<2x128x128xbf16, #tpu.memory_space<vmem>>, vector<1x128x128xbf16>
    %26 = vector.shape_cast %25 : vector<1x128x128xbf16> to vector<128x128xbf16>
    %cst_21 = arith.constant dense<0.000000e+00> : vector<504x128xf32>
    %27 = tpu.matmul %24, %26, %cst_21 {dimension_numbers = #tpu.dot_dimension_numbers<[1], [0], [0], [1], [0, 0, 1, 1], [], []>} : vector<504x128xbf16>, vector<128x128xbf16>, vector<504x128xf32> -> vector<504x128xf32>
    %c1_22 = arith.constant 1 : index
    %c0_23 = arith.constant 0 : index
    %c0_24 = arith.constant 0 : index
    %28 = vector.load %arg7[%c1_22, %c0_23, %c0_24] : memref<2x1x128xf32, #tpu.memory_space<vmem>>, vector<1x1x128xf32>
    %29 = vector.shape_cast %28 : vector<1x1x128xf32> to vector<1x128xf32>
    %30 = vector.broadcast %29 : vector<1x128xf32> to vector<504x128xf32>
    %31 = arith.addf %27, %30 : vector<504x128xf32>
    %32 = arith.truncf %31 : vector<504x128xf32> to vector<504x128xbf16>
    %c0_25 = arith.constant 0 : index
    %c0_26 = arith.constant 0 : index
    %33 = vector.load %arg8[%c0_25, %c0_26] : memref<128x4xbf16, #tpu.memory_space<vmem>>, vector<128x4xbf16>
    %cst_27 = arith.constant dense<0.000000e+00> : vector<504x4xf32>
    %34 = tpu.matmul %32, %33, %cst_27 {dimension_numbers = #tpu.dot_dimension_numbers<[1], [0], [0], [1], [0, 0, 1, 1], [], []>} : vector<504x128xbf16>, vector<128x4xbf16>, vector<504x4xf32> -> vector<504x4xf32>
    %c0_28 = arith.constant 0 : index
    %c0_29 = arith.constant 0 : index
    %35 = vector.load %arg9[%c0_28, %c0_29] : memref<1x4xf32, #tpu.memory_space<vmem>>, vector<1x4xf32>
    %36 = vector.broadcast %35 : vector<1x4xf32> to vector<504x4xf32>
    %37 = arith.addf %34, %36 : vector<504x4xf32>
    %c0_30 = arith.constant 0 : index
    %c0_31 = arith.constant 0 : index
    %38 = vector.load %arg10[%c0_30, %c0_31] : memref<504x4xf32, #tpu.memory_space<vmem>>, vector<504x4xf32>
    tpu.vector_store %arg10[%c0_30, %c0_31], %37 {strides = array<i32>} : memref<504x4xf32, #tpu.memory_space<vmem>>, vector<504x4xf32>,
    return
  }
  func.func @transform_0(%arg0: i32) -> (i32, i32) {
    %c0_i32 = arith.constant 0 : i32
    %c0_i32_0 = arith.constant 0 : i32
    return %arg0, %c0_i32 : i32, i32
  }
  func.func @transform_1(%arg0: i32) -> (i32, i32) {
    %c0_i32 = arith.constant 0 : i32
    %c0_i32_0 = arith.constant 0 : i32
    return %arg0, %c0_i32 : i32, i32
  }
  func.func @transform_2(%arg0: i32) -> (i32, i32) {
    %c0_i32 = arith.constant 0 : i32
    %c0_i32_0 = arith.constant 0 : i32
    %c0_i32_1 = arith.constant 0 : i32
    return %c0_i32, %c0_i32_0 : i32, i32
  }
  func.func @transform_3(%arg0: i32) -> (i32, i32) {
    %c0_i32 = arith.constant 0 : i32
    %c0_i32_0 = arith.constant 0 : i32
    %c0_i32_1 = arith.constant 0 : i32
    return %c0_i32, %c0_i32_0 : i32, i32
  }
  func.func @transform_4(%arg0: i32) -> (i32, i32) {
    %c0_i32 = arith.constant 0 : i32
    %c0_i32_0 = arith.constant 0 : i32
    %c0_i32_1 = arith.constant 0 : i32
    return %c0_i32, %c0_i32_0 : i32, i32
  }
  func.func @transform_5(%arg0: i32) -> (i32, i32, i32) {
    %c0_i32 = arith.constant 0 : i32
    %c0_i32_0 = arith.constant 0 : i32
    %c0_i32_1 = arith.constant 0 : i32
    %c0_i32_2 = arith.constant 0 : i32
    return %c0_i32, %c0_i32_0, %c0_i32_1 : i32, i32, i32
  }
  func.func @transform_6(%arg0: i32) -> (i32, i32, i32) {
    %c0_i32 = arith.constant 0 : i32
    %c0_i32_0 = arith.constant 0 : i32
    %c0_i32_1 = arith.constant 0 : i32
    %c0_i32_2 = arith.constant 0 : i32
    return %c0_i32, %c0_i32_0, %c0_i32_1 : i32, i32, i32
  }
  func.func @transform_7(%arg0: i32) -> (i32, i32) {
    %c0_i32 = arith.constant 0 : i32
    %c0_i32_0 = arith.constant 0 : i32
    %c0_i32_1 = arith.constant 0 : i32
    return %c0_i32, %c0_i32_0 : i32, i32
  }
  func.func @transform_8(%arg0: i32) -> (i32, i32) {
    %c0_i32 = arith.constant 0 : i32
    %c0_i32_0 = arith.constant 0 : i32
    %c0_i32_1 = arith.constant 0 : i32
    return %c0_i32, %c0_i32_0 : i32, i32
  }
  func.func @transform_9(%arg0: i32) -> (i32, i32) {
    %c0_i32 = arith.constant 0 : i32
    %c0_i32_0 = arith.constant 0 : i32
    return %arg0, %c0_i32 : i32, i32
  }
}

module attributes {stable_mosaic.version = 11 : i64} {
  func.func @_mlp_resident_kernel(%arg0: i32, %arg1: memref<504x16xf32, #tpu.memory_space<vmem>>, %arg2: memref<504x16xf32, #tpu.memory_space<vmem>>, %arg3: memref<16x128xbf16, #tpu.memory_space<vmem>>, %arg4: memref<16x128xbf16, #tpu.memory_space<vmem>>, %arg5: memref<1x128xf32, #tpu.memory_space<vmem>>, %arg6: memref<2x128x128xbf16, #tpu.memory_space<vmem>>, %arg7: memref<2x1x128xf32, #tpu.memory_space<vmem>>, %arg8: memref<128x4xbf16, #tpu.memory_space<vmem>>, %arg9: memref<1x4xf32, #tpu.memory_space<vmem>>, %arg10: memref<504x4xf32, #tpu.memory_space<vmem>>) attributes {dimension_semantics = [#tpu.dimension_semantics<parallel>], iteration_bounds = array<i64: 1>, scalar_prefetch = 0 : i64, scratch_operands = 0 : i64, tpu.core_type = #tpu.core_type<tc>, window_params = [{transform_indices = @transform_0, window_bounds = array<i64: 504, 16>}, {transform_indices = @transform_1, window_bounds = array<i64: 504, 16>}, {pipeline_mode = #tpu.pipeline_mode<synchronous>, transform_indices = @transform_2, window_bounds = array<i64: 16, 128>}, {pipeline_mode = #tpu.pipeline_mode<synchronous>, transform_indices = @transform_3, window_bounds = array<i64: 16, 128>}, {pipeline_mode = #tpu.pipeline_mode<synchronous>, transform_indices = @transform_4, window_bounds = array<i64: 1, 128>}, {pipeline_mode = #tpu.pipeline_mode<synchronous>, transform_indices = @transform_5, window_bounds = array<i64: 2, 128, 128>}, {pipeline_mode = #tpu.pipeline_mode<synchronous>, transform_indices = @transform_6, window_bounds = array<i64: 2, 1, 128>}, {pipeline_mode = #tpu.pipeline_mode<synchronous>, transform_indices = @transform_7, window_bounds = array<i64: 128, 4>}, {pipeline_mode = #tpu.pipeline_mode<synchronous>, transform_indices = @transform_8, window_bounds = array<i64: 1, 4>}, {transform_indices = @transform_9, window_bounds = array<i64: 504, 4>}]} {
    %c0 = arith.constant 0 : index
    %c0_0 = arith.constant 0 : index
    %0 = vector.load %arg1[%c0, %c0_0] : memref<504x16xf32, #tpu.memory_space<vmem>>, vector<504x16xf32>
    %1 = arith.truncf %0 : vector<504x16xf32> to vector<504x16xbf16>
    %c0_1 = arith.constant 0 : index
    %c0_2 = arith.constant 0 : index
    %2 = vector.load %arg3[%c0_1, %c0_2] : memref<16x128xbf16, #tpu.memory_space<vmem>>, vector<16x128xbf16>
    %cst = arith.constant dense<0.000000e+00> : vector<504x128xf32>
    %3 = tpu.matmul %1, %2, %cst {dimension_numbers = #tpu.dot_dimension_numbers<[1], [0], [0], [1], [0, 0, 1, 1], [], []>} : vector<504x16xbf16>, vector<16x128xbf16>, vector<504x128xf32> -> vector<504x128xf32>
    %c0_3 = arith.constant 0 : index
    %c0_4 = arith.constant 0 : index
    %4 = vector.load %arg2[%c0_3, %c0_4] : memref<504x16xf32, #tpu.memory_space<vmem>>, vector<504x16xf32>
    %5 = arith.truncf %4 : vector<504x16xf32> to vector<504x16xbf16>
    %c0_5 = arith.constant 0 : index
    %c0_6 = arith.constant 0 : index
    %6 = vector.load %arg4[%c0_5, %c0_6] : memref<16x128xbf16, #tpu.memory_space<vmem>>, vector<16x128xbf16>
    %cst_7 = arith.constant dense<0.000000e+00> : vector<504x128xf32>
    %7 = tpu.matmul %5, %6, %cst_7 {dimension_numbers = #tpu.dot_dimension_numbers<[1], [0], [0], [1], [0, 0, 1, 1], [], []>} : vector<504x16xbf16>, vector<16x128xbf16>, vector<504x128xf32> -> vector<504x128xf32>
    %8 = arith.addf %3, %7 : vector<504x128xf32>
    %c0_8 = arith.constant 0 : index
    %c0_9 = arith.constant 0 : index
    %9 = vector.load %arg5[%c0_8, %c0_9] : memref<1x128xf32, #tpu.memory_space<vmem>>, vector<1x128xf32>
    %10 = vector.broadcast %9 : vector<1x128xf32> to vector<504x128xf32>
    %11 = arith.addf %8, %10 : vector<504x128xf32>
    %cst_10 = arith.constant 0.000000e+00 : f32
    %12 = vector.broadcast %cst_10 : f32 to vector<504x128xf32>
    %13 = arith.maximumf %11, %12 : vector<504x128xf32>
    %14 = arith.truncf %13 : vector<504x128xf32> to vector<504x128xbf16>
    %c0_11 = arith.constant 0 : index
    %c0_12 = arith.constant 0 : index
    %c0_13 = arith.constant 0 : index
    %15 = vector.load %arg6[%c0_11, %c0_12, %c0_13] : memref<2x128x128xbf16, #tpu.memory_space<vmem>>, vector<1x128x128xbf16>
    %16 = vector.shape_cast %15 : vector<1x128x128xbf16> to vector<128x128xbf16>
    %cst_14 = arith.constant dense<0.000000e+00> : vector<504x128xf32>
    %17 = tpu.matmul %14, %16, %cst_14 {dimension_numbers = #tpu.dot_dimension_numbers<[1], [0], [0], [1], [0, 0, 1, 1], [], []>} : vector<504x128xbf16>, vector<128x128xbf16>, vector<504x128xf32> -> vector<504x128xf32>
    %c0_15 = arith.constant 0 : index
    %c0_16 = arith.constant 0 : index
    %c0_17 = arith.constant 0 : index
    %18 = vector.load %arg7[%c0_15, %c0_16, %c0_17] : memref<2x1x128xf32, #tpu.memory_space<vmem>>, vector<1x1x128xf32>
    %19 = vector.shape_cast %18 : vector<1x1x128xf32> to vector<1x128xf32>
    %20 = vector.broadcast %19 : vector<1x128xf32> to vector<504x128xf32>
    %21 = arith.addf %17, %20 : vector<504x128xf32>
    %cst_18 = arith.constant 0.000000e+00 : f32
    %22 = vector.broadcast %cst_18 : f32 to vector<504x128xf32>
    %23 = arith.maximumf %21, %22 : vector<504x128xf32>
    %24 = arith.truncf %23 : vector<504x128xf32> to vector<504x128xbf16>
    %c1 = arith.constant 1 : index
    %c0_19 = arith.constant 0 : index
    %c0_20 = arith.constant 0 : index
    %25 = vector.load %arg6[%c1, %c0_19, %c0_20] : memref<2x128x128xbf16, #tpu.memory_space<vmem>>, vector<1x128x128xbf16>
    %26 = vector.shape_cast %25 : vector<1x128x128xbf16> to vector<128x128xbf16>
    %cst_21 = arith.constant dense<0.000000e+00> : vector<504x128xf32>
    %27 = tpu.matmul %24, %26, %cst_21 {dimension_numbers = #tpu.dot_dimension_numbers<[1], [0], [0], [1], [0, 0, 1, 1], [], []>} : vector<504x128xbf16>, vector<128x128xbf16>, vector<504x128xf32> -> vector<504x128xf32>
    %c1_22 = arith.constant 1 : index
    %c0_23 = arith.constant 0 : index
    %c0_24 = arith.constant 0 : index
    %28 = vector.load %arg7[%c1_22, %c0_23, %c0_24] : memref<2x1x128xf32, #tpu.memory_space<vmem>>, vector<1x1x128xf32>
    %29 = vector.shape_cast %28 : vector<1x1x128xf32> to vector<1x128xf32>
    %30 = vector.broadcast %29 : vector<1x128xf32> to vector<504x128xf32>
    %31 = arith.addf %27, %30 : vector<504x128xf32>
    %32 = arith.truncf %31 : vector<504x128xf32> to vector<504x128xbf16>
    %c0_25 = arith.constant 0 : index
    %c0_26 = arith.constant 0 : index
    %33 = vector.load %arg8[%c0_25, %c0_26] : memref<128x4xbf16, #tpu.memory_space<vmem>>, vector<128x4xbf16>
    %cst_27 = arith.constant dense<0.000000e+00> : vector<504x4xf32>
    %34 = tpu.matmul %32, %33, %cst_27 {dimension_numbers = #tpu.dot_dimension_numbers<[1], [0], [0], [1], [0, 0, 1, 1], [], []>} : vector<504x128xbf16>, vector<128x4xbf16>, vector<504x4xf32> -> vector<504x4xf32>
    %c0_28 = arith.constant 0 : index
    %c0_29 = arith.constant 0 : index
    %35 = vector.load %arg9[%c0_28, %c0_29] : memref<1x4xf32, #tpu.memory_space<vmem>>, vector<1x4xf32>
    %36 = vector.broadcast %35 : vector<1x4xf32> to vector<504x4xf32>
    %37 = arith.addf %34, %36 : vector<504x4xf32>
    %c0_30 = arith.constant 0 : index
    %c0_31 = arith.constant 0 : index
    %38 = vector.load %arg10[%c0_30, %c0_31] : memref<504x4xf32, #tpu.memory_space<vmem>>, vector<504x4xf32>
    tpu.vector_store %arg10[%c0_30, %c0_31], %37 {strides = array<i32>} : memref<504x4xf32, #tpu.memory_space<vmem>>, vector<504x4xf32>,
    return
  }
  func.func @transform_0(%arg0: i32) -> (i32, i32) {
    %c0_i32 = arith.constant 0 : i32
    %c0_i32_0 = arith.constant 0 : i32
    return %arg0, %c0_i32 : i32, i32
  }
  func.func @transform_1(%arg0: i32) -> (i32, i32) {
    %c0_i32 = arith.constant 0 : i32
    %c0_i32_0 = arith.constant 0 : i32
    return %arg0, %c0_i32 : i32, i32
  }
  func.func @transform_2(%arg0: i32) -> (i32, i32) {
    %c0_i32 = arith.constant 0 : i32
    %c0_i32_0 = arith.constant 0 : i32
    %c0_i32_1 = arith.constant 0 : i32
    return %c0_i32, %c0_i32_0 : i32, i32
  }
  func.func @transform_3(%arg0: i32) -> (i32, i32) {
    %c0_i32 = arith.constant 0 : i32
    %c0_i32_0 = arith.constant 0 : i32
    %c0_i32_1 = arith.constant 0 : i32
    return %c0_i32, %c0_i32_0 : i32, i32
  }
  func.func @transform_4(%arg0: i32) -> (i32, i32) {
    %c0_i32 = arith.constant 0 : i32
    %c0_i32_0 = arith.constant 0 : i32
    %c0_i32_1 = arith.constant 0 : i32
    return %c0_i32, %c0_i32_0 : i32, i32
  }
  func.func @transform_5(%arg0: i32) -> (i32, i32, i32) {
    %c0_i32 = arith.constant 0 : i32
    %c0_i32_0 = arith.constant 0 : i32
    %c0_i32_1 = arith.constant 0 : i32
    %c0_i32_2 = arith.constant 0 : i32
    return %c0_i32, %c0_i32_0, %c0_i32_1 : i32, i32, i32
  }
  func.func @transform_6(%arg0: i32) -> (i32, i32, i32) {
    %c0_i32 = arith.constant 0 : i32
    %c0_i32_0 = arith.constant 0 : i32
    %c0_i32_1 = arith.constant 0 : i32
    %c0_i32_2 = arith.constant 0 : i32
    return %c0_i32, %c0_i32_0, %c0_i32_1 : i32, i32, i32
  }
  func.func @transform_7(%arg0: i32) -> (i32, i32) {
    %c0_i32 = arith.constant 0 : i32
    %c0_i32_0 = arith.constant 0 : i32
    %c0_i32_1 = arith.constant 0 : i32
    return %c0_i32, %c0_i32_0 : i32, i32
  }
  func.func @transform_8(%arg0: i32) -> (i32, i32) {
    %c0_i32 = arith.constant 0 : i32
    %c0_i32_0 = arith.constant 0 : i32
    %c0_i32_1 = arith.constant 0 : i32
    return %c0_i32, %c0_i32_0 : i32, i32
  }
  func.func @transform_9(%arg0: i32) -> (i32, i32) {
    %c0_i32 = arith.constant 0 : i32
    %c0_i32_0 = arith.constant 0 : i32
    return %arg0, %c0_i32 : i32, i32
  }
}

</mosaic_0001>

<bundles_post_ra>
// kernel: tpu_custom_call.1
= control target key start
LH: loop header
LB: loop body
LE: loop exit
PB: predicated region body
PF: predicated region fallthrough
CT: control target
= control target key end

     0   :  { %vm233_vm0 = vcmask 130048   ;;  %vm1767_vm1 = vcmask 31744   ;;  %s3308_s3 = inlined_call_operand.vmem [shape: bf16[16,128], index: 3, kind: input, shape index: {}]   ;;  %s3309_s1 = inlined_call_operand.vmem [shape: f32[500,16], index: 1, kind: input, shape index: {}]   ;;  %s3310_s2 = inlined_call_operand.vmem [shape: bf16[16,128], index: 2, kind: input, shape index: {}]   ;;  %s3311_s5 = inlined_call_operand.vmem [shape: bf16[2,128,128], index: 5, kind: input, shape index: {}]   ;;  %s3312_s4 = inlined_call_operand.vmem [shape: f32[1,128], index: 4, kind: input, shape index: {}]   ;;  %s3313_s0 = inlined_call_operand.vmem [shape: f32[500,16], index: 0, kind: input, shape index: {}]   ;;  %s3314_s6 = inlined_call_operand.vmem [shape: f32[2,1,128], index: 6, kind: input, shape index: {}]   ;;  %s3315_s7 = inlined_call_operand.vmem [shape: bf16[128,4], index: 7, kind: input, shape index: {}]   ;;  %s3316_s8 = inlined_call_operand.vmem [shape: f32[1,4], index: 8, kind: input, shape index: {}]   ;;  %s3317_s9 = inlined_call_operand.vmem [shape: f32[500,4], index: 9, kind: output, shape index: {}]  }
   0x1   :  { %v2021_v0 = vld [vmem:[%s3308_s3] sm:$0xff]  ;;  %v148_v1 = vld [vmem:[%s3309_s1 + $0x90] sm:$0xff]  ;;  %v149_v2 = vld [vmem:[%s3309_s1 + $0x98] sm:$0xff] }
   0x2   :  { %v202_v3 = vpack.c.bf16 %v149_v2, %v148_v1  ;;  %v2020_v4 = vld [vmem:[%s3310_s2] sm:$0xff]  ;;  %2046 = vmatpush.bf16.msra.mxu1 %v2021_v0  ;;  %337 = vmatpush.bf16.msra.mxu0 %v2021_v0  ;;  %v151_v6 = vld [vmem:[%s3309_s1 + $0xa8] sm:$0xff]  ;;  %v152_v8 = vld [vmem:[%s3309_s1 + $0xb0] sm:$0xff] }
   0x3   :  { %2047 = vmatpush.bf16.msra.mxu2 %v2021_v0  ;;  %2048 = vmatpush.bf16.msra.mxu3 %v2021_v0  ;;  %v150_v5 = vld [vmem:[%s3309_s1 + $0xa0] sm:$0xff]  ;;  %v153_v9 = vld [vmem:[%s3309_s1 + $0xb8] sm:$0xff]  ;;  %v155_v12 = vld [vmem:[%s3309_s1 + $0xc8] sm:$0xff] }
   0x4   :  { %v203_v7 = vpack.c.bf16 %v151_v6, %v150_v5  ;;  %v204_v10 = vpack.c.bf16 %v153_v9, %v152_v8  ;;  %v154_v11 = vld [vmem:[%s3309_s1 + $0xc0] sm:$0xff]  ;;  %v156_v14 = vld [vmem:[%s3309_s1 + $0xd0] sm:$0xff]  ;;  %v157_v15 = vld [vmem:[%s3309_s1 + $0xd8] sm:$0xff] }
   0x5   :  { %1848 = vmatmul.msk.bf16.vlgmr.msra.gmra.mxu1 %vm233_vm0, %v202_v3  ;;  %v205_v13 = vpack.c.bf16 %v155_v12, %v154_v11  ;;  %v206_v16 = vpack.c.bf16 %v157_v15, %v156_v14  ;;  %v158_v17 = vld [vmem:[%s3309_s1 + $0xe0] sm:$0xff]  ;;  %v159_v18 = vld [vmem:[%s3309_s1 + $0xe8] sm:$0xff]  ;;  %v160_v20 = vld [vmem:[%s3309_s1 + $0xf0] sm:$0xff] }
   0x6   :  { %607 = vmatpush.bf16.msrb.mxu1 %v2020_v4  ;;  %v207_v19 = vpack.c.bf16 %v159_v18, %v158_v17  ;;  %v161_v21 = vld [vmem:[%s3309_s1 + $0xf8] sm:$0xff]  ;;  %v130_v23 = vld [vmem:[%s3309_s1] sm:$0xff]  ;;  %v131_v24 = vld [vmem:[%s3309_s1 + $0x8] sm:$0xff] }
   0x7   :  { %v208_v22 = vpack.c.bf16 %v161_v21, %v160_v20  ;;  %v193_v25 = vpack.c.bf16 %v131_v24, %v130_v23  ;;  %v162_v26 = vld [vmem:[%s3309_s1 + $0x100] sm:$0xff]  ;;  %v163_v27 = vld [vmem:[%s3309_s1 + $0x108] sm:$0xff]  ;;  %v132_v32 = vld [vmem:[%s3309_s1 + $0x10] sm:$0xff] }
   0x8   :  { %v209_v28 = vpack.c.bf16 %v163_v27, %v162_v26  ;;  %v166_v29 = vld [vmem:[%s3309_s1 + $0x120] sm:$0xff]  ;;  %v167_v30 = vld [vmem:[%s3309_s1 + $0x128] sm:$0xff]  ;;  %v133_v33 = vld [vmem:[%s3309_s1 + $0x18] sm:$0xff] }
   0x9   :  { %1839 = vmatmul.msk.bf16.vlgmr.msra.gmra.mxu0 %vm233_vm0, %v193_v25  ;;  %v211_v31 = vpack.c.bf16 %v167_v30, %v166_v29  ;;  %v194_v34 = vpack.c.bf16 %v133_v33, %v132_v32  ;;  %v164_v35 = vld [vmem:[%s3309_s1 + $0x110] sm:$0xff]  ;;  %v165_v36 = vld [vmem:[%s3309_s1 + $0x118] sm:$0xff]  ;;  %v134_v44 = vld [vmem:[%s3309_s1 + $0x20] sm:$0xff] }
   0xa   :  { %v210_v37 = vpack.c.bf16 %v165_v36, %v164_v35  ;;  %v2029_v39 = vld [vmem:[%s3311_s5 + $0x38] sm:$0xff]  ;;  %v168_v40 = vld [vmem:[%s3309_s1 + $0x130] sm:$0xff]  ;;  %v135_v45 = vld [vmem:[%s3309_s1 + $0x28] sm:$0xff] }
   0xb   :  { %1857 = vmatmul.msk.bf16.vlgmr.msra.gmra.mxu2 %vm233_vm0, %v211_v31  ;;  %v169_v41 = vld [vmem:[%s3309_s1 + $0x138] sm:$0xff]  ;;  %v195_v46 = vpack.c.bf16 %v135_v45, %v134_v44  ;;  %v33_v47 = vld [vmem:[%s3313_s0] sm:$0xff]  ;;  %v34_v48 = vld [vmem:[%s3313_s0 + $0x8] sm:$0xff] }
   0xc   :  { %998 = vmatpush.bf16.msrb.mxu2 %v2029_v39  ;;  %v212_v42 = vpack.c.bf16 %v169_v41, %v168_v40  ;;  %v96_v49 = vpack.c.bf16 %v34_v48, %v33_v47  ;;  %v2028_v51 = vld [vmem:[%s3311_s5 + $0x30] sm:$0xff]  ;;  %v170_v52 = vld [vmem:[%s3309_s1 + $0x140] sm:$0xff]  ;;  %v171_v53 = vld [vmem:[%s3309_s1 + $0x148] sm:$0xff] }
   0xd   :  { %v213_v54 = vpack.c.bf16 %v171_v53, %v170_v52  ;;  %v136_v56 = vld [vmem:[%s3309_s1 + $0x30] sm:$0xff]  ;;  %v137_v57 = vld [vmem:[%s3309_s1 + $0x38] sm:$0xff]  ;;  %v2027_v63 = vld [vmem:[%s3311_s5 + $0x28] sm:$0xff] }
   0xe   :  { %v196_v58 = vpack.c.bf16 %v137_v57, %v136_v56  ;;  %v35_v59 = vld [vmem:[%s3313_s0 + $0x10] sm:$0xff]  ;;  %v36_v60 = vld [vmem:[%s3313_s0 + $0x18] sm:$0xff]  ;;  %v138_v4 = vld [vmem:[%s3309_s1 + $0x40] sm:$0xff] }
   0xf   :  { %v97_v61 = vpack.c.bf16 %v36_v60, %v35_v59  ;;  %v172_v0 = vld [vmem:[%s3309_s1 + $0x150] sm:$0xff]  ;;  %v173_v1 = vld [vmem:[%s3309_s1 + $0x158] sm:$0xff]  ;;  %v139_v5 = vld [vmem:[%s3309_s1 + $0x48] sm:$0xff] }
  0x10   :  { %999 = vmatpush.bf16.msrb.mxu2 %v2028_v51  ;;  %v214_v2 = vpack.c.bf16 %v173_v1, %v172_v0  ;;  %v197_v6 = vpack.c.bf16 %v139_v5, %v138_v4  ;;  %v38_v8 = vld [vmem:[%s3313_s0 + $0x28] sm:$0xff]  ;;  %v2026_v11 = vld [vmem:[%s3311_s5 + $0x20] sm:$0xff]  ;;  %v141_v17 = vld [vmem:[%s3309_s1 + $0x58] sm:$0xff] }
  0x11   :  { %v174_v12 = vld [vmem:[%s3309_s1 + $0x160] sm:$0xff]  ;;  %v40_v20 = vld [vmem:[%s3313_s0 + $0x38] sm:$0xff]  ;;  %v176_v24 = vld [vmem:[%s3309_s1 + $0x170] sm:$0xff] }
  0x12   :  { %v2025_v23 = vld [vmem:[%s3311_s5 + $0x18] sm:$0xff]  ;;  %v143_v29 = vld [vmem:[%s3309_s1 + $0x68] sm:$0xff]  ;;  %v41_v31 = vld [vmem:[%s3313_s0 + $0x40] sm:$0xff] }
  0x13   :  { %v177_v25 = vld [vmem:[%s3309_s1 + $0x178] sm:$0xff]  ;;  %v42_v32 = vld [vmem:[%s3313_s0 + $0x48] sm:$0xff]  ;;  %v2024_v35 = vld [vmem:[%s3311_s5 + $0x10] sm:$0xff] }
  0x14   :  { %1000 = vmatpush.bf16.msrb.mxu2 %v2027_v63  ;;  %v216_v26 = vpack.c.bf16 %v177_v25, %v176_v24  ;;  %v100_v33 = vpack.c.bf16 %v42_v32, %v41_v31  ;;  %v178_v36 = vld [vmem:[%s3309_s1 + $0x180] sm:$0xff]  ;;  %v144_v41 = vld [vmem:[%s3309_s1 + $0x70] sm:$0xff]  ;;  %v181_v52 = vld [vmem:[%s3309_s1 + $0x198] sm:$0xff] }
  0x15   :  { %1849 = vmatmul.msk.bf16.gmra.mxu1 %vm233_vm0, %v203_v7  ;;  %v37_v7 = vld [vmem:[%s3313_s0 + $0x20] sm:$0xff]  ;;  %v43_v45 = vld [vmem:[%s3313_s0 + $0x50] sm:$0xff]  ;;  %v147_v57 = vld [vmem:[%s3309_s1 + $0x88] sm:$0xff] }
  0x16   :  { %v98_v9 = vpack.c.bf16 %v38_v8, %v37_v7  ;;  %v180_v51 = vld [vmem:[%s3309_s1 + $0x190] sm:$0xff]  ;;  %v146_v56 = vld [vmem:[%s3309_s1 + $0x80] sm:$0xff]  ;;  %v46_v60 = vld [vmem:[%s3313_s0 + $0x68] sm:$0xff] }
  0x17   :  { %v218_v53 = vpack.c.bf16 %v181_v52, %v180_v51  ;;  %v45_v59 = vld [vmem:[%s3313_s0 + $0x60] sm:$0xff]  ;;  %v47_v5 = vld [vmem:[%s3313_s0 + $0x70] sm:$0xff]  ;;  %v52_v31 = vld [vmem:[%s3313_s0 + $0x98] sm:$0xff] }
  0x18   :  { %1001 = vmatpush.bf16.msrb.mxu2 %v2026_v11  ;;  %v102_v63 = vpack.c.bf16 %v46_v60, %v45_v59  ;;  %v2022_v1 = vld [vmem:[%s3311_s5] sm:$0xff] }
  0x19   :  { %1840 = vmatmul.msk.bf16.gmra.mxu0 %vm233_vm0, %v194_v34 }
  0x1b   :  { %1858 = vmatmul.msk.bf16.gmra.mxu2 %vm233_vm0, %v212_v42  ;;  %v145_v42 = vld [vmem:[%s3309_s1 + $0x78] sm:$0xff] }
  0x1c   :  { %1002 = vmatpush.bf16.msrb.mxu2 %v2025_v23  ;;  %v200_v44 = vpack.c.bf16 %v145_v42, %v144_v41 }
  0x20   :  { %1003 = vmatpush.bf16.msrb.mxu2 %v2024_v35 }
  0x25   :  { %1850 = vmatmul.msk.bf16.gmra.mxu1 %vm233_vm0, %v204_v10 }
  0x29   :  { %1841 = vmatmul.msk.bf16.gmra.mxu0 %vm233_vm0, %v195_v46  ;;  %v44_v46 = vld [vmem:[%s3313_s0 + $0x58] sm:$0xff] }
  0x2a   :  { %v101_v47 = vpack.c.bf16 %v44_v46, %v43_v45  ;;  %v182_v45 = vld [vmem:[%s3309_s1 + $0x1a0] sm:$0xff]  ;;  %v183_v46 = vld [vmem:[%s3309_s1 + $0x1a8] sm:$0xff] }
  0x2b   :  { %1859 = vmatmul.msk.bf16.gmra.mxu2 %vm233_vm0, %v213_v54  ;;  %v219_v51 = vpack.c.bf16 %v183_v46, %v182_v45 }
  0x2d   :  { %1865 = vmatmul.msk.bf16.vlgmr.msra.gmra.mxu3 %vm233_vm0, %v219_v51  ;;  %v57_v51 = vld [vmem:[%s3313_s0 + $0xc0] sm:$0xff] }
  0x35   :  { %1851 = vmatmul.msk.bf16.gmra.mxu1 %vm233_vm0, %v205_v13  ;;  %v175_v13 = vld [vmem:[%s3309_s1 + $0x168] sm:$0xff] }
  0x36   :  { %v215_v14 = vpack.c.bf16 %v175_v13, %v174_v12  ;;  %v49_v13 = vld [vmem:[%s3313_s0 + $0x80] sm:$0xff] }
  0x39   :  { %1842 = vmatmul.msk.bf16.gmra.mxu0 %vm233_vm0, %v196_v58  ;;  %v201_v58 = vpack.c.bf16 %v147_v57, %v146_v56  ;;  %v53_v56 = vld [vmem:[%s3313_s0 + $0xa0] sm:$0xff]  ;;  %v54_v57 = vld [vmem:[%s3313_s0 + $0xa8] sm:$0xff] }
  0x3b   :  { %1860 = vmatmul.msk.bf16.gmra.mxu2 %vm233_vm0, %v214_v2 }
  0x45   :  { %1852 = vmatmul.msk.bf16.gmra.mxu1 %vm233_vm0, %v206_v16  ;;  %v140_v16 = vld [vmem:[%s3309_s1 + $0x50] sm:$0xff] }
  0x46   :  { %v198_v18 = vpack.c.bf16 %v141_v17, %v140_v16 }
  0x49   :  { %1843 = vmatmul.msk.bf16.gmra.mxu0 %vm233_vm0, %v197_v6  ;;  %v48_v6 = vld [vmem:[%s3313_s0 + $0x78] sm:$0xff] }
  0x4a   :  { %v103_v7 = vpack.c.bf16 %v48_v6, %v47_v5  ;;  %v2037_v6 = vld [vmem:[%s3311_s5 + $0x78] sm:$0xff] }
  0x4b   :  { %1861 = vmatmul.msk.bf16.gmra.mxu2 %vm233_vm0, %v215_v14  ;;  %v50_v14 = vld [vmem:[%s3313_s0 + $0x88] sm:$0xff]  ;;  %1331 = vmatpush.bf16.msrb.mxu3 %v2037_v6 }
  0x4c   :  { %v104_v17 = vpack.c.bf16 %v50_v14, %v49_v13  ;;  %v184_v13 = vld [vmem:[%s3309_s1 + $0x1b0] sm:$0xff]  ;;  %v185_v14 = vld [vmem:[%s3309_s1 + $0x1b8] sm:$0xff] }
  0x55   :  { %1853 = vmatmul.msk.bf16.gmra.mxu1 %vm233_vm0, %v207_v19  ;;  %v39_v19 = vld [vmem:[%s3313_s0 + $0x30] sm:$0xff] }
  0x56   :  { %v99_v21 = vpack.c.bf16 %v40_v20, %v39_v19 }
  0x59   :  { %1844 = vmatmul.msk.bf16.gmra.mxu0 %vm233_vm0, %v198_v18 }
  0x5b   :  { %1862 = vmatmul.msk.bf16.gmra.mxu2 %vm233_vm0, %v216_v26 }
  0x65   :  { %1854 = vmatmul.msk.bf16.gmra.mxu1 %vm233_vm0, %v208_v22 }
  0x75   :  { %1855 = vmatmul.msk.bf16.gmra.mxu1 %vm233_vm0, %v209_v28  ;;  %v142_v28 = vld [vmem:[%s3309_s1 + $0x60] sm:$0xff] }
  0x76   :  { %v199_v30 = vpack.c.bf16 %v143_v29, %v142_v28 }
  0x78   :  { %1845 = vmatmul.msk.bf16.gmra.mxu0 %vm233_vm0, %v199_v30  ;;  %v51_v30 = vld [vmem:[%s3313_s0 + $0x90] sm:$0xff] }
  0x82   :  { %v2203_v38 = vpop.f32.mrf.mxu1 }
  0x85   :  { %1856 = vmatmul.msk.bf16.gmra.mxu1 %vm233_vm0, %v210_v37  ;;  %v179_v37 = vld [vmem:[%s3309_s1 + $0x188] sm:$0xff] }
  0x86   :  { %v217_v39 = vpack.c.bf16 %v179_v37, %v178_v36  ;;  %v105_v36 = vpack.c.bf16 %v52_v31, %v51_v30 }
  0x88   :  { %1863 = vmatmul.msk.bf16.gmra.mxu2 %vm233_vm0, %v217_v39  ;;  %1846 = vmatmul.msk.bf16.gmra.mxu0 %vm233_vm0, %v200_v44 }
  0x8a   :  { %v2215_v43 = vpop.f32.mrf.mxu1 }
  0x8e   :  { %v2416_v11 = vpop.f32.mrf.mxu2 }
  0x92   :  { %v2231_v50 = vpop.f32.mrf.mxu1 }
  0x95   :  { %1875 = vmatmul.msk.bf16.vlgmr.msrb.gmra.mxu1 %vm233_vm0, %v96_v49  ;;  %v2023_v49 = vld [vmem:[%s3311_s5 + $0x8] sm:$0xff] }
  0x96   :  { %1004 = vmatpush.bf16.msrb.mxu2 %v2023_v49  ;;  %v2426_v19 = vpop.f32.mrf.mxu2 }
  0x98   :  { %1864 = vmatmul.msk.bf16.gmra.mxu2 %vm233_vm0, %v218_v53  ;;  %1847 = vmatmul.msk.bf16.gmra.mxu0 %vm233_vm0, %v201_v58 }
  0x9a   :  { %v2243_v55 = vpop.f32.mrf.mxu1  ;;  %1005 = vmatpush.bf16.msrb.mxu2 %v2022_v1 }
  0x9e   :  { %v2435_v28 = vpop.f32.mrf.mxu2 }
  0xa2   :  { %v2259_v62 = vpop.f32.mrf.mxu1 }
  0xa5   :  { %1876 = vmatmul.msk.bf16.gmra.mxu1 %vm233_vm0, %v97_v61  ;;  %v339_v61 = vpop.f32.mrf.mxu0 }
  0xa6   :  { %v2445_v41 = vpop.f32.mrf.mxu2 }
  0xaa   :  { %v2271_v3 = vpop.f32.mrf.mxu1 }
  0xad   :  { %v341_v4 = vpop.f32.mrf.mxu0 }
  0xae   :  { %v2462_v60 = vpop.f32.mrf.mxu2 }
  0xb2   :  { %v2287_v10 = vpop.f32.mrf.mxu1 }
  0xb5   :  { %1877 = vmatmul.msk.bf16.gmra.mxu1 %vm233_vm0, %v98_v9  ;;  %v344_v9 = vpop.f32.mrf.mxu0 }
  0xba   :  { %v2299_v15 = vpop.f32.mrf.mxu1 }
  0xbd   :  { %v346_v16 = vpop.f32.mrf.mxu0 }
  0xc2   :  { %v2315_v22 = vpop.f32.mrf.mxu1 }
  0xc5   :  { %1878 = vmatmul.msk.bf16.gmra.mxu1 %vm233_vm0, %v99_v21  ;;  %v2432_v21 = vld [vmem:[%s3312_s4] ss:$0 sm:$0xff]  ;;  %v349_v23 = vpop.f32.mrf.mxu0 }
  0xca   :  { %v2327_v27 = vpop.f32.mrf.mxu1 }
  0xcd   :  { %v351_v39 = vpop.f32.mrf.mxu0 }
  0xd2   :  { %v2343_v34 = vpop.f32.mrf.mxu1 }
  0xd5   :  { %1879 = vmatmul.msk.bf16.gmra.mxu1 %vm233_vm0, %v100_v33  ;;  %v354_v52 = vpop.f32.mrf.mxu0 }
  0xda   :  { %v2355_v40 = vpop.f32.mrf.mxu1 }
  0xe2   :  { %v2371_v48 = vpop.f32.mrf.mxu1 }
  0xe5   :  { %1880 = vmatmul.msk.bf16.gmra.mxu1 %vm233_vm0, %v101_v47 }
  0xea   :  { %v2383_v54 = vpop.f32.mrf.mxu1 }
  0xf2   :  { %v2399_v0 = vpop.f32.mrf.mxu1 }
  0xf5   :  { %1881 = vmatmul.msk.bf16.gmra.mxu1 %vm233_vm0, %v102_v63  ;;  %v106_v63 = vpack.c.bf16 %v54_v57, %v53_v56 }
  0xfa   :  { %v2405_v2 = vpop.f32.mrf.mxu1 }
 0x102   :  { %v2413_v8 = vpop.f32.mrf.mxu1 }
 0x105   :  { %1882 = vmatmul.msk.bf16.gmra.mxu1 %vm233_vm0, %v103_v7 }
 0x10a   :  { %v2418_v12 = vpop.f32.mrf.mxu1 }
 0x112   :  { %v609_v18 = vpop.f32.mrf.mxu1 }
 0x113   :  { %v610_v20 = vadd.f32 %v609_v18, %v339_v61  ;;  %v220_v18 = vpack.c.bf16 %v185_v14, %v184_v13  ;;  %v188_v13 = vld [vmem:[%s3309_s1 + $0x1d0] sm:$0xff]  ;;  %v189_v14 = vld [vmem:[%s3309_s1 + $0x1d8] sm:$0xff] }
 0x115   :  { %1883 = vmatmul.msk.bf16.gmra.mxu1 %vm233_vm0, %v104_v17  ;;  %v772_v25 = vadd.f32 %v2432_v21, %v610_v20  ;;  %1866 = vmatmul.msk.bf16.gmra.mxu3 %vm233_vm0, %v220_v18  ;;  %v222_v18 = vpack.c.bf16 %v189_v14, %v188_v13 }
 0x117   :  { %v835_v32 = vmax.f32 %v772_v25, 0.0 }
 0x11a   :  { %v611_v24 = vpop.f32.mrf.mxu1 }
 0x11b   :  { %v612_v26 = vadd.f32 %v611_v24, %v341_v4  ;;  %v356_v4 = vpop.f32.mrf.mxu0  ;;  %v56_v24 = vld [vmem:[%s3313_s0 + $0xb8] sm:$0xff] }
 0x11d   :  { %v773_v29 = vadd.f32 %v2432_v21, %v612_v26 }
 0x11f   :  { %v836_v33 = vmax.f32 %v773_v29, 0.0  ;;  %v2036_v29 = vld [vmem:[%s3311_s5 + $0x70] sm:$0xff] }
 0x120   :  { %1332 = vmatpush.bf16.msrb.mxu3 %v2036_v29 }
 0x121   :  { %v898_v35 = vpack.c.bf16 %v836_v33, %v835_v32 }
 0x122   :  { %v614_v37 = vpop.f32.mrf.mxu1 }
 0x123   :  { %1006 = vmatmul.bf16.vlgmr.msrb.gmra.mxu2 %v898_v35  ;;  %v615_v42 = vadd.f32 %v614_v37, %v344_v9  ;;  %v2468_v9 = vpop.f32.mrf.mxu2  ;;  %v359_v30 = vpop.f32.mrf.mxu0 }
 0x125   :  { %1884 = vmatmul.msk.bf16.gmra.mxu1 %vm233_vm0, %v105_v36  ;;  %v774_v47 = vadd.f32 %v2432_v21, %v615_v42  ;;  %v186_v42 = vld [vmem:[%s3309_s1 + $0x1c0] sm:$0xff] }
 0x127   :  { %v837_v58 = vmax.f32 %v774_v47, 0.0 }
 0x12a   :  { %v616_v44 = vpop.f32.mrf.mxu1 }
 0x12b   :  { %v617_v49 = vadd.f32 %v616_v44, %v346_v16  ;;  %v2488_v35 = vpop.f32.mrf.mxu2  ;;  %v187_v44 = vld [vmem:[%s3309_s1 + $0x1c8] sm:$0xff] }
 0x12c   :  { %v221_v47 = vpack.c.bf16 %v187_v44, %v186_v42  ;;  %v190_v44 = vld [vmem:[%s3309_s1 + $0x1e0] sm:$0xff] }
 0x12d   :  { %v775_v53 = vadd.f32 %v2432_v21, %v617_v49 }
 0x12e   :  { %1867 = vmatmul.msk.bf16.gmra.mxu3 %vm233_vm0, %v221_v47 }
 0x12f   :  { %v838_v59 = vmax.f32 %v775_v53, 0.0 }
 0x131   :  { %v899_v61 = vpack.c.bf16 %v838_v59, %v837_v58  ;;  %v2035_v58 = vld [vmem:[%s3311_s5 + $0x68] sm:$0xff] }
 0x132   :  { %v619_v1 = vpop.f32.mrf.mxu1  ;;  %1333 = vmatpush.bf16.msrb.mxu3 %v2035_v58 }
 0x133   :  { %1011 = vmatmul.bf16.gmra.mxu2 %v899_v61  ;;  %v620_v5 = vadd.f32 %v619_v1, %v349_v23  ;;  %v55_v23 = vld [vmem:[%s3313_s0 + $0xb0] sm:$0xff]  ;;  %v2506_v53 = vpop.f32.mrf.mxu2 }
 0x134   :  { %v107_v32 = vpack.c.bf16 %v56_v24, %v55_v23  ;;  %v59_v24 = vld [vmem:[%s3313_s0 + $0xd0] sm:$0xff] }
 0x135   :  { %1885 = vmatmul.msk.bf16.gmra.mxu1 %vm233_vm0, %v106_v63  ;;  %v776_v16 = vadd.f32 %v2432_v21, %v620_v5  ;;  %v2034_v5 = vld [vmem:[%s3311_s5 + $0x60] sm:$0xff] }
 0x136   :  { %1334 = vmatpush.bf16.msrb.mxu3 %v2034_v5 }
 0x137   :  { %v839_v25 = vmax.f32 %v776_v16, 0.0 }
 0x13a   :  { %v621_v7 = vpop.f32.mrf.mxu1 }
 0x13b   :  { %v622_v17 = vadd.f32 %v621_v7, %v351_v39  ;;  %v361_v39 = vpop.f32.mrf.mxu0  ;;  %v2515_v6 = vpop.f32.mrf.mxu2 }
 0x13d   :  { %v777_v20 = vadd.f32 %v2432_v21, %v622_v17 }
 0x13e   :  { %1868 = vmatmul.msk.bf16.gmra.mxu3 %vm233_vm0, %v222_v18 }
 0x13f   :  { %v840_v26 = vmax.f32 %v777_v20, 0.0 }
 0x141   :  { %v900_v31 = vpack.c.bf16 %v840_v26, %v839_v25  ;;  %v60_v25 = vld [vmem:[%s3313_s0 + $0xd8] sm:$0xff] }
 0x142   :  { %v624_v33 = vpop.f32.mrf.mxu1 }
 0x143   :  { %1016 = vmatmul.bf16.gmra.mxu2 %v900_v31  ;;  %v625_v36 = vadd.f32 %v624_v33, %v354_v52  ;;  %v58_v52 = vld [vmem:[%s3313_s0 + $0xc8] sm:$0xff]  ;;  %v364_v1 = vpop.f32.mrf.mxu0  ;;  %v109_v31 = vpack.c.bf16 %v60_v25, %v59_v24  ;;  %v2532_v33 = vpop.f32.mrf.mxu2  ;;  %v63_v25 = vld [vmem:[%s3313_s0 + $0xf0] sm:$0xff] }
 0x144   :  { %v108_v61 = vpack.c.bf16 %v58_v52, %v57_v51 }
 0x145   :  { %1886 = vmatmul.msk.bf16.gmra.mxu1 %vm233_vm0, %v107_v32  ;;  %v778_v45 = vadd.f32 %v2432_v21, %v625_v36 }
 0x147   :  { %v841_v56 = vmax.f32 %v778_v45, 0.0  ;;  %v191_v45 = vld [vmem:[%s3309_s1 + $0x1e8] sm:$0xff] }
 0x14a   :  { %v626_v37 = vpop.f32.mrf.mxu1 }
 0x14b   :  { %v627_v46 = vadd.f32 %v626_v37, %v356_v4  ;;  %v366_v23 = vpop.f32.mrf.mxu0  ;;  %v2033_v37 = vld [vmem:[%s3311_s5 + $0x58] sm:$0xff]  ;;  %v2545_v51 = vpop.f32.mrf.mxu2 }
 0x14c   :  { %1335 = vmatpush.bf16.msrb.mxu3 %v2033_v37 }
 0x14d   :  { %v779_v49 = vadd.f32 %v2432_v21, %v627_v46 }
 0x14f   :  { %v842_v57 = vmax.f32 %v779_v49, 0.0  ;;  %v223_v49 = vpack.c.bf16 %v191_v45, %v190_v44  ;;  %v2030_v45 = vld [vmem:[%s3311_s5 + $0x40] sm:$0xff] }
 0x151   :  { %v901_v59 = vpack.c.bf16 %v842_v57, %v841_v56  ;;  %1869 = vmatmul.msk.bf16.gmra.mxu3 %vm233_vm0, %v223_v49  ;;  %v61_v56 = vld [vmem:[%s3313_s0 + $0xe0] sm:$0xff]  ;;  %v62_v57 = vld [vmem:[%s3313_s0 + $0xe8] sm:$0xff] }
 0x152   :  { %v629_v63 = vpop.f32.mrf.mxu1 }
 0x153   :  { %1021 = vmatmul.bf16.gmra.mxu2 %v901_v59  ;;  %v630_v4 = vadd.f32 %v629_v63, %v359_v30 }
 0x155   :  { %1887 = vmatmul.msk.bf16.gmra.mxu1 %vm233_vm0, %v108_v61  ;;  %v780_v16 = vadd.f32 %v2432_v21, %v630_v4  ;;  %v2032_v61 = vld [vmem:[%s3311_s5 + $0x50] sm:$0xff] }
 0x156   :  { %1336 = vmatpush.bf16.msrb.mxu3 %v2032_v61 }
 0x157   :  { %v843_v26 = vmax.f32 %v780_v16, 0.0  ;;  %v192_v16 = vld [vmem:[%s3309_s1 + $0x1f0] sm:$0xff] }
 0x15a   :  { %v631_v7 = vpop.f32.mrf.mxu1 }
 0x15b   :  { %v632_v17 = vadd.f32 %v631_v7, %v361_v39  ;;  %v369_v39 = vpop.f32.mrf.mxu0  ;;  %v2559_v7 = vpop.f32.mrf.mxu2 }
 0x15d   :  { %v781_v20 = vadd.f32 %v2432_v21, %v632_v17 }
 0x15f   :  { %v844_v29 = vmax.f32 %v781_v20, 0.0  ;;  %v224_v20 = vpack.c.bf16 %v192_v16, %v192_v16 }
 0x161   :  { %v902_v30 = vpack.c.bf16 %v844_v29, %v843_v26  ;;  %1870 = vmatmul.msk.bf16.gmra.mxu3 %vm233_vm0, %v224_v20  ;;  %v64_v26 = vld [vmem:[%s3313_s0 + $0xf8] sm:$0xff] }
 0x162   :  { %v634_v32 = vpop.f32.mrf.mxu1  ;;  %v111_v37 = vpack.c.bf16 %v64_v26, %v63_v25  ;;  %v67_v25 = vld [vmem:[%s3313_s0 + $0x110] sm:$0xff]  ;;  %v68_v26 = vld [vmem:[%s3313_s0 + $0x118] sm:$0xff] }
 0x163   :  { %1026 = vmatmul.bf16.gmra.mxu2 %v902_v30  ;;  %v635_v36 = vadd.f32 %v634_v32, %v364_v1  ;;  %v110_v1 = vpack.c.bf16 %v62_v57, %v61_v56  ;;  %v371_v4 = vpop.f32.mrf.mxu0  ;;  %v2576_v32 = vpop.f32.mrf.mxu2  ;;  %v65_v57 = vld [vmem:[%s3313_s0 + $0x100] sm:$0xff] }
 0x165   :  { %1888 = vmatmul.msk.bf16.gmra.mxu1 %vm233_vm0, %v109_v31  ;;  %v782_v46 = vadd.f32 %v2432_v21, %v635_v36  ;;  %v2031_v31 = vld [vmem:[%s3311_s5 + $0x48] sm:$0xff] }
 0x166   :  { %1337 = vmatpush.bf16.msrb.mxu3 %v2031_v31 }
 0x167   :  { %v845_v58 = vmax.f32 %v782_v46, 0.0 }
 0x16a   :  { %v636_v42 = vpop.f32.mrf.mxu1  ;;  %1338 = vmatpush.bf16.msrb.mxu3 %v2030_v45  ;;  %v2613_v45 = vld [vmem:[%s3314_s6] ss:$0 sm:$0xff] }
 0x16b   :  { %v637_v47 = vadd.f32 %v636_v42, %v366_v23  ;;  %v374_v23 = vpop.f32.mrf.mxu0  ;;  %v2582_v46 = vpop.f32.mrf.mxu2 }
 0x16d   :  { %v783_v52 = vadd.f32 %v2432_v21, %v637_v47 }
 0x16f   :  { %v846_v59 = vmax.f32 %v783_v52, 0.0 }
 0x171   :  { %v903_v63 = vpack.c.bf16 %v846_v59, %v845_v58  ;;  %v66_v58 = vld [vmem:[%s3313_s0 + $0x108] sm:$0xff] }
 0x172   :  { %v639_v5 = vpop.f32.mrf.mxu1 }
 0x173   :  { %1031 = vmatmul.bf16.gmra.mxu2 %v903_v63  ;;  %v640_v13 = vadd.f32 %v639_v5, %v369_v39  ;;  %v376_v42 = vpop.f32.mrf.mxu0 }
 0x175   :  { %1889 = vmatmul.msk.bf16.gmra.mxu1 %vm233_vm0, %v110_v1  ;;  %v784_v17 = vadd.f32 %v2432_v21, %v640_v13  ;;  %v2592_v13 = vpop.f32.mrf.mxu2 }
 0x177   :  { %v847_v29 = vmax.f32 %v784_v17, 0.0 }
 0x17a   :  { %v641_v14 = vpop.f32.mrf.mxu1 }
 0x17b   :  { %v642_v18 = vadd.f32 %v641_v14, %v371_v4  ;;  %v379_v63 = vpop.f32.mrf.mxu0  ;;  %v112_v4 = vpack.c.bf16 %v66_v58, %v65_v57 }
 0x17d   :  { %v785_v24 = vadd.f32 %v2432_v21, %v642_v18 }
 0x17f   :  { %v848_v30 = vmax.f32 %v785_v24, 0.0  ;;  %v2597_v24 = vpop.f32.mrf.mxu2 }
 0x181   :  { %v904_v36 = vpack.c.bf16 %v848_v30, %v847_v29 }
 0x182   :  { %v644_v39 = vpop.f32.mrf.mxu1 }
 0x183   :  { %1036 = vmatmul.bf16.gmra.mxu2 %v904_v36  ;;  %v645_v44 = vadd.f32 %v644_v39, %v374_v23  ;;  %v381_v16 = vpop.f32.mrf.mxu0  ;;  %v113_v36 = vpack.c.bf16 %v68_v26, %v67_v25  ;;  %v2044_v25 = vld [vmem:[%s3315_s7 + $0x30] sm:$0xff] }
 0x185   :  { %1890 = vmatmul.msk.bf16.gmra.mxu1 %vm233_vm0, %v111_v37  ;;  %v786_v49 = vadd.f32 %v2432_v21, %v645_v44  ;;  %v2045_v37 = vld [vmem:[%s3315_s7 + $0x38] sm:$0xff] }
 0x186   :  { %1599 = vmatpush.bf16.msrb.mxu0 %v2045_v37  ;;  %2049 = vmatpush.bf16.msra.mxu3 %v2045_v37 }
 0x187   :  { %v849_v59 = vmax.f32 %v786_v49, 0.0 }
 0x18a   :  { %v646_v47 = vpop.f32.mrf.mxu1  ;;  %1600 = vmatpush.bf16.msrb.mxu0 %v2044_v25  ;;  %2050 = vmatpush.bf16.msra.mxu3 %v2044_v25 }
 0x18b   :  { %v647_v52 = vadd.f32 %v646_v47, %v376_v42 }
 0x18d   :  { %v787_v56 = vadd.f32 %v2432_v21, %v647_v52 }
 0x18f   :  { %v850_v61 = vmax.f32 %v787_v56, 0.0 }
 0x191   :  { %v905_v1 = vpack.c.bf16 %v850_v61, %v849_v59  ;;  %v69_v59 = vld [vmem:[%s3313_s0 + $0x120] sm:$0xff] }
 0x192   :  { %v649_v5 = vpop.f32.mrf.mxu1 }
 0x193   :  { %1041 = vmatmul.bf16.gmra.mxu2 %v905_v1  ;;  %v650_v14 = vadd.f32 %v649_v5, %v379_v63 }
 0x195   :  { %1891 = vmatmul.msk.bf16.gmra.mxu1 %vm233_vm0, %v112_v4  ;;  %v788_v18 = vadd.f32 %v2432_v21, %v650_v14  ;;  %v2626_v4 = vpop.f32.mrf.mxu3 }
 0x197   :  { %v851_v29 = vmax.f32 %v788_v18, 0.0 }
 0x19a   :  { %v651_v17 = vpop.f32.mrf.mxu1 }
 0x19b   :  { %v652_v20 = vadd.f32 %v651_v17, %v381_v16 }
 0x19d   :  { %v789_v23 = vadd.f32 %v2432_v21, %v652_v20  ;;  %v2633_v26 = vpop.f32.mrf.mxu3 }
 0x19f   :  { %v852_v30 = vmax.f32 %v789_v23, 0.0 }
 0x1a1   :  { %v906_v31 = vpack.c.bf16 %v852_v30, %v851_v29 }
 0x1a2   :  { %v654_v39 = vpop.f32.mrf.mxu1 }
 0x1a3   :  { %1046 = vmatmul.bf16.gmra.mxu2 %v906_v31  ;;  %v655_v44 = vadd.f32 %v654_v39, %v2203_v38  ;;  %v70_v38 = vld [vmem:[%s3313_s0 + $0x128] sm:$0xff] }
 0x1a4   :  { %v114_v16 = vpack.c.bf16 %v70_v38, %v69_v59 }
 0x1a5   :  { %1892 = vmatmul.msk.bf16.gmra.mxu1 %vm233_vm0, %v113_v36  ;;  %v790_v49 = vadd.f32 %v2432_v21, %v655_v44 }
 0x1a6   :  { %v1007_v42 = vpop.f32.mrf.mxu2 }
 0x1a7   :  { %v1008_v56 = vadd.f32 %v2613_v45, %v1007_v42  ;;  %v853_v61 = vmax.f32 %v790_v49, 0.0  ;;  %v72_v42 = vld [vmem:[%s3313_s0 + $0x138] sm:$0xff] }
 0x1aa   :  { %v656_v47 = vpop.f32.mrf.mxu1 }
 0x1ab   :  { %v657_v52 = vadd.f32 %v656_v47, %v2215_v43  ;;  %v1166_v43 = vmax.f32 %v1008_v56, 0.0 }
 0x1ad   :  { %v791_v57 = vadd.f32 %v2432_v21, %v657_v52  ;;  %v2646_v52 = vpop.f32.mrf.mxu3 }
 0x1ae   :  { %v1009_v58 = vpop.f32.mrf.mxu2 }
 0x1af   :  { %v854_v63 = vmax.f32 %v791_v57, 0.0  ;;  %v1010_v1 = vadd.f32 %v2613_v45, %v1009_v58 }
 0x1b1   :  { %v1167_v5 = vmax.f32 %v1010_v1, 0.0  ;;  %v907_v14 = vpack.c.bf16 %v854_v63, %v853_v61  ;;  %v2043_v1 = vld [vmem:[%s3315_s7 + $0x28] sm:$0xff] }
 0x1b2   :  { %v659_v17 = vpop.f32.mrf.mxu1  ;;  %1601 = vmatpush.bf16.msrb.mxu0 %v2043_v1  ;;  %2051 = vmatpush.bf16.msra.mxu3 %v2043_v1 }
 0x1b3   :  { %1051 = vmatmul.bf16.gmra.mxu2 %v907_v14  ;;  %v1229_v18 = vpack.c.bf16 %v1167_v5, %v1166_v43  ;;  %v660_v23 = vadd.f32 %v659_v17, %v2231_v50  ;;  %v71_v50 = vld [vmem:[%s3313_s0 + $0x130] sm:$0xff] }
 0x1b4   :  { %v115_v58 = vpack.c.bf16 %v72_v42, %v71_v50 }
 0x1b5   :  { %1893 = vmatmul.msk.bf16.gmra.mxu1 %vm233_vm0, %v114_v16  ;;  %1339 = vmatmul.bf16.vlgmr.msrb.gmra.mxu3 %v1229_v18  ;;  %v792_v30 = vadd.f32 %v2432_v21, %v660_v23  ;;  %v2653_v43 = vpop.f32.mrf.mxu3  ;;  %v74_v23 = vld [vmem:[%s3313_s0 + $0x148] sm:$0xff] }
 0x1b6   :  { %v1012_v20 = vpop.f32.mrf.mxu2 }
 0x1b7   :  { %v1013_v36 = vadd.f32 %v2613_v45, %v1012_v20  ;;  %v855_v44 = vmax.f32 %v792_v30, 0.0 }
 0x1ba   :  { %v661_v29 = vpop.f32.mrf.mxu1 }
 0x1bb   :  { %v662_v31 = vadd.f32 %v661_v29, %v2243_v55  ;;  %v1168_v55 = vmax.f32 %v1013_v36, 0.0 }
 0x1bd   :  { %v793_v37 = vadd.f32 %v2432_v21, %v662_v31  ;;  %v2666_v31 = vpop.f32.mrf.mxu3 }
 0x1be   :  { %v1014_v39 = vpop.f32.mrf.mxu2 }
 0x1bf   :  { %v856_v47 = vmax.f32 %v793_v37, 0.0  ;;  %v1015_v49 = vadd.f32 %v2613_v45, %v1014_v39 }
 0x1c1   :  { %v1169_v56 = vmax.f32 %v1015_v49, 0.0  ;;  %v908_v57 = vpack.c.bf16 %v856_v47, %v855_v44 }
 0x1c2   :  { %v664_v59 = vpop.f32.mrf.mxu1 }
 0x1c3   :  { %1056 = vmatmul.bf16.gmra.mxu2 %v908_v57  ;;  %v1230_v38 = vpack.c.bf16 %v1169_v56, %v1168_v55  ;;  %v665_v63 = vadd.f32 %v664_v59, %v2259_v62  ;;  %v73_v62 = vld [vmem:[%s3313_s0 + $0x140] sm:$0xff] }
 0x1c4   :  { %v116_v39 = vpack.c.bf16 %v74_v23, %v73_v62  ;;  %v2042_v55 = vld [vmem:[%s3315_s7 + $0x20] sm:$0xff] }
 0x1c5   :  { %1894 = vmatmul.msk.bf16.gmra.mxu1 %vm233_vm0, %v115_v58  ;;  %1344 = vmatmul.bf16.gmra.mxu3 %v1230_v38  ;;  %v794_v14 = vadd.f32 %v2432_v21, %v665_v63  ;;  %v2670_v49 = vpop.f32.mrf.mxu3  ;;  %v76_v63 = vld [vmem:[%s3313_s0 + $0x158] sm:$0xff] }
 0x1c6   :  { %v1017_v61 = vpop.f32.mrf.mxu2  ;;  %1602 = vmatpush.bf16.msrb.mxu0 %v2042_v55  ;;  %2052 = vmatpush.bf16.msra.mxu3 %v2042_v55 }
 0x1c7   :  { %v1018_v17 = vadd.f32 %v2613_v45, %v1017_v61  ;;  %v857_v25 = vmax.f32 %v794_v14, 0.0 }
 0x1ca   :  { %v666_v5 = vpop.f32.mrf.mxu1 }
 0x1cb   :  { %v667_v16 = vadd.f32 %v666_v5, %v2271_v3  ;;  %v1170_v3 = vmax.f32 %v1018_v17, 0.0 }
 0x1cd   :  { %v795_v18 = vadd.f32 %v2432_v21, %v667_v16 }
 0x1ce   :  { %v1019_v20 = vpop.f32.mrf.mxu2 }
 0x1cf   :  { %v858_v29 = vmax.f32 %v795_v18, 0.0  ;;  %v1020_v30 = vadd.f32 %v2613_v45, %v1019_v20 }
 0x1d1   :  { %v1171_v36 = vmax.f32 %v1020_v30, 0.0  ;;  %v909_v37 = vpack.c.bf16 %v858_v29, %v857_v25 }
 0x1d2   :  { %v669_v50 = vpop.f32.mrf.mxu1 }
 0x1d3   :  { %1061 = vmatmul.bf16.gmra.mxu2 %v909_v37  ;;  %v1231_v42 = vpack.c.bf16 %v1171_v36, %v1170_v3  ;;  %v670_v47 = vadd.f32 %v669_v50, %v2287_v10  ;;  %v75_v10 = vld [vmem:[%s3313_s0 + $0x150] sm:$0xff]  ;;  %v2041_v3 = vld [vmem:[%s3315_s7 + $0x18] sm:$0xff] }
 0x1d4   :  { %v117_v20 = vpack.c.bf16 %v76_v63, %v75_v10  ;;  %1603 = vmatpush.bf16.msrb.mxu0 %v2041_v3  ;;  %2053 = vmatpush.bf16.msra.mxu3 %v2041_v3 }
 0x1d5   :  { %1895 = vmatmul.msk.bf16.gmra.mxu1 %vm233_vm0, %v116_v39  ;;  %1349 = vmatmul.bf16.gmra.mxu3 %v1231_v42  ;;  %v796_v57 = vadd.f32 %v2432_v21, %v670_v47  ;;  %v78_v47 = vld [vmem:[%s3313_s0 + $0x168] sm:$0xff] }
 0x1d6   :  { %v1022_v44 = vpop.f32.mrf.mxu2 }
 0x1d7   :  { %v1023_v59 = vadd.f32 %v2613_v45, %v1022_v44  ;;  %v859_v1 = vmax.f32 %v796_v57, 0.0 }
 0x1d9   :  { %v1172_v16 = vmax.f32 %v1023_v59, 0.0 }
 0x1da   :  { %v671_v56 = vpop.f32.mrf.mxu1 }
 0x1db   :  { %v672_v58 = vadd.f32 %v671_v56, %v2299_v15  ;;  %v2686_v15 = vpop.f32.mrf.mxu3 }
 0x1dd   :  { %v797_v38 = vadd.f32 %v2432_v21, %v672_v58 }
 0x1de   :  { %v1024_v61 = vpop.f32.mrf.mxu2 }
 0x1df   :  { %v860_v5 = vmax.f32 %v797_v38, 0.0  ;;  %v1025_v14 = vadd.f32 %v2613_v45, %v1024_v61 }
 0x1e1   :  { %v1173_v17 = vmax.f32 %v1025_v14, 0.0  ;;  %v910_v18 = vpack.c.bf16 %v860_v5, %v859_v1 }
 0x1e2   :  { %v674_v62 = vpop.f32.mrf.mxu1 }
 0x1e3   :  { %1066 = vmatmul.bf16.gmra.mxu2 %v910_v18  ;;  %v1232_v23 = vpack.c.bf16 %v1173_v17, %v1172_v16  ;;  %v675_v29 = vadd.f32 %v674_v62, %v2315_v22  ;;  %v2690_v30 = vpop.f32.mrf.mxu3  ;;  %v77_v22 = vld [vmem:[%s3313_s0 + $0x160] sm:$0xff] }
 0x1e4   :  { %v118_v61 = vpack.c.bf16 %v78_v47, %v77_v22 }
 0x1e5   :  { %1896 = vmatmul.msk.bf16.gmra.mxu1 %vm233_vm0, %v117_v20  ;;  %1354 = vmatmul.bf16.gmra.mxu3 %v1232_v23  ;;  %v798_v37 = vadd.f32 %v2432_v21, %v675_v29 }
 0x1e6   :  { %v1027_v25 = vpop.f32.mrf.mxu2 }
 0x1e7   :  { %v1028_v50 = vadd.f32 %v2613_v45, %v1027_v25  ;;  %v861_v55 = vmax.f32 %v798_v37, 0.0  ;;  %v79_v25 = vld [vmem:[%s3313_s0 + $0x170] sm:$0xff] }
 0x1e9   :  { %v1174_v58 = vmax.f32 %v1028_v50, 0.0 }
 0x1ea   :  { %v676_v36 = vpop.f32.mrf.mxu1 }
 0x1eb   :  { %v677_v39 = vadd.f32 %v676_v36, %v2327_v27  ;;  %v2706_v27 = vpop.f32.mrf.mxu3 }
 0x1ed   :  { %v799_v42 = vadd.f32 %v2432_v21, %v677_v39 }
 0x1ee   :  { %v1029_v44 = vpop.f32.mrf.mxu2 }
 0x1ef   :  { %v862_v56 = vmax.f32 %v799_v42, 0.0  ;;  %v1030_v57 = vadd.f32 %v2613_v45, %v1029_v44 }
 0x1f1   :  { %v1175_v59 = vmax.f32 %v1030_v57, 0.0  ;;  %v911_v38 = vpack.c.bf16 %v862_v56, %v861_v55 }
 0x1f2   :  { %v679_v10 = vpop.f32.mrf.mxu1 }
 0x1f3   :  { %1071 = vmatmul.bf16.gmra.mxu2 %v911_v38  ;;  %v1233_v63 = vpack.c.bf16 %v1175_v59, %v1174_v58  ;;  %v680_v5 = vadd.f32 %v679_v10, %v2343_v34  ;;  %v2710_v14 = vpop.f32.mrf.mxu3  ;;  %v80_v34 = vld [vmem:[%s3313_s0 + $0x178] sm:$0xff] }
 0x1f4   :  { %v119_v44 = vpack.c.bf16 %v80_v34, %v79_v25 }
 0x1f5   :  { %1897 = vmatmul.msk.bf16.gmra.mxu1 %vm233_vm0, %v118_v61  ;;  %1359 = vmatmul.bf16.gmra.mxu3 %v1233_v63  ;;  %v800_v17 = vadd.f32 %v2432_v21, %v680_v5  ;;  %v82_v5 = vld [vmem:[%s3313_s0 + $0x188] sm:$0xff] }
 0x1f6   :  { %v1032_v1 = vpop.f32.mrf.mxu2 }
 0x1f7   :  { %v1033_v20 = vadd.f32 %v2613_v45, %v1032_v1  ;;  %v863_v29 = vmax.f32 %v800_v17, 0.0  ;;  %v81_v1 = vld [vmem:[%s3313_s0 + $0x180] sm:$0xff] }
 0x1f9   :  { %v1176_v39 = vmax.f32 %v1033_v20, 0.0 }
 0x1fa   :  { %v681_v16 = vpop.f32.mrf.mxu1 }
 0x1fb   :  { %v682_v18 = vadd.f32 %v681_v16, %v2355_v40  ;;  %v2040_v40 = vld [vmem:[%s3315_s7 + $0x10] sm:$0xff]  ;;  %v2726_v37 = vpop.f32.mrf.mxu3 }
 0x1fc   :  { %1604 = vmatpush.bf16.msrb.mxu0 %v2040_v40  ;;  %2054 = vmatpush.bf16.msra.mxu3 %v2040_v40 }
 0x1fd   :  { %v801_v62 = vadd.f32 %v2432_v21, %v682_v18 }
 0x1fe   :  { %v1034_v23 = vpop.f32.mrf.mxu2 }
 0x1ff   :  { %v864_v3 = vmax.f32 %v801_v62, 0.0  ;;  %v1035_v36 = vadd.f32 %v2613_v45, %v1034_v23  ;;  %v120_v23 = vpack.c.bf16 %v82_v5, %v81_v1 }
 0x201   :  { %v1177_v50 = vmax.f32 %v1035_v36, 0.0  ;;  %v912_v42 = vpack.c.bf16 %v864_v3, %v863_v29 }
 0x202   :  { %v684_v22 = vpop.f32.mrf.mxu1 }
 0x203   :  { %1076 = vmatmul.bf16.gmra.mxu2 %v912_v42  ;;  %v1234_v47 = vpack.c.bf16 %v1177_v50, %v1176_v39  ;;  %v685_v56 = vadd.f32 %v684_v22, %v2371_v48  ;;  %v496_v57 = vpop.f32.mrf.mxu3  ;;  %v83_v22 = vld [vmem:[%s3313_s0 + $0x190] sm:$0xff] }
 0x205   :  { %1898 = vmatmul.msk.bf16.gmra.mxu1 %vm233_vm0, %v119_v44  ;;  %1364 = vmatmul.bf16.gmra.mxu3 %v1234_v47  ;;  %v802_v59 = vadd.f32 %v2432_v21, %v685_v56  ;;  %v84_v47 = vld [vmem:[%s3313_s0 + $0x198] sm:$0xff] }
 0x206   :  { %v1037_v55 = vpop.f32.mrf.mxu2 }
 0x207   :  { %v1038_v61 = vadd.f32 %v2613_v45, %v1037_v55  ;;  %v865_v48 = vmax.f32 %v802_v59, 0.0 }
 0x209   :  { %v1178_v18 = vmax.f32 %v1038_v61, 0.0 }
 0x20a   :  { %v686_v58 = vpop.f32.mrf.mxu1 }
 0x20b   :  { %v687_v38 = vadd.f32 %v686_v58, %v2383_v54  ;;  %v2039_v54 = vld [vmem:[%s3315_s7 + $0x8] sm:$0xff] }
 0x20c   :  { %1605 = vmatpush.bf16.msrb.mxu0 %v2039_v54  ;;  %2055 = vmatpush.bf16.msra.mxu3 %v2039_v54 }
 0x20d   :  { %v803_v10 = vadd.f32 %v2432_v21, %v687_v38  ;;  %v121_v38 = vpack.c.bf16 %v84_v47, %v83_v22 }
 0x20e   :  { %v1039_v63 = vpop.f32.mrf.mxu2 }
 0x20f   :  { %v866_v16 = vmax.f32 %v803_v10, 0.0  ;;  %v1040_v17 = vadd.f32 %v2613_v45, %v1039_v63 }
 0x211   :  { %v1179_v20 = vmax.f32 %v1040_v17, 0.0  ;;  %v913_v62 = vpack.c.bf16 %v866_v16, %v865_v48 }
 0x212   :  { %v689_v25 = vpop.f32.mrf.mxu1 }
 0x213   :  { %1081 = vmatmul.bf16.gmra.mxu2 %v913_v62  ;;  %v1235_v34 = vpack.c.bf16 %v1179_v20, %v1178_v18  ;;  %v690_v3 = vadd.f32 %v689_v25, %v2399_v0  ;;  %v85_v20 = vld [vmem:[%s3313_s0 + $0x1a0] sm:$0xff]  ;;  %v86_v62 = vld [vmem:[%s3313_s0 + $0x1a8] sm:$0xff] }
 0x215   :  { %1899 = vmatmul.msk.bf16.gmra.mxu1 %vm233_vm0, %v120_v23  ;;  %1369 = vmatmul.bf16.gmra.mxu3 %v1235_v34  ;;  %v804_v40 = vadd.f32 %v2432_v21, %v690_v3  ;;  %v122_v3 = vpack.c.bf16 %v86_v62, %v85_v20 }
 0x216   :  { %v1042_v29 = vpop.f32.mrf.mxu2 }
 0x217   :  { %v1043_v50 = vadd.f32 %v2613_v45, %v1042_v29  ;;  %v867_v55 = vmax.f32 %v804_v40, 0.0 }
 0x219   :  { %v1180_v57 = vmax.f32 %v1043_v50, 0.0 }
 0x21a   :  { %v691_v36 = vpop.f32.mrf.mxu1 }
 0x21b   :  { %v692_v39 = vadd.f32 %v691_v36, %v2405_v2  ;;  %v2038_v2 = vld [vmem:[%s3315_s7] sm:$0xff] }
 0x21c   :  { %1606 = vmatpush.bf16.msrb.mxu0 %v2038_v2  ;;  %2056 = vmatpush.bf16.msra.mxu3 %v2038_v2  ;;  %v87_v2 = vld [vmem:[%s3313_s0 + $0x1b0] sm:$0xff] }
 0x21d   :  { %v805_v42 = vadd.f32 %v2432_v21, %v692_v39 }
 0x21e   :  { %v1044_v44 = vpop.f32.mrf.mxu2 }
 0x21f   :  { %v868_v0 = vmax.f32 %v805_v42, 0.0  ;;  %v1045_v56 = vadd.f32 %v2613_v45, %v1044_v44 }
 0x221   :  { %v1181_v58 = vmax.f32 %v1045_v56, 0.0  ;;  %v914_v59 = vpack.c.bf16 %v868_v0, %v867_v55  ;;  %v2781_v0 = vld [vmem:[%s3314_s6 + $0x1] ss:$0 sm:$0xff] }
 0x222   :  { %v694_v61 = vpop.f32.mrf.mxu1 }
 0x223   :  { %1086 = vmatmul.bf16.gmra.mxu2 %v914_v59  ;;  %v1236_v10 = vpack.c.bf16 %v1181_v58, %v1180_v57  ;;  %v695_v1 = vadd.f32 %v694_v61, %v2413_v8 }
 0x225   :  { %1900 = vmatmul.msk.bf16.gmra.mxu1 %vm233_vm0, %v121_v38  ;;  %1374 = vmatmul.bf16.gmra.mxu3 %v1236_v10  ;;  %v806_v48 = vadd.f32 %v2432_v21, %v695_v1 }
 0x226   :  { %v1047_v63 = vpop.f32.mrf.mxu2 }
 0x227   :  { %v1048_v17 = vadd.f32 %v2613_v45, %v1047_v63  ;;  %v869_v23 = vmax.f32 %v806_v48, 0.0 }
 0x229   :  { %v1182_v34 = vmax.f32 %v1048_v17, 0.0 }
 0x22a   :  { %v696_v5 = vpop.f32.mrf.mxu1 }
 0x22b   :  { %v697_v16 = vadd.f32 %v696_v5, %v2418_v12 }
 0x22d   :  { %v807_v54 = vadd.f32 %v2432_v21, %v697_v16 }
 0x22e   :  { %v1049_v18 = vpop.f32.mrf.mxu2 }
 0x22f   :  { %v870_v8 = vmax.f32 %v807_v54, 0.0  ;;  %v1050_v25 = vadd.f32 %v2613_v45, %v1049_v18 }
 0x231   :  { %v1183_v29 = vmax.f32 %v1050_v25, 0.0  ;;  %v915_v12 = vpack.c.bf16 %v870_v8, %v869_v23 }
 0x232   :  { %v699_v36 = vpop.f32.mrf.mxu1 }
 0x233   :  { %1091 = vmatmul.bf16.gmra.mxu2 %v915_v12  ;;  %v1237_v40 = vpack.c.bf16 %v1183_v29, %v1182_v34  ;;  %v700_v50 = vadd.f32 %v699_v36, %v2416_v11  ;;  %v88_v11 = vld [vmem:[%s3313_s0 + $0x1b8] sm:$0xff]  ;;  %v89_v12 = vld [vmem:[%s3313_s0 + $0x1c0] sm:$0xff] }
 0x234   :  { %v123_v10 = vpack.c.bf16 %v88_v11, %v87_v2 }
 0x235   :  { %1901 = vmatmul.msk.bf16.gmra.mxu1 %vm233_vm0, %v122_v3  ;;  %1379 = vmatmul.bf16.gmra.mxu3 %v1237_v40  ;;  %v808_v22 = vadd.f32 %v2432_v21, %v700_v50  ;;  %v90_v3 = vld [vmem:[%s3313_s0 + $0x1c8] sm:$0xff] }
 0x236   :  { %v1052_v39 = vpop.f32.mrf.mxu2 }
 0x237   :  { %v1053_v55 = vadd.f32 %v2613_v45, %v1052_v39  ;;  %v871_v58 = vmax.f32 %v808_v22, 0.0 }
 0x238   :  { %v1340_v42 = vpop.f32.mrf.mxu3 }
 0x239   :  { %v1184_v38 = vmax.f32 %v1053_v55, 0.0  ;;  %v1341_v63 = vadd.f32 %v2781_v0, %v1340_v42 }
 0x23a   :  { %v701_v44 = vpop.f32.mrf.mxu1 }
 0x23b   :  { %v702_v47 = vadd.f32 %v701_v44, %v2426_v19 }
 0x23d   :  { %v809_v56 = vadd.f32 %v2432_v21, %v702_v47 }
 0x23e   :  { %v1054_v57 = vpop.f32.mrf.mxu2 }
 0x23f   :  { %v872_v19 = vmax.f32 %v809_v56, 0.0  ;;  %v1055_v59 = vadd.f32 %v2613_v45, %v1054_v57 }
 0x240   :  { %v1342_v61 = vpop.f32.mrf.mxu3 }
 0x241   :  { %v1185_v1 = vmax.f32 %v1055_v59, 0.0  ;;  %v1343_v5 = vadd.f32 %v2781_v0, %v1342_v61  ;;  %v916_v48 = vpack.c.bf16 %v872_v19, %v871_v58 }
 0x242   :  { %v704_v16 = vpop.f32.mrf.mxu1 }
 0x243   :  { %v1499_v17 = vpack.c.bf16 %v1343_v5, %v1341_v63  ;;  %1096 = vmatmul.bf16.gmra.mxu2 %v916_v48  ;;  %v1238_v54 = vpack.c.bf16 %v1185_v1, %v1184_v38  ;;  %v705_v20 = vadd.f32 %v704_v16, %v2435_v28  ;;  %v91_v1 = vld [vmem:[%s3313_s0 + $0x1d0] sm:$0xff]  ;;  %v92_v5 = vld [vmem:[%s3313_s0 + $0x1d8] sm:$0xff] }
 0x245   :  { %1902 = vmatmul.msk.bf16.gmra.mxu1 %vm233_vm0, %v123_v10  ;;  %1384 = vmatmul.bf16.gmra.mxu3 %v1238_v54  ;;  %v810_v8 = vadd.f32 %v2432_v21, %v705_v20 }
 0x246   :  { %1607 = vmatmul.bf16.vlgmr.msrb.gmra.mxu0 %v1499_v17  ;;  %v1057_v18 = vpop.f32.mrf.mxu2 }
 0x247   :  { %v1058_v34 = vadd.f32 %v2613_v45, %v1057_v18  ;;  %v873_v28 = vmax.f32 %v810_v8, 0.0 }
 0x248   :  { %v1345_v62 = vpop.f32.mrf.mxu3 }
 0x249   :  { %v1186_v50 = vmax.f32 %v1058_v34, 0.0  ;;  %v1346_v44 = vadd.f32 %v2781_v0, %v1345_v62 }
 0x24a   :  { %v706_v23 = vpop.f32.mrf.mxu1 }
 0x24b   :  { %v707_v25 = vadd.f32 %v706_v23, %v2445_v41  ;;  %v124_v41 = vpack.c.bf16 %v90_v3, %v89_v12 }
 0x24d   :  { %v811_v29 = vadd.f32 %v2432_v21, %v707_v25 }
 0x24e   :  { %v1059_v36 = vpop.f32.mrf.mxu2 }
 0x24f   :  { %v874_v40 = vmax.f32 %v811_v29, 0.0  ;;  %v1060_v39 = vadd.f32 %v2613_v45, %v1059_v36 }
 0x250   :  { %v1347_v42 = vpop.f32.mrf.mxu3 }
 0x251   :  { %v1187_v22 = vmax.f32 %v1060_v39, 0.0  ;;  %v1348_v47 = vadd.f32 %v2781_v0, %v1347_v42  ;;  %v917_v55 = vpack.c.bf16 %v874_v40, %v873_v28  ;;  %v2828_v28 = vld [vmem:[%s3312_s4] ss:$0 sm:$0xff] }
 0x252   :  { %v709_v56 = vpop.f32.mrf.mxu1 }
 0x253   :  { %1101 = vmatmul.bf16.gmra.mxu2 %v917_v55  ;;  %v1239_v2 = vpack.c.bf16 %v1187_v22, %v1186_v50  ;;  %v1500_v11 = vpack.c.bf16 %v1348_v47, %v1346_v44  ;;  %v710_v58 = vadd.f32 %v709_v56, %v2462_v60 }
 0x255   :  { %1903 = vmatmul.msk.bf16.gmra.mxu1 %vm233_vm0, %v124_v41  ;;  %1389 = vmatmul.bf16.gmra.mxu3 %v1239_v2  ;;  %v812_v38 = vadd.f32 %v2432_v21, %v710_v58  ;;  %v93_v41 = vld [vmem:[%s3313_s0 + $0x1e0] sm:$0xff] }
 0x256   :  { %1612 = vmatmul.bf16.gmra.mxu0 %v1500_v11  ;;  %v1062_v57 = vpop.f32.mrf.mxu2 }
 0x257   :  { %v1063_v10 = vadd.f32 %v2613_v45, %v1062_v57  ;;  %v875_v60 = vmax.f32 %v812_v38, 0.0 }
 0x258   :  { %v1350_v19 = vpop.f32.mrf.mxu3 }
 0x259   :  { %v1188_v54 = vmax.f32 %v1063_v10, 0.0  ;;  %v1351_v20 = vadd.f32 %v2781_v0, %v1350_v19 }
 0x25a   :  { %v711_v59 = vpop.f32.mrf.mxu1 }
 0x25b   :  { %v712_v61 = vadd.f32 %v711_v59, %v2468_v9  ;;  %v125_v9 = vpack.c.bf16 %v92_v5, %v91_v1 }
 0x25d   :  { %v813_v63 = vadd.f32 %v2432_v21, %v712_v61 }
 0x25e   :  { %v1064_v48 = vpop.f32.mrf.mxu2 }
 0x25f   :  { %v876_v16 = vmax.f32 %v813_v63, 0.0  ;;  %v1065_v17 = vadd.f32 %v2613_v45, %v1064_v48 }
 0x260   :  { %v1352_v18 = vpop.f32.mrf.mxu3 }
 0x261   :  { %v1189_v62 = vmax.f32 %v1065_v17, 0.0  ;;  %v1353_v21 = vadd.f32 %v2781_v0, %v1352_v18  ;;  %v918_v23 = vpack.c.bf16 %v876_v16, %v875_v60 }
 0x262   :  { %v714_v8 = vpop.f32.mrf.mxu1 }
 0x263   :  { %1106 = vmatmul.bf16.gmra.mxu2 %v918_v23  ;;  %v1240_v25 = vpack.c.bf16 %v1189_v62, %v1188_v54  ;;  %v1501_v34 = vpack.c.bf16 %v1353_v21, %v1351_v20  ;;  %v715_v12 = vadd.f32 %v714_v8, %v2488_v35  ;;  %v94_v35 = vld [vmem:[%s3313_s0 + $0x1e8] sm:$0xff]  ;;  %v95_v54 = vld [vmem:[%s3313_s0 + $0x1f0] sm:$0xff] }
 0x264   :  { %v127_v23 = vpack.c.bf16 %v95_v54, %v95_v54 }
 0x265   :  { %1904 = vmatmul.msk.bf16.gmra.mxu1 %vm233_vm0, %v125_v9  ;;  %1394 = vmatmul.bf16.gmra.mxu3 %v1240_v25  ;;  %v814_v40 = vadd.f32 %v2828_v28, %v715_v12 }
 0x266   :  { %1617 = vmatmul.bf16.gmra.mxu0 %v1501_v34  ;;  %v1067_v29 = vpop.f32.mrf.mxu2 }
 0x267   :  { %v1068_v50 = vadd.f32 %v2613_v45, %v1067_v29  ;;  %v877_v22 = vmax.f32 %v814_v40, 0.0 }
 0x268   :  { %v1355_v3 = vpop.f32.mrf.mxu3 }
 0x269   :  { %v1190_v56 = vmax.f32 %v1068_v50, 0.0  ;;  %v1356_v11 = vadd.f32 %v2781_v0, %v1355_v3 }
 0x26a   :  { %v716_v36 = vpop.f32.mrf.mxu1 }
 0x26b   :  { %v717_v39 = vadd.f32 %v716_v36, %v2506_v53  ;;  %v126_v53 = vpack.c.bf16 %v94_v35, %v93_v41 }
 0x26d   :  { %v815_v42 = vadd.f32 %v2828_v28, %v717_v39 }
 0x26e   :  { %v1069_v44 = vpop.f32.mrf.mxu2 }
 0x26f   :  { %v878_v47 = vmax.f32 %v815_v42, 0.0  ;;  %v1070_v55 = vadd.f32 %v2613_v45, %v1069_v44 }
 0x270   :  { %v1357_v2 = vpop.f32.mrf.mxu3 }
 0x271   :  { %v1191_v57 = vmax.f32 %v1070_v55, 0.0  ;;  %v1358_v58 = vadd.f32 %v2781_v0, %v1357_v2  ;;  %v919_v19 = vpack.c.bf16 %v878_v47, %v877_v22 }
 0x272   :  { %v719_v59 = vpop.f32.mrf.mxu1 }
 0x273   :  { %v1502_v38 = vpack.c.bf16 %v1358_v58, %v1356_v11  ;;  %1111 = vmatmul.bf16.gmra.mxu2 %v919_v19  ;;  %v1241_v61 = vpack.c.bf16 %v1191_v57, %v1190_v56  ;;  %v720_v63 = vadd.f32 %v719_v59, %v2515_v6 }
 0x275   :  { %1905 = vmatmul.msk.bf16.gmra.mxu1 %vm233_vm0, %v126_v53  ;;  %1399 = vmatmul.bf16.gmra.mxu3 %v1241_v61  ;;  %v816_v48 = vadd.f32 %v2828_v28, %v720_v63 }
 0x276   :  { %1622 = vmatmul.bf16.gmra.mxu0 %v1502_v38  ;;  %v1072_v10 = vpop.f32.mrf.mxu2 }
 0x277   :  { %v1073_v16 = vadd.f32 %v2613_v45, %v1072_v10  ;;  %v879_v9 = vmax.f32 %v816_v48, 0.0 }
 0x278   :  { %v1360_v1 = vpop.f32.mrf.mxu3 }
 0x279   :  { %v1192_v6 = vmax.f32 %v1073_v16, 0.0  ;;  %v1361_v8 = vadd.f32 %v2781_v0, %v1360_v1 }
 0x27a   :  { %v721_v5 = vpop.f32.mrf.mxu1 }
 0x27b   :  { %v722_v60 = vadd.f32 %v721_v5, %v2532_v33 }
 0x27d   :  { %v817_v17 = vadd.f32 %v2828_v28, %v722_v60 }
 0x27e   :  { %v1074_v18 = vpop.f32.mrf.mxu2 }
 0x27f   :  { %v880_v20 = vmax.f32 %v817_v17, 0.0  ;;  %v1075_v62 = vadd.f32 %v2613_v45, %v1074_v18 }
 0x280   :  { %v1362_v21 = vpop.f32.mrf.mxu3 }
 0x281   :  { %v1193_v25 = vmax.f32 %v1075_v62, 0.0  ;;  %v1363_v33 = vadd.f32 %v2781_v0, %v1362_v21  ;;  %v920_v34 = vpack.c.bf16 %v880_v20, %v879_v9 }
 0x282   :  { %v724_v29 = vpop.f32.mrf.mxu1 }
 0x283   :  { %v1503_v12 = vpack.c.bf16 %v1363_v33, %v1361_v8  ;;  %1116 = vmatmul.bf16.gmra.mxu2 %v920_v34  ;;  %v1242_v3 = vpack.c.bf16 %v1193_v25, %v1192_v6  ;;  %v725_v40 = vadd.f32 %v724_v29, %v2545_v51 }
 0x285   :  { %1906 = vmatmul.msk.bf16.gmra.mxu1 %vm233_vm0, %v127_v23  ;;  %1404 = vmatmul.bf16.gmra.mxu3 %v1242_v3  ;;  %v818_v42 = vadd.f32 %v2828_v28, %v725_v40 }
 0x286   :  { %1627 = vmatmul.bf16.gmra.mxu0 %v1503_v12  ;;  %v1077_v36 = vpop.f32.mrf.mxu2 }
 0x287   :  { %v1078_v35 = vadd.f32 %v2613_v45, %v1077_v36  ;;  %v881_v47 = vmax.f32 %v818_v42, 0.0 }
 0x288   :  { %v1365_v39 = vpop.f32.mrf.mxu3 }
 0x289   :  { %v1194_v2 = vmax.f32 %v1078_v35, 0.0  ;;  %v1366_v11 = vadd.f32 %v2781_v0, %v1365_v39 }
 0x28a   :  { %v726_v50 = vpop.f32.mrf.mxu1 }
 0x28b   :  { %v727_v41 = vadd.f32 %v726_v50, %v2559_v7 }
 0x28d   :  { %v819_v44 = vadd.f32 %v2828_v28, %v727_v41 }
 0x28e   :  { %v1079_v22 = vpop.f32.mrf.mxu2 }
 0x28f   :  { %v882_v55 = vmax.f32 %v819_v44, 0.0  ;;  %v1080_v56 = vadd.f32 %v2613_v45, %v1079_v22 }
 0x290   :  { %v1367_v53 = vpop.f32.mrf.mxu3 }
 0x291   :  { %v1195_v51 = vmax.f32 %v1080_v56, 0.0  ;;  %v1368_v57 = vadd.f32 %v2781_v0, %v1367_v53  ;;  %v921_v58 = vpack.c.bf16 %v882_v55, %v881_v47 }
 0x292   :  { %v729_v19 = vpop.f32.mrf.mxu1 }
 0x293   :  { %v1504_v59 = vpack.c.bf16 %v1368_v57, %v1366_v11  ;;  %1121 = vmatmul.bf16.gmra.mxu2 %v921_v58  ;;  %v1243_v7 = vpack.c.bf16 %v1195_v51, %v1194_v2  ;;  %v730_v61 = vadd.f32 %v729_v19, %v2576_v32 }
 0x295   :  { %1409 = vmatmul.bf16.gmra.mxu3 %v1243_v7  ;;  %v820_v1 = vadd.f32 %v2828_v28, %v730_v61 }
 0x296   :  { %1632 = vmatmul.bf16.gmra.mxu0 %v1504_v59  ;;  %v1082_v38 = vpop.f32.mrf.mxu2 }
 0x297   :  { %v1083_v48 = vadd.f32 %v2613_v45, %v1082_v38  ;;  %v883_v17 = vmax.f32 %v820_v1, 0.0 }
 0x298   :  { %v1370_v10 = vpop.f32.mrf.mxu3 }
 0x299   :  { %v1196_v9 = vmax.f32 %v1083_v48, 0.0  ;;  %v1371_v62 = vadd.f32 %v2781_v0, %v1370_v10 }
 0x29a   :  { %v731_v63 = vpop.f32.mrf.mxu1 }
 0x29b   :  { %v732_v5 = vadd.f32 %v731_v63, %v2582_v46 }
 0x29d   :  { %v821_v60 = vadd.f32 %v2828_v28, %v732_v5 }
 0x29e   :  { %v1084_v16 = vpop.f32.mrf.mxu2 }
 0x29f   :  { %v884_v54 = vmax.f32 %v821_v60, 0.0  ;;  %v1085_v18 = vadd.f32 %v2613_v45, %v1084_v16 }
 0x2a0   :  { %v1372_v20 = vpop.f32.mrf.mxu3 }
 0x2a1   :  { %v1197_v32 = vmax.f32 %v1085_v18, 0.0  ;;  %v1373_v6 = vadd.f32 %v2781_v0, %v1372_v20  ;;  %v922_v21 = vpack.c.bf16 %v884_v54, %v883_v17 }
 0x2a2   :  { %v734_v23 = vpop.f32.mrf.mxu1 }
 0x2a3   :  { %v1505_v8 = vpack.c.bf16 %v1373_v6, %v1371_v62  ;;  %1126 = vmatmul.bf16.gmra.mxu2 %v922_v21  ;;  %v1244_v46 = vpack.c.bf16 %v1197_v32, %v1196_v9  ;;  %v735_v33 = vadd.f32 %v734_v23, %v2592_v13 }
 0x2a5   :  { %1414 = vmatmul.bf16.gmra.mxu3 %v1244_v46  ;;  %v822_v12 = vadd.f32 %v2828_v28, %v735_v33 }
 0x2a6   :  { %1637 = vmatmul.bf16.gmra.mxu0 %v1505_v8  ;;  %v1087_v25 = vpop.f32.mrf.mxu2 }
 0x2a7   :  { %v1088_v36 = vadd.f32 %v2613_v45, %v1087_v25  ;;  %v885_v50 = vmax.f32 %v822_v12, 0.0 }
 0x2a8   :  { %v1375_v34 = vpop.f32.mrf.mxu3 }
 0x2a9   :  { %v1198_v35 = vmax.f32 %v1088_v36, 0.0  ;;  %v1376_v22 = vadd.f32 %v2781_v0, %v1375_v34 }
 0x2aa   :  { %v736_v29 = vpop.f32.mrf.mxu1 }
 0x2ab   :  { %v737_v3 = vadd.f32 %v736_v29, %v2597_v24 }
 0x2ad   :  { %v823_v40 = vadd.f32 %v2828_v28, %v737_v3 }
 0x2ae   :  { %v1089_v39 = vpop.f32.mrf.mxu2 }
 0x2af   :  { %v886_v42 = vmax.f32 %v823_v40, 0.0  ;;  %v1090_v41 = vadd.f32 %v2613_v45, %v1089_v39 }
 0x2b0   :  { %v1377_v44 = vpop.f32.mrf.mxu3 }
 0x2b1   :  { %v1199_v13 = vmax.f32 %v1090_v41, 0.0  ;;  %v1378_v47 = vadd.f32 %v2781_v0, %v1377_v44  ;;  %v923_v55 = vpack.c.bf16 %v886_v42, %v885_v50 }
 0x2b2   :  { %v739_v56 = vpop.f32.mrf.mxu1 }
 0x2b3   :  { %v1506_v2 = vpack.c.bf16 %v1378_v47, %v1376_v22  ;;  %1131 = vmatmul.bf16.gmra.mxu2 %v923_v55  ;;  %v1245_v24 = vpack.c.bf16 %v1199_v13, %v1198_v35  ;;  %v740_v11 = vadd.f32 %v739_v56, %v2626_v4  ;;  %v2889_v4 = vld [vmem:[%s3316_s8] ss:$0 sm:$0xff] }
 0x2b5   :  { %1419 = vmatmul.bf16.gmra.mxu3 %v1245_v24  ;;  %v824_v58 = vadd.f32 %v2828_v28, %v740_v11 }
 0x2b6   :  { %1642 = vmatmul.bf16.gmra.mxu0 %v1506_v2  ;;  %v1092_v53 = vpop.f32.mrf.mxu2 }
 0x2b7   :  { %v1093_v59 = vadd.f32 %v2613_v45, %v1092_v53  ;;  %v887_v61 = vmax.f32 %v824_v58, 0.0 }
 0x2b8   :  { %v1380_v51 = vpop.f32.mrf.mxu3 }
 0x2b9   :  { %v1200_v1 = vmax.f32 %v1093_v59, 0.0  ;;  %v1381_v48 = vadd.f32 %v2781_v0, %v1380_v51 }
 0x2ba   :  { %v741_v57 = vpop.f32.mrf.mxu1 }
 0x2bb   :  { %v742_v19 = vadd.f32 %v741_v57, %v2633_v26 }
 0x2bd   :  { %v825_v7 = vadd.f32 %v2828_v28, %v742_v19 }
 0x2be   :  { %v1094_v38 = vpop.f32.mrf.mxu2 }
 0x2bf   :  { %v888_v10 = vmax.f32 %v825_v7, 0.0  ;;  %v1095_v63 = vadd.f32 %v2613_v45, %v1094_v38  ;;  %v2929_v7 = vld [vmem:[%s3314_s6] ss:$0 sm:$0xff] }
 0x2c0   :  { %v1382_v5 = vpop.f32.mrf.mxu3 }
 0x2c1   :  { %v1201_v60 = vmax.f32 %v1095_v63, 0.0  ;;  %v1383_v26 = vadd.f32 %v2781_v0, %v1382_v5  ;;  %v924_v16 = vpack.c.bf16 %v888_v10, %v887_v61 }
 0x2c2   :  { %v744_v17 = vpop.f32.mrf.mxu1 }
 0x2c3   :  { %v1507_v54 = vpack.c.bf16 %v1383_v26, %v1381_v48  ;;  %v1608_v18 = vpop.f32.mrf.mxu0  ;;  %1136 = vmatmul.bf16.gmra.mxu2 %v924_v16  ;;  %v1246_v9 = vpack.c.bf16 %v1201_v60, %v1200_v1  ;;  %v745_v32 = vadd.f32 %v744_v17, %v2646_v52 }
 0x2c4   :  { %v1609_v20 = vadd.f32 %v2889_v4, %v1608_v18 }
 0x2c5   :  { %1424 = vmatmul.bf16.gmra.mxu3 %v1246_v9  ;;  %v826_v23 = vadd.f32 %v2828_v28, %v745_v32 }
 0x2c6   :  { %1768 = vst.msk [vmem:[%s3317_s9] sm:$0xff] %vm1767_vm1, %v1609_v20  ;;  %1647 = vmatmul.bf16.gmra.mxu0 %v1507_v54  ;;  %v1097_v62 = vpop.f32.mrf.mxu2 }
 0x2c7   :  { %v1098_v25 = vadd.f32 %v2613_v45, %v1097_v62  ;;  %v889_v52 = vmax.f32 %v826_v23, 0.0 }
 0x2c8   :  { %v1385_v6 = vpop.f32.mrf.mxu3 }
 0x2c9   :  { %v1202_v36 = vmax.f32 %v1098_v25, 0.0 }
 0x2ca   :  { %v746_v21 = vpop.f32.mrf.mxu1 }
 0x2cb   :  { %v747_v8 = vadd.f32 %v746_v21, %v2653_v43  ;;  %v1610_v46 = vpop.f32.mrf.mxu0  ;;  %v1386_v43 = vadd.f32 %v2781_v0, %v1385_v6 }
 0x2cc   :  { %v1611_v33 = vadd.f32 %v2889_v4, %v1610_v46 }
 0x2cd   :  { %v827_v34 = vadd.f32 %v2828_v28, %v747_v8 }
 0x2ce   :  { %1769 = vst.msk [vmem:[%s3317_s9 + $0x8] sm:$0xff] %vm1767_vm1, %v1611_v33  ;;  %v1099_v29 = vpop.f32.mrf.mxu2 }
 0x2cf   :  { %v890_v12 = vmax.f32 %v827_v34, 0.0  ;;  %v1100_v3 = vadd.f32 %v2613_v45, %v1099_v29 }
 0x2d0   :  { %v1387_v40 = vpop.f32.mrf.mxu3 }
 0x2d1   :  { %v1203_v39 = vmax.f32 %v1100_v3, 0.0  ;;  %v1388_v50 = vadd.f32 %v2781_v0, %v1387_v40  ;;  %v925_v42 = vpack.c.bf16 %v890_v12, %v889_v52 }
 0x2d2   :  { %v749_v41 = vpop.f32.mrf.mxu1 }
 0x2d3   :  { %v1508_v35 = vpack.c.bf16 %v1388_v50, %v1386_v43  ;;  %v1613_v44 = vpop.f32.mrf.mxu0  ;;  %1141 = vmatmul.bf16.gmra.mxu2 %v925_v42  ;;  %v1247_v22 = vpack.c.bf16 %v1203_v39, %v1202_v36  ;;  %v750_v55 = vadd.f32 %v749_v41, %v2666_v31 }
 0x2d4   :  { %v1614_v13 = vadd.f32 %v2889_v4, %v1613_v44 }
 0x2d5   :  { %1429 = vmatmul.bf16.gmra.mxu3 %v1247_v22  ;;  %v828_v24 = vadd.f32 %v2828_v28, %v750_v55 }
 0x2d6   :  { %1770 = vst.msk [vmem:[%s3317_s9 + $0x10] sm:$0xff] %vm1767_vm1, %v1614_v13  ;;  %1652 = vmatmul.bf16.gmra.mxu0 %v1508_v35  ;;  %v1102_v47 = vpop.f32.mrf.mxu2 }
 0x2d7   :  { %v1103_v51 = vadd.f32 %v2613_v45, %v1102_v47  ;;  %v891_v31 = vmax.f32 %v828_v24, 0.0 }
 0x2d8   :  { %v1390_v56 = vpop.f32.mrf.mxu3 }
 0x2d9   :  { %v1204_v45 = vmax.f32 %v1103_v51, 0.0  ;;  %v1391_v61 = vadd.f32 %v2781_v0, %v1390_v56 }
 0x2da   :  { %v751_v2 = vpop.f32.mrf.mxu1 }
 0x2db   :  { %v752_v53 = vadd.f32 %v751_v2, %v2670_v49  ;;  %v1615_v11 = vpop.f32.mrf.mxu0 }
 0x2dc   :  { %v1616_v57 = vadd.f32 %v2889_v4, %v1615_v11 }
 0x2dd   :  { %v829_v58 = vadd.f32 %v2828_v28, %v752_v53 }
 0x2de   :  { %1771 = vst.msk [vmem:[%s3317_s9 + $0x18] sm:$0xff] %vm1767_vm1, %v1616_v57  ;;  %v1104_v19 = vpop.f32.mrf.mxu2 }
 0x2df   :  { %v892_v59 = vmax.f32 %v829_v58, 0.0  ;;  %v1105_v49 = vadd.f32 %v2929_v7, %v1104_v19 }
 0x2e0   :  { %v1392_v38 = vpop.f32.mrf.mxu3 }
 0x2e1   :  { %v1205_v10 = vmax.f32 %v1105_v49, 0.0  ;;  %v1393_v63 = vadd.f32 %v2781_v0, %v1392_v38  ;;  %v926_v1 = vpack.c.bf16 %v892_v59, %v891_v31 }
 0x2e2   :  { %v754_v5 = vpop.f32.mrf.mxu1 }
 0x2e3   :  { %v1509_v48 = vpack.c.bf16 %v1393_v63, %v1391_v61  ;;  %v1618_v60 = vpop.f32.mrf.mxu0  ;;  %1146 = vmatmul.bf16.gmra.mxu2 %v926_v1  ;;  %v1248_v26 = vpack.c.bf16 %v1205_v10, %v1204_v45  ;;  %v755_v54 = vadd.f32 %v754_v5, %v2686_v15 }
 0x2e4   :  { %v1619_v16 = vadd.f32 %v2889_v4, %v1618_v60 }
 0x2e5   :  { %1434 = vmatmul.bf16.gmra.mxu3 %v1248_v26  ;;  %v830_v20 = vadd.f32 %v2828_v28, %v755_v54 }
 0x2e6   :  { %1772 = vst.msk [vmem:[%s3317_s9 + $0x20] sm:$0xff] %vm1767_vm1, %v1619_v16  ;;  %1657 = vmatmul.bf16.gmra.mxu0 %v1509_v48  ;;  %v1107_v17 = vpop.f32.mrf.mxu2 }
 0x2e7   :  { %v1108_v6 = vadd.f32 %v2929_v7, %v1107_v17  ;;  %v893_v15 = vmax.f32 %v830_v20, 0.0 }
 0x2e8   :  { %v1395_v18 = vpop.f32.mrf.mxu3 }
 0x2e9   :  { %v1206_v33 = vmax.f32 %v1108_v6, 0.0 }
 0x2ea   :  { %v756_v9 = vpop.f32.mrf.mxu1 }
 0x2eb   :  { %v757_v62 = vadd.f32 %v756_v9, %v2690_v30  ;;  %v1620_v32 = vpop.f32.mrf.mxu0  ;;  %v1396_v30 = vadd.f32 %v2781_v0, %v1395_v18 }
 0x2ec   :  { %v1621_v21 = vadd.f32 %v2889_v4, %v1620_v32 }
 0x2ed   :  { %v831_v23 = vadd.f32 %v2828_v28, %v757_v62 }
 0x2ee   :  { %1773 = vst.msk [vmem:[%s3317_s9 + $0x28] sm:$0xff] %vm1767_vm1, %v1621_v21  ;;  %v1109_v8 = vpop.f32.mrf.mxu2 }
 0x2ef   :  { %v894_v46 = vmax.f32 %v831_v23, 0.0  ;;  %v1110_v25 = vadd.f32 %v2929_v7, %v1109_v8 }
 0x2f0   :  { %v1397_v34 = vpop.f32.mrf.mxu3 }
 0x2f1   :  { %v1207_v29 = vmax.f32 %v1110_v25, 0.0  ;;  %v1398_v52 = vadd.f32 %v2781_v0, %v1397_v34  ;;  %v927_v12 = vpack.c.bf16 %v894_v46, %v893_v15 }
 0x2f2   :  { %v759_v3 = vpop.f32.mrf.mxu1 }
 0x2f3   :  { %v1249_v36 = vpack.c.bf16 %v1207_v29, %v1206_v33  ;;  %v1510_v40 = vpack.c.bf16 %v1398_v52, %v1396_v30  ;;  %v1623_v43 = vpop.f32.mrf.mxu0  ;;  %1151 = vmatmul.bf16.gmra.mxu2 %v927_v12  ;;  %v760_v42 = vadd.f32 %v759_v3, %v2706_v27 }
 0x2f4   :  { %v1624_v39 = vadd.f32 %v2889_v4, %v1623_v43 }
 0x2f5   :  { %1439 = vmatmul.bf16.gmra.mxu3 %v1249_v36  ;;  %v832_v44 = vadd.f32 %v2828_v28, %v760_v42 }
 0x2f6   :  { %1774 = vst.msk [vmem:[%s3317_s9 + $0x30] sm:$0xff] %vm1767_vm1, %v1624_v39  ;;  %1662 = vmatmul.bf16.gmra.mxu0 %v1510_v40  ;;  %v1112_v50 = vpop.f32.mrf.mxu2 }
 0x2f7   :  { %v1113_v47 = vadd.f32 %v2929_v7, %v1112_v50  ;;  %v895_v27 = vmax.f32 %v832_v44, 0.0 }
 0x2f8   :  { %v1400_v41 = vpop.f32.mrf.mxu3 }
 0x2f9   :  { %v1208_v11 = vmax.f32 %v1113_v47, 0.0 }
 0x2fa   :  { %v761_v35 = vpop.f32.mrf.mxu1 }
 0x2fb   :  { %v762_v22 = vadd.f32 %v761_v35, %v2710_v14  ;;  %v1625_v13 = vpop.f32.mrf.mxu0  ;;  %v1401_v14 = vadd.f32 %v2781_v0, %v1400_v41 }
 0x2fc   :  { %v1626_v55 = vadd.f32 %v2889_v4, %v1625_v13 }
 0x2fd   :  { %v833_v56 = vadd.f32 %v2828_v28, %v762_v22 }
 0x2fe   :  { %1775 = vst.msk [vmem:[%s3317_s9 + $0x38] sm:$0xff] %vm1767_vm1, %v1626_v55  ;;  %v1114_v2 = vpop.f32.mrf.mxu2 }
 0x2ff   :  { %v896_v24 = vmax.f32 %v833_v56, 0.0  ;;  %v1115_v53 = vadd.f32 %v2929_v7, %v1114_v2 }
 0x300   :  { %v1402_v51 = vpop.f32.mrf.mxu3 }
 0x301   :  { %v1209_v57 = vmax.f32 %v1115_v53, 0.0  ;;  %v1403_v58 = vadd.f32 %v2781_v0, %v1402_v51  ;;  %v928_v19 = vpack.c.bf16 %v896_v24, %v895_v27 }
 0x302   :  { %v764_v31 = vpop.f32.mrf.mxu1 }
 0x303   :  { %v1250_v59 = vpack.c.bf16 %v1209_v57, %v1208_v11  ;;  %v1511_v49 = vpack.c.bf16 %v1403_v58, %v1401_v14  ;;  %v1628_v45 = vpop.f32.mrf.mxu0  ;;  %1156 = vmatmul.bf16.gmra.mxu2 %v928_v19  ;;  %v765_v38 = vadd.f32 %v764_v31, %v2726_v37 }
 0x304   :  { %v1629_v61 = vadd.f32 %v2889_v4, %v1628_v45 }
 0x305   :  { %1444 = vmatmul.bf16.gmra.mxu3 %v1250_v59  ;;  %v834_v63 = vadd.f32 %v2828_v28, %v765_v38 }
 0x306   :  { %1776 = vst.msk [vmem:[%s3317_s9 + $0x40] sm:$0xff] %vm1767_vm1, %v1629_v61  ;;  %1667 = vmatmul.bf16.gmra.mxu0 %v1511_v49  ;;  %v1117_v10 = vpop.f32.mrf.mxu2 }
 0x307   :  { %v897_v60 = vmax.f32 %v834_v63, 0.0  ;;  %v1118_v37 = vadd.f32 %v2929_v7, %v1117_v10 }
 0x308   :  { %v1405_v1 = vpop.f32.mrf.mxu3 }
 0x309   :  { %v929_v54 = vpack.c.bf16 %v897_v60, %v897_v60  ;;  %v1210_v9 = vmax.f32 %v1118_v37, 0.0  ;;  %v1406_v28 = vadd.f32 %v2781_v0, %v1405_v1 }
 0x30a   :  { %v766_v5 = vpop.f32.mrf.mxu1 }
 0x30b   :  { %v1630_v48 = vpop.f32.mrf.mxu0 }
 0x30c   :  { %v1631_v26 = vadd.f32 %v2889_v4, %v1630_v48 }
 0x30e   :  { %1777 = vst.msk [vmem:[%s3317_s9 + $0x48] sm:$0xff] %vm1767_vm1, %v1631_v26  ;;  %v1119_v16 = vpop.f32.mrf.mxu2 }
 0x30f   :  { %v1120_v17 = vadd.f32 %v2929_v7, %v1119_v16 }
 0x310   :  { %v1407_v18 = vpop.f32.mrf.mxu3 }
 0x311   :  { %v1211_v20 = vmax.f32 %v1120_v17, 0.0  ;;  %v1408_v62 = vadd.f32 %v2781_v0, %v1407_v18 }
 0x313   :  { %v1251_v32 = vpack.c.bf16 %v1211_v20, %v1210_v9  ;;  %v1512_v6 = vpack.c.bf16 %v1408_v62, %v1406_v28  ;;  %v1633_v21 = vpop.f32.mrf.mxu0  ;;  %1161 = vmatmul.bf16.gmra.mxu2 %v929_v54 }
 0x314   :  { %v1634_v23 = vadd.f32 %v2889_v4, %v1633_v21 }
 0x315   :  { %1449 = vmatmul.bf16.gmra.mxu3 %v1251_v32 }
 0x316   :  { %1778 = vst.msk [vmem:[%s3317_s9 + $0x50] sm:$0xff] %vm1767_vm1, %v1634_v23  ;;  %1672 = vmatmul.bf16.gmra.mxu0 %v1512_v6  ;;  %v1122_v8 = vpop.f32.mrf.mxu2 }
 0x317   :  { %v1123_v33 = vadd.f32 %v2929_v7, %v1122_v8 }
 0x318   :  { %v1410_v15 = vpop.f32.mrf.mxu3 }
 0x319   :  { %v1212_v52 = vmax.f32 %v1123_v33, 0.0  ;;  %v1411_v12 = vadd.f32 %v2781_v0, %v1410_v15 }
 0x31b   :  { %v1635_v46 = vpop.f32.mrf.mxu0 }
 0x31c   :  { %v1636_v25 = vadd.f32 %v2889_v4, %v1635_v46 }
 0x31e   :  { %1779 = vst.msk [vmem:[%s3317_s9 + $0x58] sm:$0xff] %vm1767_vm1, %v1636_v25  ;;  %v1124_v34 = vpop.f32.mrf.mxu2 }
 0x31f   :  { %v1125_v30 = vadd.f32 %v2929_v7, %v1124_v34 }
 0x320   :  { %v1412_v29 = vpop.f32.mrf.mxu3 }
 0x321   :  { %v1213_v3 = vmax.f32 %v1125_v30, 0.0  ;;  %v1413_v36 = vadd.f32 %v2781_v0, %v1412_v29 }
 0x323   :  { %v1252_v40 = vpack.c.bf16 %v1213_v3, %v1212_v52  ;;  %v1513_v43 = vpack.c.bf16 %v1413_v36, %v1411_v12  ;;  %v1638_v39 = vpop.f32.mrf.mxu0 }
 0x324   :  { %v1639_v50 = vadd.f32 %v2889_v4, %v1638_v39 }
 0x325   :  { %1454 = vmatmul.bf16.gmra.mxu3 %v1252_v40 }
 0x326   :  { %1780 = vst.msk [vmem:[%s3317_s9 + $0x60] sm:$0xff] %vm1767_vm1, %v1639_v50  ;;  %1677 = vmatmul.bf16.gmra.mxu0 %v1513_v43  ;;  %v1127_v42 = vpop.f32.mrf.mxu2 }
 0x327   :  { %v1128_v22 = vadd.f32 %v2929_v7, %v1127_v42 }
 0x328   :  { %v1415_v41 = vpop.f32.mrf.mxu3 }
 0x329   :  { %v1214_v56 = vmax.f32 %v1128_v22, 0.0  ;;  %v1416_v2 = vadd.f32 %v2781_v0, %v1415_v41 }
 0x32b   :  { %v1640_v35 = vpop.f32.mrf.mxu0 }
 0x32c   :  { %v1641_v44 = vadd.f32 %v2889_v4, %v1640_v35 }
 0x32e   :  { %1781 = vst.msk [vmem:[%s3317_s9 + $0x68] sm:$0xff] %vm1767_vm1, %v1641_v44  ;;  %v1129_v13 = vpop.f32.mrf.mxu2 }
 0x32f   :  { %v1130_v47 = vadd.f32 %v2929_v7, %v1129_v13 }
 0x330   :  { %v1417_v55 = vpop.f32.mrf.mxu3 }
 0x331   :  { %v1215_v27 = vmax.f32 %v1130_v47, 0.0  ;;  %v1418_v24 = vadd.f32 %v2781_v0, %v1417_v55 }
 0x333   :  { %v1253_v53 = vpack.c.bf16 %v1215_v27, %v1214_v56  ;;  %v1514_v11 = vpack.c.bf16 %v1418_v24, %v1416_v2  ;;  %v1643_v51 = vpop.f32.mrf.mxu0 }
 0x334   :  { %v1644_v14 = vadd.f32 %v2889_v4, %v1643_v51 }
 0x335   :  { %1459 = vmatmul.bf16.gmra.mxu3 %v1253_v53 }
 0x336   :  { %1782 = vst.msk [vmem:[%s3317_s9 + $0x70] sm:$0xff] %vm1767_vm1, %v1644_v14  ;;  %1682 = vmatmul.bf16.gmra.mxu0 %v1514_v11  ;;  %v1132_v57 = vpop.f32.mrf.mxu2 }
 0x337   :  { %v1133_v59 = vadd.f32 %v2929_v7, %v1132_v57 }
 0x338   :  { %v1420_v58 = vpop.f32.mrf.mxu3 }
 0x339   :  { %v1216_v61 = vmax.f32 %v1133_v59, 0.0  ;;  %v1421_v10 = vadd.f32 %v2781_v0, %v1420_v58 }
 0x33b   :  { %v1645_v19 = vpop.f32.mrf.mxu0 }
 0x33c   :  { %v1646_v31 = vadd.f32 %v2889_v4, %v1645_v19 }
 0x33e   :  { %1783 = vst.msk [vmem:[%s3317_s9 + $0x78] sm:$0xff] %vm1767_vm1, %v1646_v31  ;;  %v1134_v49 = vpop.f32.mrf.mxu2 }
 0x33f   :  { %v1135_v45 = vadd.f32 %v2929_v7, %v1134_v49 }
 0x340   :  { %v1422_v38 = vpop.f32.mrf.mxu3 }
 0x341   :  { %v1217_v63 = vmax.f32 %v1135_v45, 0.0  ;;  %v1423_v1 = vadd.f32 %v2781_v0, %v1422_v38 }
 0x343   :  { %v1254_v5 = vpack.c.bf16 %v1217_v63, %v1216_v61  ;;  %v1515_v48 = vpack.c.bf16 %v1423_v1, %v1421_v10  ;;  %v1648_v60 = vpop.f32.mrf.mxu0  ;;  %v3085_v1 = vld [vmem:[%s3314_s6 + $0x1] ss:$0 sm:$0xff] }
 0x344   :  { %v1649_v26 = vadd.f32 %v2889_v4, %v1648_v60 }
 0x345   :  { %1464 = vmatmul.bf16.gmra.mxu3 %v1254_v5 }
 0x346   :  { %1784 = vst.msk [vmem:[%s3317_s9 + $0x80] sm:$0xff] %vm1767_vm1, %v1649_v26  ;;  %1687 = vmatmul.bf16.gmra.mxu0 %v1515_v48  ;;  %v1137_v37 = vpop.f32.mrf.mxu2 }
 0x347   :  { %v1138_v18 = vadd.f32 %v2929_v7, %v1137_v37 }
 0x348   :  { %v1425_v16 = vpop.f32.mrf.mxu3 }
 0x349   :  { %v1218_v62 = vmax.f32 %v1138_v18, 0.0  ;;  %v1426_v32 = vadd.f32 %v2781_v0, %v1425_v16 }
 0x34b   :  { %v1650_v17 = vpop.f32.mrf.mxu0 }
 0x34c   :  { %v1651_v54 = vadd.f32 %v2889_v4, %v1650_v17 }
 0x34e   :  { %1785 = vst.msk [vmem:[%s3317_s9 + $0x88] sm:$0xff] %vm1767_vm1, %v1651_v54  ;;  %v1139_v9 = vpop.f32.mrf.mxu2 }
 0x34f   :  { %v1140_v28 = vadd.f32 %v2929_v7, %v1139_v9 }
 0x350   :  { %v1427_v20 = vpop.f32.mrf.mxu3 }
 0x351   :  { %v1219_v6 = vmax.f32 %v1140_v28, 0.0  ;;  %v1428_v21 = vadd.f32 %v2781_v0, %v1427_v20 }
 0x353   :  { %v1255_v23 = vpack.c.bf16 %v1219_v6, %v1218_v62  ;;  %v1516_v8 = vpack.c.bf16 %v1428_v21, %v1426_v32  ;;  %v1653_v15 = vpop.f32.mrf.mxu0 }
 0x354   :  { %v1654_v46 = vadd.f32 %v2889_v4, %v1653_v15 }
 0x355   :  { %1469 = vmatmul.bf16.gmra.mxu3 %v1255_v23 }
 0x356   :  { %1786 = vst.msk [vmem:[%s3317_s9 + $0x90] sm:$0xff] %vm1767_vm1, %v1654_v46  ;;  %1692 = vmatmul.bf16.gmra.mxu0 %v1516_v8  ;;  %v1142_v25 = vpop.f32.mrf.mxu2 }
 0x357   :  { %v1143_v29 = vadd.f32 %v2929_v7, %v1142_v25 }
 0x358   :  { %v1430_v33 = vpop.f32.mrf.mxu3 }
 0x359   :  { %v1220_v36 = vmax.f32 %v1143_v29, 0.0  ;;  %v1431_v40 = vadd.f32 %v2781_v0, %v1430_v33 }
 0x35b   :  { %v1655_v34 = vpop.f32.mrf.mxu0 }
 0x35c   :  { %v1656_v30 = vadd.f32 %v2889_v4, %v1655_v34 }
 0x35e   :  { %1787 = vst.msk [vmem:[%s3317_s9 + $0x98] sm:$0xff] %vm1767_vm1, %v1656_v30  ;;  %v1144_v52 = vpop.f32.mrf.mxu2 }
 0x35f   :  { %v1145_v12 = vadd.f32 %v2929_v7, %v1144_v52 }
 0x360   :  { %v1432_v3 = vpop.f32.mrf.mxu3 }
 0x361   :  { %v1221_v43 = vmax.f32 %v1145_v12, 0.0  ;;  %v1433_v39 = vadd.f32 %v2781_v0, %v1432_v3 }
 0x363   :  { %v1256_v50 = vpack.c.bf16 %v1221_v43, %v1220_v36  ;;  %v1517_v42 = vpack.c.bf16 %v1433_v39, %v1431_v40  ;;  %v1658_v41 = vpop.f32.mrf.mxu0 }
 0x364   :  { %v1659_v35 = vadd.f32 %v2889_v4, %v1658_v41 }
 0x365   :  { %1474 = vmatmul.bf16.gmra.mxu3 %v1256_v50 }
 0x366   :  { %1788 = vst.msk [vmem:[%s3317_s9 + $0xa0] sm:$0xff] %vm1767_vm1, %v1659_v35  ;;  %1697 = vmatmul.bf16.gmra.mxu0 %v1517_v42  ;;  %v1147_v44 = vpop.f32.mrf.mxu2 }
 0x367   :  { %v1148_v55 = vadd.f32 %v2929_v7, %v1147_v44 }
 0x368   :  { %v1435_v22 = vpop.f32.mrf.mxu3 }
 0x369   :  { %v1222_v24 = vmax.f32 %v1148_v55, 0.0  ;;  %v1436_v53 = vadd.f32 %v2781_v0, %v1435_v22 }
 0x36b   :  { %v1660_v13 = vpop.f32.mrf.mxu0 }
 0x36c   :  { %v1661_v47 = vadd.f32 %v2889_v4, %v1660_v13 }
 0x36e   :  { %1789 = vst.msk [vmem:[%s3317_s9 + $0xa8] sm:$0xff] %vm1767_vm1, %v1661_v47  ;;  %v1149_v56 = vpop.f32.mrf.mxu2 }
 0x36f   :  { %v1150_v2 = vadd.f32 %v2929_v7, %v1149_v56 }
 0x370   :  { %v1437_v27 = vpop.f32.mrf.mxu3 }
 0x371   :  { %v1223_v11 = vmax.f32 %v1150_v2, 0.0  ;;  %v1438_v51 = vadd.f32 %v2781_v0, %v1437_v27 }
 0x373   :  { %v1257_v14 = vpack.c.bf16 %v1223_v11, %v1222_v24  ;;  %v1518_v57 = vpack.c.bf16 %v1438_v51, %v1436_v53  ;;  %v1663_v58 = vpop.f32.mrf.mxu0 }
 0x374   :  { %v1664_v19 = vadd.f32 %v2889_v4, %v1663_v58 }
 0x375   :  { %1479 = vmatmul.bf16.gmra.mxu3 %v1257_v14 }
 0x376   :  { %1790 = vst.msk [vmem:[%s3317_s9 + $0xb0] sm:$0xff] %vm1767_vm1, %v1664_v19  ;;  %1702 = vmatmul.bf16.gmra.mxu0 %v1518_v57  ;;  %v1152_v31 = vpop.f32.mrf.mxu2 }
 0x377   :  { %v1153_v38 = vadd.f32 %v2929_v7, %v1152_v31 }
 0x378   :  { %v1440_v59 = vpop.f32.mrf.mxu3 }
 0x379   :  { %v1224_v63 = vmax.f32 %v1153_v38, 0.0  ;;  %v1441_v5 = vadd.f32 %v3085_v1, %v1440_v59 }
 0x37b   :  { %v1665_v49 = vpop.f32.mrf.mxu0 }
 0x37c   :  { %v1666_v45 = vadd.f32 %v2889_v4, %v1665_v49 }
 0x37e   :  { %1791 = vst.msk [vmem:[%s3317_s9 + $0xb8] sm:$0xff] %vm1767_vm1, %v1666_v45  ;;  %v1154_v0 = vpop.f32.mrf.mxu2 }
 0x37f   :  { %v1155_v61 = vadd.f32 %v2929_v7, %v1154_v0 }
 0x380   :  { %v1442_v10 = vpop.f32.mrf.mxu3 }
 0x381   :  { %v1225_v48 = vmax.f32 %v1155_v61, 0.0  ;;  %v1443_v60 = vadd.f32 %v3085_v1, %v1442_v10 }
 0x383   :  { %v1258_v26 = vpack.c.bf16 %v1225_v48, %v1224_v63  ;;  %v1519_v37 = vpack.c.bf16 %v1443_v60, %v1441_v5  ;;  %v1668_v16 = vpop.f32.mrf.mxu0 }
 0x384   :  { %v1669_v17 = vadd.f32 %v2889_v4, %v1668_v16 }
 0x385   :  { %1484 = vmatmul.bf16.gmra.mxu3 %v1258_v26 }
 0x386   :  { %1792 = vst.msk [vmem:[%s3317_s9 + $0xc0] sm:$0xff] %vm1767_vm1, %v1669_v17  ;;  %1707 = vmatmul.bf16.gmra.mxu0 %v1519_v37  ;;  %v1157_v54 = vpop.f32.mrf.mxu2 }
 0x387   :  { %v1158_v20 = vadd.f32 %v2929_v7, %v1157_v54 }
 0x388   :  { %v1445_v18 = vpop.f32.mrf.mxu3 }
 0x389   :  { %v1226_v21 = vmax.f32 %v1158_v20, 0.0  ;;  %v1446_v23 = vadd.f32 %v3085_v1, %v1445_v18 }
 0x38b   :  { %v1670_v9 = vpop.f32.mrf.mxu0 }
 0x38c   :  { %v1671_v28 = vadd.f32 %v2889_v4, %v1670_v9 }
 0x38e   :  { %1793 = vst.msk [vmem:[%s3317_s9 + $0xc8] sm:$0xff] %vm1767_vm1, %v1671_v28  ;;  %v1159_v62 = vpop.f32.mrf.mxu2 }
 0x38f   :  { %v1160_v32 = vadd.f32 %v2929_v7, %v1159_v62 }
 0x390   :  { %v1447_v6 = vpop.f32.mrf.mxu3 }
 0x391   :  { %v1227_v8 = vmax.f32 %v1160_v32, 0.0  ;;  %v1448_v15 = vadd.f32 %v3085_v1, %v1447_v6 }
 0x393   :  { %v1259_v46 = vpack.c.bf16 %v1227_v8, %v1226_v21  ;;  %v1520_v25 = vpack.c.bf16 %v1448_v15, %v1446_v23  ;;  %v1673_v33 = vpop.f32.mrf.mxu0 }
 0x394   :  { %v1674_v34 = vadd.f32 %v2889_v4, %v1673_v33 }
 0x395   :  { %1489 = vmatmul.bf16.gmra.mxu3 %v1259_v46 }
 0x396   :  { %1794 = vst.msk [vmem:[%s3317_s9 + $0xd0] sm:$0xff] %vm1767_vm1, %v1674_v34  ;;  %1712 = vmatmul.bf16.gmra.mxu0 %v1520_v25  ;;  %v1162_v30 = vpop.f32.mrf.mxu2 }
 0x397   :  { %v1163_v52 = vadd.f32 %v2929_v7, %v1162_v30 }
 0x398   :  { %v1450_v29 = vpop.f32.mrf.mxu3 }
 0x399   :  { %v1228_v40 = vmax.f32 %v1163_v52, 0.0  ;;  %v1451_v39 = vadd.f32 %v3085_v1, %v1450_v29 }
 0x39b   :  { %v1675_v12 = vpop.f32.mrf.mxu0  ;;  %v1260_v42 = vpack.c.bf16 %v1228_v40, %v1228_v40 }
 0x39c   :  { %v1676_v3 = vadd.f32 %v2889_v4, %v1675_v12 }
 0x39e   :  { %1795 = vst.msk [vmem:[%s3317_s9 + $0xd8] sm:$0xff] %vm1767_vm1, %v1676_v3  ;;  %v1164_v36 = vpop.f32.mrf.mxu2 }
 0x3a0   :  { %v1452_v43 = vpop.f32.mrf.mxu3 }
 0x3a1   :  { %v1453_v50 = vadd.f32 %v3085_v1, %v1452_v43 }
 0x3a3   :  { %v1521_v41 = vpack.c.bf16 %v1453_v50, %v1451_v39  ;;  %v1678_v35 = vpop.f32.mrf.mxu0 }
 0x3a4   :  { %v1679_v7 = vadd.f32 %v2889_v4, %v1678_v35 }
 0x3a5   :  { %1494 = vmatmul.bf16.gmra.mxu3 %v1260_v42 }
 0x3a6   :  { %1796 = vst.msk [vmem:[%s3317_s9 + $0xe0] sm:$0xff] %vm1767_vm1, %v1679_v7  ;;  %1717 = vmatmul.bf16.gmra.mxu0 %v1521_v41 }
 0x3a8   :  { %v1455_v44 = vpop.f32.mrf.mxu3 }
 0x3a9   :  { %v1456_v55 = vadd.f32 %v3085_v1, %v1455_v44 }
 0x3ab   :  { %v1680_v22 = vpop.f32.mrf.mxu0 }
 0x3ac   :  { %v1681_v13 = vadd.f32 %v2889_v4, %v1680_v22 }
 0x3ae   :  { %1797 = vst.msk [vmem:[%s3317_s9 + $0xe8] sm:$0xff] %vm1767_vm1, %v1681_v13 }
 0x3b0   :  { %v1457_v47 = vpop.f32.mrf.mxu3 }
 0x3b1   :  { %v1458_v56 = vadd.f32 %v3085_v1, %v1457_v47 }
 0x3b3   :  { %v1522_v2 = vpack.c.bf16 %v1458_v56, %v1456_v55  ;;  %v1683_v27 = vpop.f32.mrf.mxu0 }
 0x3b4   :  { %v1684_v24 = vadd.f32 %v2889_v4, %v1683_v27 }
 0x3b6   :  { %1798 = vst.msk [vmem:[%s3317_s9 + $0xf0] sm:$0xff] %vm1767_vm1, %v1684_v24  ;;  %1722 = vmatmul.bf16.gmra.mxu0 %v1522_v2 }
 0x3b8   :  { %v1460_v53 = vpop.f32.mrf.mxu3 }
 0x3b9   :  { %v1461_v57 = vadd.f32 %v3085_v1, %v1460_v53 }
 0x3bb   :  { %v1685_v11 = vpop.f32.mrf.mxu0 }
 0x3bc   :  { %v1686_v51 = vadd.f32 %v2889_v4, %v1685_v11 }
 0x3be   :  { %1799 = vst.msk [vmem:[%s3317_s9 + $0xf8] sm:$0xff] %vm1767_vm1, %v1686_v51 }
 0x3c0   :  { %v1462_v14 = vpop.f32.mrf.mxu3 }
 0x3c1   :  { %v1463_v58 = vadd.f32 %v3085_v1, %v1462_v14 }
 0x3c3   :  { %v1523_v19 = vpack.c.bf16 %v1463_v58, %v1461_v57  ;;  %v1688_v31 = vpop.f32.mrf.mxu0 }
 0x3c4   :  { %v1689_v59 = vadd.f32 %v2889_v4, %v1688_v31 }
 0x3c6   :  { %1800 = vst.msk [vmem:[%s3317_s9 + $0x100] sm:$0xff] %vm1767_vm1, %v1689_v59  ;;  %1727 = vmatmul.bf16.gmra.mxu0 %v1523_v19 }
 0x3c8   :  { %v1465_v49 = vpop.f32.mrf.mxu3 }
 0x3c9   :  { %v1466_v61 = vadd.f32 %v3085_v1, %v1465_v49 }
 0x3cb   :  { %v1690_v45 = vpop.f32.mrf.mxu0 }
 0x3cc   :  { %v1691_v38 = vadd.f32 %v2889_v4, %v1690_v45 }
 0x3ce   :  { %1801 = vst.msk [vmem:[%s3317_s9 + $0x108] sm:$0xff] %vm1767_vm1, %v1691_v38 }
 0x3d0   :  { %v1467_v0 = vpop.f32.mrf.mxu3 }
 0x3d1   :  { %v1468_v10 = vadd.f32 %v3085_v1, %v1467_v0 }
 0x3d3   :  { %v1524_v63 = vpack.c.bf16 %v1468_v10, %v1466_v61  ;;  %v1693_v5 = vpop.f32.mrf.mxu0 }
 0x3d4   :  { %v1694_v48 = vadd.f32 %v2889_v4, %v1693_v5 }
 0x3d6   :  { %1802 = vst.msk [vmem:[%s3317_s9 + $0x110] sm:$0xff] %vm1767_vm1, %v1694_v48  ;;  %1732 = vmatmul.bf16.gmra.mxu0 %v1524_v63 }
 0x3d8   :  { %v1470_v60 = vpop.f32.mrf.mxu3 }
 0x3d9   :  { %v1471_v17 = vadd.f32 %v3085_v1, %v1470_v60 }
 0x3db   :  { %v1695_v26 = vpop.f32.mrf.mxu0 }
 0x3dc   :  { %v1696_v37 = vadd.f32 %v2889_v4, %v1695_v26 }
 0x3de   :  { %1803 = vst.msk [vmem:[%s3317_s9 + $0x118] sm:$0xff] %vm1767_vm1, %v1696_v37 }
 0x3e0   :  { %v1472_v16 = vpop.f32.mrf.mxu3 }
 0x3e1   :  { %v1473_v54 = vadd.f32 %v3085_v1, %v1472_v16 }
 0x3e3   :  { %v1525_v18 = vpack.c.bf16 %v1473_v54, %v1471_v17  ;;  %v1698_v9 = vpop.f32.mrf.mxu0 }
 0x3e4   :  { %v1699_v28 = vadd.f32 %v2889_v4, %v1698_v9 }
 0x3e6   :  { %1804 = vst.msk [vmem:[%s3317_s9 + $0x120] sm:$0xff] %vm1767_vm1, %v1699_v28  ;;  %1737 = vmatmul.bf16.gmra.mxu0 %v1525_v18 }
 0x3e8   :  { %v1475_v20 = vpop.f32.mrf.mxu3 }
 0x3e9   :  { %v1476_v21 = vadd.f32 %v3085_v1, %v1475_v20 }
 0x3eb   :  { %v1700_v62 = vpop.f32.mrf.mxu0 }
 0x3ec   :  { %v1701_v32 = vadd.f32 %v2889_v4, %v1700_v62 }
 0x3ee   :  { %1805 = vst.msk [vmem:[%s3317_s9 + $0x128] sm:$0xff] %vm1767_vm1, %v1701_v32 }
 0x3f0   :  { %v1477_v6 = vpop.f32.mrf.mxu3 }
 0x3f1   :  { %v1478_v23 = vadd.f32 %v3085_v1, %v1477_v6 }
 0x3f3   :  { %v1526_v8 = vpack.c.bf16 %v1478_v23, %v1476_v21  ;;  %v1703_v15 = vpop.f32.mrf.mxu0 }
 0x3f4   :  { %v1704_v46 = vadd.f32 %v2889_v4, %v1703_v15 }
 0x3f6   :  { %1806 = vst.msk [vmem:[%s3317_s9 + $0x130] sm:$0xff] %vm1767_vm1, %v1704_v46  ;;  %1742 = vmatmul.bf16.gmra.mxu0 %v1526_v8 }
 0x3f8   :  { %v1480_v25 = vpop.f32.mrf.mxu3 }
 0x3f9   :  { %v1481_v29 = vadd.f32 %v3085_v1, %v1480_v25 }
 0x3fb   :  { %v1705_v33 = vpop.f32.mrf.mxu0 }
 0x3fc   :  { %v1706_v34 = vadd.f32 %v2889_v4, %v1705_v33 }
 0x3fe   :  { %1807 = vst.msk [vmem:[%s3317_s9 + $0x138] sm:$0xff] %vm1767_vm1, %v1706_v34 }
 0x400   :  { %v1482_v30 = vpop.f32.mrf.mxu3 }
 0x401   :  { %v1483_v52 = vadd.f32 %v3085_v1, %v1482_v30 }
 0x403   :  { %v1527_v12 = vpack.c.bf16 %v1483_v52, %v1481_v29  ;;  %v1708_v3 = vpop.f32.mrf.mxu0 }
 0x404   :  { %v1709_v36 = vadd.f32 %v2889_v4, %v1708_v3 }
 0x406   :  { %1808 = vst.msk [vmem:[%s3317_s9 + $0x140] sm:$0xff] %vm1767_vm1, %v1709_v36  ;;  %1747 = vmatmul.bf16.gmra.mxu0 %v1527_v12 }
 0x408   :  { %v1485_v40 = vpop.f32.mrf.mxu3 }
 0x409   :  { %v1486_v42 = vadd.f32 %v3085_v1, %v1485_v40 }
 0x40b   :  { %v1710_v43 = vpop.f32.mrf.mxu0 }
 0x40c   :  { %v1711_v39 = vadd.f32 %v2889_v4, %v1710_v43 }
 0x40e   :  { %1809 = vst.msk [vmem:[%s3317_s9 + $0x148] sm:$0xff] %vm1767_vm1, %v1711_v39 }
 0x410   :  { %v1487_v50 = vpop.f32.mrf.mxu3 }
 0x411   :  { %v1488_v41 = vadd.f32 %v3085_v1, %v1487_v50 }
 0x413   :  { %v1528_v35 = vpack.c.bf16 %v1488_v41, %v1486_v42  ;;  %v1713_v7 = vpop.f32.mrf.mxu0 }
 0x414   :  { %v1714_v44 = vadd.f32 %v2889_v4, %v1713_v7 }
 0x416   :  { %1810 = vst.msk [vmem:[%s3317_s9 + $0x150] sm:$0xff] %vm1767_vm1, %v1714_v44  ;;  %1752 = vmatmul.bf16.gmra.mxu0 %v1528_v35 }
 0x418   :  { %v1490_v22 = vpop.f32.mrf.mxu3 }
 0x419   :  { %v1491_v56 = vadd.f32 %v3085_v1, %v1490_v22 }
 0x41b   :  { %v1715_v13 = vpop.f32.mrf.mxu0 }
 0x41c   :  { %v1716_v47 = vadd.f32 %v2889_v4, %v1715_v13 }
 0x41e   :  { %1811 = vst.msk [vmem:[%s3317_s9 + $0x158] sm:$0xff] %vm1767_vm1, %v1716_v47 }
 0x420   :  { %v1492_v55 = vpop.f32.mrf.mxu3 }
 0x421   :  { %v1493_v2 = vadd.f32 %v3085_v1, %v1492_v55 }
 0x423   :  { %v1529_v27 = vpack.c.bf16 %v1493_v2, %v1491_v56  ;;  %v1718_v24 = vpop.f32.mrf.mxu0 }
 0x424   :  { %v1719_v53 = vadd.f32 %v2889_v4, %v1718_v24 }
 0x426   :  { %1812 = vst.msk [vmem:[%s3317_s9 + $0x160] sm:$0xff] %vm1767_vm1, %v1719_v53  ;;  %1757 = vmatmul.bf16.gmra.mxu0 %v1529_v27 }
 0x428   :  { %v1495_v11 = vpop.f32.mrf.mxu3 }
 0x429   :  { %v1496_v51 = vadd.f32 %v3085_v1, %v1495_v11 }
 0x42b   :  { %v1530_v14 = vpack.c.bf16 %v1496_v51, %v1496_v51  ;;  %v1720_v57 = vpop.f32.mrf.mxu0 }
 0x42c   :  { %v1721_v58 = vadd.f32 %v2889_v4, %v1720_v57 }
 0x42d   :  { %1762 = vmatmul.bf16.vlgmr.msra.gmra.mxu3 %v1530_v14 }
 0x42e   :  { %1813 = vst.msk [vmem:[%s3317_s9 + $0x168] sm:$0xff] %vm1767_vm1, %v1721_v58 }
 0x430   :  { %v1497_v19 = vpop.f32.mrf.mxu3 }
 0x433   :  { %v1723_v31 = vpop.f32.mrf.mxu0 }
 0x434   :  { %v1724_v59 = vadd.f32 %v2889_v4, %v1723_v31 }
 0x436   :  { %1814 = vst.msk [vmem:[%s3317_s9 + $0x170] sm:$0xff] %vm1767_vm1, %v1724_v59 }
 0x43b   :  { %v1725_v1 = vpop.f32.mrf.mxu0 }
 0x43c   :  { %v1726_v49 = vadd.f32 %v2889_v4, %v1725_v1 }
 0x43e   :  { %1815 = vst.msk [vmem:[%s3317_s9 + $0x178] sm:$0xff] %vm1767_vm1, %v1726_v49 }
 0x443   :  { %v1728_v45 = vpop.f32.mrf.mxu0 }
 0x444   :  { %v1729_v38 = vadd.f32 %v2889_v4, %v1728_v45 }
 0x446   :  { %1816 = vst.msk [vmem:[%s3317_s9 + $0x180] sm:$0xff] %vm1767_vm1, %v1729_v38 }
 0x44b   :  { %v1730_v0 = vpop.f32.mrf.mxu0 }
 0x44c   :  { %v1731_v61 = vadd.f32 %v2889_v4, %v1730_v0 }
 0x44e   :  { %1817 = vst.msk [vmem:[%s3317_s9 + $0x188] sm:$0xff] %vm1767_vm1, %v1731_v61 }
 0x453   :  { %v1733_v10 = vpop.f32.mrf.mxu0 }
 0x454   :  { %v1734_v63 = vadd.f32 %v2889_v4, %v1733_v10 }
 0x456   :  { %1818 = vst.msk [vmem:[%s3317_s9 + $0x190] sm:$0xff] %vm1767_vm1, %v1734_v63 }
 0x45b   :  { %v1735_v5 = vpop.f32.mrf.mxu0 }
 0x45c   :  { %v1736_v48 = vadd.f32 %v2889_v4, %v1735_v5 }
 0x45e   :  { %1819 = vst.msk [vmem:[%s3317_s9 + $0x198] sm:$0xff] %vm1767_vm1, %v1736_v48 }
 0x463   :  { %v1738_v60 = vpop.f32.mrf.mxu0 }
 0x464   :  { %v1739_v26 = vadd.f32 %v2889_v4, %v1738_v60 }
 0x466   :  { %1820 = vst.msk [vmem:[%s3317_s9 + $0x1a0] sm:$0xff] %vm1767_vm1, %v1739_v26 }
 0x46b   :  { %v1740_v37 = vpop.f32.mrf.mxu0 }
 0x46c   :  { %v1741_v16 = vadd.f32 %v2889_v4, %v1740_v37 }
 0x46e   :  { %1821 = vst.msk [vmem:[%s3317_s9 + $0x1a8] sm:$0xff] %vm1767_vm1, %v1741_v16 }
 0x473   :  { %v1743_v17 = vpop.f32.mrf.mxu0 }
 0x474   :  { %v1744_v54 = vadd.f32 %v2889_v4, %v1743_v17 }
 0x476   :  { %1822 = vst.msk [vmem:[%s3317_s9 + $0x1b0] sm:$0xff] %vm1767_vm1, %v1744_v54 }
 0x47b   :  { %v1745_v18 = vpop.f32.mrf.mxu0 }
 0x47c   :  { %v1746_v9 = vadd.f32 %v2889_v4, %v1745_v18 }
 0x47e   :  { %1823 = vst.msk [vmem:[%s3317_s9 + $0x1b8] sm:$0xff] %vm1767_vm1, %v1746_v9 }
 0x483   :  { %v1748_v28 = vpop.f32.mrf.mxu0 }
 0x484   :  { %v1749_v20 = vadd.f32 %v2889_v4, %v1748_v28 }
 0x486   :  { %1824 = vst.msk [vmem:[%s3317_s9 + $0x1c0] sm:$0xff] %vm1767_vm1, %v1749_v20 }
 0x48b   :  { %v1750_v62 = vpop.f32.mrf.mxu0 }
 0x48c   :  { %v1751_v32 = vadd.f32 %v2889_v4, %v1750_v62 }
 0x48e   :  { %1825 = vst.msk [vmem:[%s3317_s9 + $0x1c8] sm:$0xff] %vm1767_vm1, %v1751_v32 }
 0x493   :  { %v1753_v6 = vpop.f32.mrf.mxu0 }
 0x494   :  { %v1754_v21 = vadd.f32 %v2889_v4, %v1753_v6 }
 0x496   :  { %1826 = vst.msk [vmem:[%s3317_s9 + $0x1d0] sm:$0xff] %vm1767_vm1, %v1754_v21 }
 0x49b   :  { %v1755_v23 = vpop.f32.mrf.mxu0 }
 0x49c   :  { %v1756_v8 = vadd.f32 %v2889_v4, %v1755_v23 }
 0x49e   :  { %1827 = vst.msk [vmem:[%s3317_s9 + $0x1d8] sm:$0xff] %vm1767_vm1, %v1756_v8 }
 0x4a3   :  { %v1758_v15 = vpop.f32.mrf.mxu0 }
 0x4a4   :  { %v1759_v46 = vadd.f32 %v2889_v4, %v1758_v15 }
 0x4a6   :  { %1828 = vst.msk [vmem:[%s3317_s9 + $0x1e0] sm:$0xff] %vm1767_vm1, %v1759_v46 }
 0x4ab   :  { %v1760_v25 = vpop.f32.mrf.mxu0 }
 0x4ac   :  { %v1761_v33 = vadd.f32 %v2889_v4, %v1760_v25 }
 0x4ae   :  { %1829 = vst.msk [vmem:[%s3317_s9 + $0x1e8] sm:$0xff] %vm1767_vm1, %v1761_v33 }
 0x4b0   :  { %v1763_v34 = vpop.f32.mrf.mxu3 }
 0x4b1   :  { %v1764_v30 = vadd.f32 %v2889_v4, %v1763_v34 }
 0x4b3   :  { %1830 = vst.msk [vmem:[%s3317_s9 + $0x1f0] sm:$0xff] %vm1767_vm1, %v1764_v30 }
 0x4b8   :  { %v1765_v29 = vpop.f32.mrf.mxu3 }

// kernel: tpu_custom_call.1
= control target key start
LH: loop header
LB: loop body
LE: loop exit
PB: predicated region body
PF: predicated region fallthrough
CT: control target
= control target key end

     0   :  { %vm233_vm0 = vcmask 130048   ;;  %vm1767_vm1 = vcmask 31744   ;;  %s3308_s3 = inlined_call_operand.vmem [shape: bf16[16,128], index: 3, kind: input, shape index: {}]   ;;  %s3309_s1 = inlined_call_operand.vmem [shape: f32[500,16], index: 1, kind: input, shape index: {}]   ;;  %s3310_s2 = inlined_call_operand.vmem [shape: bf16[16,128], index: 2, kind: input, shape index: {}]   ;;  %s3311_s5 = inlined_call_operand.vmem [shape: bf16[2,128,128], index: 5, kind: input, shape index: {}]   ;;  %s3312_s4 = inlined_call_operand.vmem [shape: f32[1,128], index: 4, kind: input, shape index: {}]   ;;  %s3313_s0 = inlined_call_operand.vmem [shape: f32[500,16], index: 0, kind: input, shape index: {}]   ;;  %s3314_s6 = inlined_call_operand.vmem [shape: f32[2,1,128], index: 6, kind: input, shape index: {}]   ;;  %s3315_s7 = inlined_call_operand.vmem [shape: bf16[128,4], index: 7, kind: input, shape index: {}]   ;;  %s3316_s8 = inlined_call_operand.vmem [shape: f32[1,4], index: 8, kind: input, shape index: {}]   ;;  %s3317_s9 = inlined_call_operand.vmem [shape: f32[500,4], index: 9, kind: output, shape index: {}]  }
   0x1   :  { %v2021_v0 = vld [vmem:[%s3308_s3] sm:$0xff]  ;;  %v148_v1 = vld [vmem:[%s3309_s1 + $0x90] sm:$0xff]  ;;  %v149_v2 = vld [vmem:[%s3309_s1 + $0x98] sm:$0xff] }
   0x2   :  { %v202_v3 = vpack.c.bf16 %v149_v2, %v148_v1  ;;  %v2020_v4 = vld [vmem:[%s3310_s2] sm:$0xff]  ;;  %2046 = vmatpush.bf16.msra.mxu1 %v2021_v0  ;;  %337 = vmatpush.bf16.msra.mxu0 %v2021_v0  ;;  %v151_v6 = vld [vmem:[%s3309_s1 + $0xa8] sm:$0xff]  ;;  %v152_v8 = vld [vmem:[%s3309_s1 + $0xb0] sm:$0xff] }
   0x3   :  { %2047 = vmatpush.bf16.msra.mxu2 %v2021_v0  ;;  %2048 = vmatpush.bf16.msra.mxu3 %v2021_v0  ;;  %v150_v5 = vld [vmem:[%s3309_s1 + $0xa0] sm:$0xff]  ;;  %v153_v9 = vld [vmem:[%s3309_s1 + $0xb8] sm:$0xff]  ;;  %v155_v12 = vld [vmem:[%s3309_s1 + $0xc8] sm:$0xff] }
   0x4   :  { %v203_v7 = vpack.c.bf16 %v151_v6, %v150_v5  ;;  %v204_v10 = vpack.c.bf16 %v153_v9, %v152_v8  ;;  %v154_v11 = vld [vmem:[%s3309_s1 + $0xc0] sm:$0xff]  ;;  %v156_v14 = vld [vmem:[%s3309_s1 + $0xd0] sm:$0xff]  ;;  %v157_v15 = vld [vmem:[%s3309_s1 + $0xd8] sm:$0xff] }
   0x5   :  { %1848 = vmatmul.msk.bf16.vlgmr.msra.gmra.mxu1 %vm233_vm0, %v202_v3  ;;  %v205_v13 = vpack.c.bf16 %v155_v12, %v154_v11  ;;  %v206_v16 = vpack.c.bf16 %v157_v15, %v156_v14  ;;  %v158_v17 = vld [vmem:[%s3309_s1 + $0xe0] sm:$0xff]  ;;  %v159_v18 = vld [vmem:[%s3309_s1 + $0xe8] sm:$0xff]  ;;  %v160_v20 = vld [vmem:[%s3309_s1 + $0xf0] sm:$0xff] }
   0x6   :  { %607 = vmatpush.bf16.msrb.mxu1 %v2020_v4  ;;  %v207_v19 = vpack.c.bf16 %v159_v18, %v158_v17  ;;  %v161_v21 = vld [vmem:[%s3309_s1 + $0xf8] sm:$0xff]  ;;  %v130_v23 = vld [vmem:[%s3309_s1] sm:$0xff]  ;;  %v131_v24 = vld [vmem:[%s3309_s1 + $0x8] sm:$0xff] }
   0x7   :  { %v208_v22 = vpack.c.bf16 %v161_v21, %v160_v20  ;;  %v193_v25 = vpack.c.bf16 %v131_v24, %v130_v23  ;;  %v162_v26 = vld [vmem:[%s3309_s1 + $0x100] sm:$0xff]  ;;  %v163_v27 = vld [vmem:[%s3309_s1 + $0x108] sm:$0xff]  ;;  %v132_v32 = vld [vmem:[%s3309_s1 + $0x10] sm:$0xff] }
   0x8   :  { %v209_v28 = vpack.c.bf16 %v163_v27, %v162_v26  ;;  %v166_v29 = vld [vmem:[%s3309_s1 + $0x120] sm:$0xff]  ;;  %v167_v30 = vld [vmem:[%s3309_s1 + $0x128] sm:$0xff]  ;;  %v133_v33 = vld [vmem:[%s3309_s1 + $0x18] sm:$0xff] }
   0x9   :  { %1839 = vmatmul.msk.bf16.vlgmr.msra.gmra.mxu0 %vm233_vm0, %v193_v25  ;;  %v211_v31 = vpack.c.bf16 %v167_v30, %v166_v29  ;;  %v194_v34 = vpack.c.bf16 %v133_v33, %v132_v32  ;;  %v164_v35 = vld [vmem:[%s3309_s1 + $0x110] sm:$0xff]  ;;  %v165_v36 = vld [vmem:[%s3309_s1 + $0x118] sm:$0xff]  ;;  %v134_v44 = vld [vmem:[%s3309_s1 + $0x20] sm:$0xff] }
   0xa   :  { %v210_v37 = vpack.c.bf16 %v165_v36, %v164_v35  ;;  %v2029_v39 = vld [vmem:[%s3311_s5 + $0x38] sm:$0xff]  ;;  %v168_v40 = vld [vmem:[%s3309_s1 + $0x130] sm:$0xff]  ;;  %v135_v45 = vld [vmem:[%s3309_s1 + $0x28] sm:$0xff] }
   0xb   :  { %1857 = vmatmul.msk.bf16.vlgmr.msra.gmra.mxu2 %vm233_vm0, %v211_v31  ;;  %v169_v41 = vld [vmem:[%s3309_s1 + $0x138] sm:$0xff]  ;;  %v195_v46 = vpack.c.bf16 %v135_v45, %v134_v44  ;;  %v33_v47 = vld [vmem:[%s3313_s0] sm:$0xff]  ;;  %v34_v48 = vld [vmem:[%s3313_s0 + $0x8] sm:$0xff] }
   0xc   :  { %998 = vmatpush.bf16.msrb.mxu2 %v2029_v39  ;;  %v212_v42 = vpack.c.bf16 %v169_v41, %v168_v40  ;;  %v96_v49 = vpack.c.bf16 %v34_v48, %v33_v47  ;;  %v2028_v51 = vld [vmem:[%s3311_s5 + $0x30] sm:$0xff]  ;;  %v170_v52 = vld [vmem:[%s3309_s1 + $0x140] sm:$0xff]  ;;  %v171_v53 = vld [vmem:[%s3309_s1 + $0x148] sm:$0xff] }
   0xd   :  { %v213_v54 = vpack.c.bf16 %v171_v53, %v170_v52  ;;  %v136_v56 = vld [vmem:[%s3309_s1 + $0x30] sm:$0xff]  ;;  %v137_v57 = vld [vmem:[%s3309_s1 + $0x38] sm:$0xff]  ;;  %v2027_v63 = vld [vmem:[%s3311_s5 + $0x28] sm:$0xff] }
   0xe   :  { %v196_v58 = vpack.c.bf16 %v137_v57, %v136_v56  ;;  %v35_v59 = vld [vmem:[%s3313_s0 + $0x10] sm:$0xff]  ;;  %v36_v60 = vld [vmem:[%s3313_s0 + $0x18] sm:$0xff]  ;;  %v138_v4 = vld [vmem:[%s3309_s1 + $0x40] sm:$0xff] }
   0xf   :  { %v97_v61 = vpack.c.bf16 %v36_v60, %v35_v59  ;;  %v172_v0 = vld [vmem:[%s3309_s1 + $0x150] sm:$0xff]  ;;  %v173_v1 = vld [vmem:[%s3309_s1 + $0x158] sm:$0xff]  ;;  %v139_v5 = vld [vmem:[%s3309_s1 + $0x48] sm:$0xff] }
  0x10   :  { %999 = vmatpush.bf16.msrb.mxu2 %v2028_v51  ;;  %v214_v2 = vpack.c.bf16 %v173_v1, %v172_v0  ;;  %v197_v6 = vpack.c.bf16 %v139_v5, %v138_v4  ;;  %v38_v8 = vld [vmem:[%s3313_s0 + $0x28] sm:$0xff]  ;;  %v2026_v11 = vld [vmem:[%s3311_s5 + $0x20] sm:$0xff]  ;;  %v141_v17 = vld [vmem:[%s3309_s1 + $0x58] sm:$0xff] }
  0x11   :  { %v174_v12 = vld [vmem:[%s3309_s1 + $0x160] sm:$0xff]  ;;  %v40_v20 = vld [vmem:[%s3313_s0 + $0x38] sm:$0xff]  ;;  %v176_v24 = vld [vmem:[%s3309_s1 + $0x170] sm:$0xff] }
  0x12   :  { %v2025_v23 = vld [vmem:[%s3311_s5 + $0x18] sm:$0xff]  ;;  %v143_v29 = vld [vmem:[%s3309_s1 + $0x68] sm:$0xff]  ;;  %v41_v31 = vld [vmem:[%s3313_s0 + $0x40] sm:$0xff] }
  0x13   :  { %v177_v25 = vld [vmem:[%s3309_s1 + $0x178] sm:$0xff]  ;;  %v42_v32 = vld [vmem:[%s3313_s0 + $0x48] sm:$0xff]  ;;  %v2024_v35 = vld [vmem:[%s3311_s5 + $0x10] sm:$0xff] }
  0x14   :  { %1000 = vmatpush.bf16.msrb.mxu2 %v2027_v63  ;;  %v216_v26 = vpack.c.bf16 %v177_v25, %v176_v24  ;;  %v100_v33 = vpack.c.bf16 %v42_v32, %v41_v31  ;;  %v178_v36 = vld [vmem:[%s3309_s1 + $0x180] sm:$0xff]  ;;  %v144_v41 = vld [vmem:[%s3309_s1 + $0x70] sm:$0xff]  ;;  %v181_v52 = vld [vmem:[%s3309_s1 + $0x198] sm:$0xff] }
  0x15   :  { %1849 = vmatmul.msk.bf16.gmra.mxu1 %vm233_vm0, %v203_v7  ;;  %v37_v7 = vld [vmem:[%s3313_s0 + $0x20] sm:$0xff]  ;;  %v43_v45 = vld [vmem:[%s3313_s0 + $0x50] sm:$0xff]  ;;  %v147_v57 = vld [vmem:[%s3309_s1 + $0x88] sm:$0xff] }
  0x16   :  { %v98_v9 = vpack.c.bf16 %v38_v8, %v37_v7  ;;  %v180_v51 = vld [vmem:[%s3309_s1 + $0x190] sm:$0xff]  ;;  %v146_v56 = vld [vmem:[%s3309_s1 + $0x80] sm:$0xff]  ;;  %v46_v60 = vld [vmem:[%s3313_s0 + $0x68] sm:$0xff] }
  0x17   :  { %v218_v53 = vpack.c.bf16 %v181_v52, %v180_v51  ;;  %v45_v59 = vld [vmem:[%s3313_s0 + $0x60] sm:$0xff]  ;;  %v47_v5 = vld [vmem:[%s3313_s0 + $0x70] sm:$0xff]  ;;  %v52_v31 = vld [vmem:[%s3313_s0 + $0x98] sm:$0xff] }
  0x18   :  { %1001 = vmatpush.bf16.msrb.mxu2 %v2026_v11  ;;  %v102_v63 = vpack.c.bf16 %v46_v60, %v45_v59  ;;  %v2022_v1 = vld [vmem:[%s3311_s5] sm:$0xff] }
  0x19   :  { %1840 = vmatmul.msk.bf16.gmra.mxu0 %vm233_vm0, %v194_v34 }
  0x1b   :  { %1858 = vmatmul.msk.bf16.gmra.mxu2 %vm233_vm0, %v212_v42  ;;  %v145_v42 = vld [vmem:[%s3309_s1 + $0x78] sm:$0xff] }
  0x1c   :  { %1002 = vmatpush.bf16.msrb.mxu2 %v2025_v23  ;;  %v200_v44 = vpack.c.bf16 %v145_v42, %v144_v41 }
  0x20   :  { %1003 = vmatpush.bf16.msrb.mxu2 %v2024_v35 }
  0x25   :  { %1850 = vmatmul.msk.bf16.gmra.mxu1 %vm233_vm0, %v204_v10 }
  0x29   :  { %1841 = vmatmul.msk.bf16.gmra.mxu0 %vm233_vm0, %v195_v46  ;;  %v44_v46 = vld [vmem:[%s3313_s0 + $0x58] sm:$0xff] }
  0x2a   :  { %v101_v47 = vpack.c.bf16 %v44_v46, %v43_v45  ;;  %v182_v45 = vld [vmem:[%s3309_s1 + $0x1a0] sm:$0xff]  ;;  %v183_v46 = vld [vmem:[%s3309_s1 + $0x1a8] sm:$0xff] }
  0x2b   :  { %1859 = vmatmul.msk.bf16.gmra.mxu2 %vm233_vm0, %v213_v54  ;;  %v219_v51 = vpack.c.bf16 %v183_v46, %v182_v45 }
  0x2d   :  { %1865 = vmatmul.msk.bf16.vlgmr.msra.gmra.mxu3 %vm233_vm0, %v219_v51  ;;  %v57_v51 = vld [vmem:[%s3313_s0 + $0xc0] sm:$0xff] }
  0x35   :  { %1851 = vmatmul.msk.bf16.gmra.mxu1 %vm233_vm0, %v205_v13  ;;  %v175_v13 = vld [vmem:[%s3309_s1 + $0x168] sm:$0xff] }
  0x36   :  { %v215_v14 = vpack.c.bf16 %v175_v13, %v174_v12  ;;  %v49_v13 = vld [vmem:[%s3313_s0 + $0x80] sm:$0xff] }
  0x39   :  { %1842 = vmatmul.msk.bf16.gmra.mxu0 %vm233_vm0, %v196_v58  ;;  %v201_v58 = vpack.c.bf16 %v147_v57, %v146_v56  ;;  %v53_v56 = vld [vmem:[%s3313_s0 + $0xa0] sm:$0xff]  ;;  %v54_v57 = vld [vmem:[%s3313_s0 + $0xa8] sm:$0xff] }
  0x3b   :  { %1860 = vmatmul.msk.bf16.gmra.mxu2 %vm233_vm0, %v214_v2 }
  0x45   :  { %1852 = vmatmul.msk.bf16.gmra.mxu1 %vm233_vm0, %v206_v16  ;;  %v140_v16 = vld [vmem:[%s3309_s1 + $0x50] sm:$0xff] }
  0x46   :  { %v198_v18 = vpack.c.bf16 %v141_v17, %v140_v16 }
  0x49   :  { %1843 = vmatmul.msk.bf16.gmra.mxu0 %vm233_vm0, %v197_v6  ;;  %v48_v6 = vld [vmem:[%s3313_s0 + $0x78] sm:$0xff] }
  0x4a   :  { %v103_v7 = vpack.c.bf16 %v48_v6, %v47_v5  ;;  %v2037_v6 = vld [vmem:[%s3311_s5 + $0x78] sm:$0xff] }
  0x4b   :  { %1861 = vmatmul.msk.bf16.gmra.mxu2 %vm233_vm0, %v215_v14  ;;  %v50_v14 = vld [vmem:[%s3313_s0 + $0x88] sm:$0xff]  ;;  %1331 = vmatpush.bf16.msrb.mxu3 %v2037_v6 }
  0x4c   :  { %v104_v17 = vpack.c.bf16 %v50_v14, %v49_v13  ;;  %v184_v13 = vld [vmem:[%s3309_s1 + $0x1b0] sm:$0xff]  ;;  %v185_v14 = vld [vmem:[%s3309_s1 + $0x1b8] sm:$0xff] }
  0x55   :  { %1853 = vmatmul.msk.bf16.gmra.mxu1 %vm233_vm0, %v207_v19  ;;  %v39_v19 = vld [vmem:[%s3313_s0 + $0x30] sm:$0xff] }
  0x56   :  { %v99_v21 = vpack.c.bf16 %v40_v20, %v39_v19 }
  0x59   :  { %1844 = vmatmul.msk.bf16.gmra.mxu0 %vm233_vm0, %v198_v18 }
  0x5b   :  { %1862 = vmatmul.msk.bf16.gmra.mxu2 %vm233_vm0, %v216_v26 }
  0x65   :  { %1854 = vmatmul.msk.bf16.gmra.mxu1 %vm233_vm0, %v208_v22 }
  0x75   :  { %1855 = vmatmul.msk.bf16.gmra.mxu1 %vm233_vm0, %v209_v28  ;;  %v142_v28 = vld [vmem:[%s3309_s1 + $0x60] sm:$0xff] }
  0x76   :  { %v199_v30 = vpack.c.bf16 %v143_v29, %v142_v28 }
  0x78   :  { %1845 = vmatmul.msk.bf16.gmra.mxu0 %vm233_vm0, %v199_v30  ;;  %v51_v30 = vld [vmem:[%s3313_s0 + $0x90] sm:$0xff] }
  0x82   :  { %v2203_v38 = vpop.f32.mrf.mxu1 }
  0x85   :  { %1856 = vmatmul.msk.bf16.gmra.mxu1 %vm233_vm0, %v210_v37  ;;  %v179_v37 = vld [vmem:[%s3309_s1 + $0x188] sm:$0xff] }
  0x86   :  { %v217_v39 = vpack.c.bf16 %v179_v37, %v178_v36  ;;  %v105_v36 = vpack.c.bf16 %v52_v31, %v51_v30 }
  0x88   :  { %1863 = vmatmul.msk.bf16.gmra.mxu2 %vm233_vm0, %v217_v39  ;;  %1846 = vmatmul.msk.bf16.gmra.mxu0 %vm233_vm0, %v200_v44 }
  0x8a   :  { %v2215_v43 = vpop.f32.mrf.mxu1 }
  0x8e   :  { %v2416_v11 = vpop.f32.mrf.mxu2 }
  0x92   :  { %v2231_v50 = vpop.f32.mrf.mxu1 }
  0x95   :  { %1875 = vmatmul.msk.bf16.vlgmr.msrb.gmra.mxu1 %vm233_vm0, %v96_v49  ;;  %v2023_v49 = vld [vmem:[%s3311_s5 + $0x8] sm:$0xff] }
  0x96   :  { %1004 = vmatpush.bf16.msrb.mxu2 %v2023_v49  ;;  %v2426_v19 = vpop.f32.mrf.mxu2 }
  0x98   :  { %1864 = vmatmul.msk.bf16.gmra.mxu2 %vm233_vm0, %v218_v53  ;;  %1847 = vmatmul.msk.bf16.gmra.mxu0 %vm233_vm0, %v201_v58 }
  0x9a   :  { %v2243_v55 = vpop.f32.mrf.mxu1  ;;  %1005 = vmatpush.bf16.msrb.mxu2 %v2022_v1 }
  0x9e   :  { %v2435_v28 = vpop.f32.mrf.mxu2 }
  0xa2   :  { %v2259_v62 = vpop.f32.mrf.mxu1 }
  0xa5   :  { %1876 = vmatmul.msk.bf16.gmra.mxu1 %vm233_vm0, %v97_v61  ;;  %v339_v61 = vpop.f32.mrf.mxu0 }
  0xa6   :  { %v2445_v41 = vpop.f32.mrf.mxu2 }
  0xaa   :  { %v2271_v3 = vpop.f32.mrf.mxu1 }
  0xad   :  { %v341_v4 = vpop.f32.mrf.mxu0 }
  0xae   :  { %v2462_v60 = vpop.f32.mrf.mxu2 }
  0xb2   :  { %v2287_v10 = vpop.f32.mrf.mxu1 }
  0xb5   :  { %1877 = vmatmul.msk.bf16.gmra.mxu1 %vm233_vm0, %v98_v9  ;;  %v344_v9 = vpop.f32.mrf.mxu0 }
  0xba   :  { %v2299_v15 = vpop.f32.mrf.mxu1 }
  0xbd   :  { %v346_v16 = vpop.f32.mrf.mxu0 }
  0xc2   :  { %v2315_v22 = vpop.f32.mrf.mxu1 }
  0xc5   :  { %1878 = vmatmul.msk.bf16.gmra.mxu1 %vm233_vm0, %v99_v21  ;;  %v2432_v21 = vld [vmem:[%s3312_s4] ss:$0 sm:$0xff]  ;;  %v349_v23 = vpop.f32.mrf.mxu0 }
  0xca   :  { %v2327_v27 = vpop.f32.mrf.mxu1 }
  0xcd   :  { %v351_v39 = vpop.f32.mrf.mxu0 }
  0xd2   :  { %v2343_v34 = vpop.f32.mrf.mxu1 }
  0xd5   :  { %1879 = vmatmul.msk.bf16.gmra.mxu1 %vm233_vm0, %v100_v33  ;;  %v354_v52 = vpop.f32.mrf.mxu0 }
  0xda   :  { %v2355_v40 = vpop.f32.mrf.mxu1 }
  0xe2   :  { %v2371_v48 = vpop.f32.mrf.mxu1 }
  0xe5   :  { %1880 = vmatmul.msk.bf16.gmra.mxu1 %vm233_vm0, %v101_v47 }
  0xea   :  { %v2383_v54 = vpop.f32.mrf.mxu1 }
  0xf2   :  { %v2399_v0 = vpop.f32.mrf.mxu1 }
  0xf5   :  { %1881 = vmatmul.msk.bf16.gmra.mxu1 %vm233_vm0, %v102_v63  ;;  %v106_v63 = vpack.c.bf16 %v54_v57, %v53_v56 }
  0xfa   :  { %v2405_v2 = vpop.f32.mrf.mxu1 }
 0x102   :  { %v2413_v8 = vpop.f32.mrf.mxu1 }
 0x105   :  { %1882 = vmatmul.msk.bf16.gmra.mxu1 %vm233_vm0, %v103_v7 }
 0x10a   :  { %v2418_v12 = vpop.f32.mrf.mxu1 }
 0x112   :  { %v609_v18 = vpop.f32.mrf.mxu1 }
 0x113   :  { %v610_v20 = vadd.f32 %v609_v18, %v339_v61  ;;  %v220_v18 = vpack.c.bf16 %v185_v14, %v184_v13  ;;  %v188_v13 = vld [vmem:[%s3309_s1 + $0x1d0] sm:$0xff]  ;;  %v189_v14 = vld [vmem:[%s3309_s1 + $0x1d8] sm:$0xff] }
 0x115   :  { %1883 = vmatmul.msk.bf16.gmra.mxu1 %vm233_vm0, %v104_v17  ;;  %v772_v25 = vadd.f32 %v2432_v21, %v610_v20  ;;  %1866 = vmatmul.msk.bf16.gmra.mxu3 %vm233_vm0, %v220_v18  ;;  %v222_v18 = vpack.c.bf16 %v189_v14, %v188_v13 }
 0x117   :  { %v835_v32 = vmax.f32 %v772_v25, 0.0 }
 0x11a   :  { %v611_v24 = vpop.f32.mrf.mxu1 }
 0x11b   :  { %v612_v26 = vadd.f32 %v611_v24, %v341_v4  ;;  %v356_v4 = vpop.f32.mrf.mxu0  ;;  %v56_v24 = vld [vmem:[%s3313_s0 + $0xb8] sm:$0xff] }
 0x11d   :  { %v773_v29 = vadd.f32 %v2432_v21, %v612_v26 }
 0x11f   :  { %v836_v33 = vmax.f32 %v773_v29, 0.0  ;;  %v2036_v29 = vld [vmem:[%s3311_s5 + $0x70] sm:$0xff] }
 0x120   :  { %1332 = vmatpush.bf16.msrb.mxu3 %v2036_v29 }
 0x121   :  { %v898_v35 = vpack.c.bf16 %v836_v33, %v835_v32 }
 0x122   :  { %v614_v37 = vpop.f32.mrf.mxu1 }
 0x123   :  { %1006 = vmatmul.bf16.vlgmr.msrb.gmra.mxu2 %v898_v35  ;;  %v615_v42 = vadd.f32 %v614_v37, %v344_v9  ;;  %v2468_v9 = vpop.f32.mrf.mxu2  ;;  %v359_v30 = vpop.f32.mrf.mxu0 }
 0x125   :  { %1884 = vmatmul.msk.bf16.gmra.mxu1 %vm233_vm0, %v105_v36  ;;  %v774_v47 = vadd.f32 %v2432_v21, %v615_v42  ;;  %v186_v42 = vld [vmem:[%s3309_s1 + $0x1c0] sm:$0xff] }
 0x127   :  { %v837_v58 = vmax.f32 %v774_v47, 0.0 }
 0x12a   :  { %v616_v44 = vpop.f32.mrf.mxu1 }
 0x12b   :  { %v617_v49 = vadd.f32 %v616_v44, %v346_v16  ;;  %v2488_v35 = vpop.f32.mrf.mxu2  ;;  %v187_v44 = vld [vmem:[%s3309_s1 + $0x1c8] sm:$0xff] }
 0x12c   :  { %v221_v47 = vpack.c.bf16 %v187_v44, %v186_v42  ;;  %v190_v44 = vld [vmem:[%s3309_s1 + $0x1e0] sm:$0xff] }
 0x12d   :  { %v775_v53 = vadd.f32 %v2432_v21, %v617_v49 }
 0x12e   :  { %1867 = vmatmul.msk.bf16.gmra.mxu3 %vm233_vm0, %v221_v47 }
 0x12f   :  { %v838_v59 = vmax.f32 %v775_v53, 0.0 }
 0x131   :  { %v899_v61 = vpack.c.bf16 %v838_v59, %v837_v58  ;;  %v2035_v58 = vld [vmem:[%s3311_s5 + $0x68] sm:$0xff] }
 0x132   :  { %v619_v1 = vpop.f32.mrf.mxu1  ;;  %1333 = vmatpush.bf16.msrb.mxu3 %v2035_v58 }
 0x133   :  { %1011 = vmatmul.bf16.gmra.mxu2 %v899_v61  ;;  %v620_v5 = vadd.f32 %v619_v1, %v349_v23  ;;  %v55_v23 = vld [vmem:[%s3313_s0 + $0xb0] sm:$0xff]  ;;  %v2506_v53 = vpop.f32.mrf.mxu2 }
 0x134   :  { %v107_v32 = vpack.c.bf16 %v56_v24, %v55_v23  ;;  %v59_v24 = vld [vmem:[%s3313_s0 + $0xd0] sm:$0xff] }
 0x135   :  { %1885 = vmatmul.msk.bf16.gmra.mxu1 %vm233_vm0, %v106_v63  ;;  %v776_v16 = vadd.f32 %v2432_v21, %v620_v5  ;;  %v2034_v5 = vld [vmem:[%s3311_s5 + $0x60] sm:$0xff] }
 0x136   :  { %1334 = vmatpush.bf16.msrb.mxu3 %v2034_v5 }
 0x137   :  { %v839_v25 = vmax.f32 %v776_v16, 0.0 }
 0x13a   :  { %v621_v7 = vpop.f32.mrf.mxu1 }
 0x13b   :  { %v622_v17 = vadd.f32 %v621_v7, %v351_v39  ;;  %v361_v39 = vpop.f32.mrf.mxu0  ;;  %v2515_v6 = vpop.f32.mrf.mxu2 }
 0x13d   :  { %v777_v20 = vadd.f32 %v2432_v21, %v622_v17 }
 0x13e   :  { %1868 = vmatmul.msk.bf16.gmra.mxu3 %vm233_vm0, %v222_v18 }
 0x13f   :  { %v840_v26 = vmax.f32 %v777_v20, 0.0 }
 0x141   :  { %v900_v31 = vpack.c.bf16 %v840_v26, %v839_v25  ;;  %v60_v25 = vld [vmem:[%s3313_s0 + $0xd8] sm:$0xff] }
 0x142   :  { %v624_v33 = vpop.f32.mrf.mxu1 }
 0x143   :  { %1016 = vmatmul.bf16.gmra.mxu2 %v900_v31  ;;  %v625_v36 = vadd.f32 %v624_v33, %v354_v52  ;;  %v58_v52 = vld [vmem:[%s3313_s0 + $0xc8] sm:$0xff]  ;;  %v364_v1 = vpop.f32.mrf.mxu0  ;;  %v109_v31 = vpack.c.bf16 %v60_v25, %v59_v24  ;;  %v2532_v33 = vpop.f32.mrf.mxu2  ;;  %v63_v25 = vld [vmem:[%s3313_s0 + $0xf0] sm:$0xff] }
 0x144   :  { %v108_v61 = vpack.c.bf16 %v58_v52, %v57_v51 }
 0x145   :  { %1886 = vmatmul.msk.bf16.gmra.mxu1 %vm233_vm0, %v107_v32  ;;  %v778_v45 = vadd.f32 %v2432_v21, %v625_v36 }
 0x147   :  { %v841_v56 = vmax.f32 %v778_v45, 0.0  ;;  %v191_v45 = vld [vmem:[%s3309_s1 + $0x1e8] sm:$0xff] }
 0x14a   :  { %v626_v37 = vpop.f32.mrf.mxu1 }
 0x14b   :  { %v627_v46 = vadd.f32 %v626_v37, %v356_v4  ;;  %v366_v23 = vpop.f32.mrf.mxu0  ;;  %v2033_v37 = vld [vmem:[%s3311_s5 + $0x58] sm:$0xff]  ;;  %v2545_v51 = vpop.f32.mrf.mxu2 }
 0x14c   :  { %1335 = vmatpush.bf16.msrb.mxu3 %v2033_v37 }
 0x14d   :  { %v779_v49 = vadd.f32 %v2432_v21, %v627_v46 }
 0x14f   :  { %v842_v57 = vmax.f32 %v779_v49, 0.0  ;;  %v223_v49 = vpack.c.bf16 %v191_v45, %v190_v44  ;;  %v2030_v45 = vld [vmem:[%s3311_s5 + $0x40] sm:$0xff] }
 0x151   :  { %v901_v59 = vpack.c.bf16 %v842_v57, %v841_v56  ;;  %1869 = vmatmul.msk.bf16.gmra.mxu3 %vm233_vm0, %v223_v49  ;;  %v61_v56 = vld [vmem:[%s3313_s0 + $0xe0] sm:$0xff]  ;;  %v62_v57 = vld [vmem:[%s3313_s0 + $0xe8] sm:$0xff] }
 0x152   :  { %v629_v63 = vpop.f32.mrf.mxu1 }
 0x153   :  { %1021 = vmatmul.bf16.gmra.mxu2 %v901_v59  ;;  %v630_v4 = vadd.f32 %v629_v63, %v359_v30 }
 0x155   :  { %1887 = vmatmul.msk.bf16.gmra.mxu1 %vm233_vm0, %v108_v61  ;;  %v780_v16 = vadd.f32 %v2432_v21, %v630_v4  ;;  %v2032_v61 = vld [vmem:[%s3311_s5 + $0x50] sm:$0xff] }
 0x156   :  { %1336 = vmatpush.bf16.msrb.mxu3 %v2032_v61 }
 0x157   :  { %v843_v26 = vmax.f32 %v780_v16, 0.0  ;;  %v192_v16 = vld [vmem:[%s3309_s1 + $0x1f0] sm:$0xff] }
 0x15a   :  { %v631_v7 = vpop.f32.mrf.mxu1 }
 0x15b   :  { %v632_v17 = vadd.f32 %v631_v7, %v361_v39  ;;  %v369_v39 = vpop.f32.mrf.mxu0  ;;  %v2559_v7 = vpop.f32.mrf.mxu2 }
 0x15d   :  { %v781_v20 = vadd.f32 %v2432_v21, %v632_v17 }
 0x15f   :  { %v844_v29 = vmax.f32 %v781_v20, 0.0  ;;  %v224_v20 = vpack.c.bf16 %v192_v16, %v192_v16 }
 0x161   :  { %v902_v30 = vpack.c.bf16 %v844_v29, %v843_v26  ;;  %1870 = vmatmul.msk.bf16.gmra.mxu3 %vm233_vm0, %v224_v20  ;;  %v64_v26 = vld [vmem:[%s3313_s0 + $0xf8] sm:$0xff] }
 0x162   :  { %v634_v32 = vpop.f32.mrf.mxu1  ;;  %v111_v37 = vpack.c.bf16 %v64_v26, %v63_v25  ;;  %v67_v25 = vld [vmem:[%s3313_s0 + $0x110] sm:$0xff]  ;;  %v68_v26 = vld [vmem:[%s3313_s0 + $0x118] sm:$0xff] }
 0x163   :  { %1026 = vmatmul.bf16.gmra.mxu2 %v902_v30  ;;  %v635_v36 = vadd.f32 %v634_v32, %v364_v1  ;;  %v110_v1 = vpack.c.bf16 %v62_v57, %v61_v56  ;;  %v371_v4 = vpop.f32.mrf.mxu0  ;;  %v2576_v32 = vpop.f32.mrf.mxu2  ;;  %v65_v57 = vld [vmem:[%s3313_s0 + $0x100] sm:$0xff] }
 0x165   :  { %1888 = vmatmul.msk.bf16.gmra.mxu1 %vm233_vm0, %v109_v31  ;;  %v782_v46 = vadd.f32 %v2432_v21, %v635_v36  ;;  %v2031_v31 = vld [vmem:[%s3311_s5 + $0x48] sm:$0xff] }
 0x166   :  { %1337 = vmatpush.bf16.msrb.mxu3 %v2031_v31 }
 0x167   :  { %v845_v58 = vmax.f32 %v782_v46, 0.0 }
 0x16a   :  { %v636_v42 = vpop.f32.mrf.mxu1  ;;  %1338 = vmatpush.bf16.msrb.mxu3 %v2030_v45  ;;  %v2613_v45 = vld [vmem:[%s3314_s6] ss:$0 sm:$0xff] }
 0x16b   :  { %v637_v47 = vadd.f32 %v636_v42, %v366_v23  ;;  %v374_v23 = vpop.f32.mrf.mxu0  ;;  %v2582_v46 = vpop.f32.mrf.mxu2 }
 0x16d   :  { %v783_v52 = vadd.f32 %v2432_v21, %v637_v47 }
 0x16f   :  { %v846_v59 = vmax.f32 %v783_v52, 0.0 }
 0x171   :  { %v903_v63 = vpack.c.bf16 %v846_v59, %v845_v58  ;;  %v66_v58 = vld [vmem:[%s3313_s0 + $0x108] sm:$0xff] }
 0x172   :  { %v639_v5 = vpop.f32.mrf.mxu1 }
 0x173   :  { %1031 = vmatmul.bf16.gmra.mxu2 %v903_v63  ;;  %v640_v13 = vadd.f32 %v639_v5, %v369_v39  ;;  %v376_v42 = vpop.f32.mrf.mxu0 }
 0x175   :  { %1889 = vmatmul.msk.bf16.gmra.mxu1 %vm233_vm0, %v110_v1  ;;  %v784_v17 = vadd.f32 %v2432_v21, %v640_v13  ;;  %v2592_v13 = vpop.f32.mrf.mxu2 }
 0x177   :  { %v847_v29 = vmax.f32 %v784_v17, 0.0 }
 0x17a   :  { %v641_v14 = vpop.f32.mrf.mxu1 }
 0x17b   :  { %v642_v18 = vadd.f32 %v641_v14, %v371_v4  ;;  %v379_v63 = vpop.f32.mrf.mxu0  ;;  %v112_v4 = vpack.c.bf16 %v66_v58, %v65_v57 }
 0x17d   :  { %v785_v24 = vadd.f32 %v2432_v21, %v642_v18 }
 0x17f   :  { %v848_v30 = vmax.f32 %v785_v24, 0.0  ;;  %v2597_v24 = vpop.f32.mrf.mxu2 }
 0x181   :  { %v904_v36 = vpack.c.bf16 %v848_v30, %v847_v29 }
 0x182   :  { %v644_v39 = vpop.f32.mrf.mxu1 }
 0x183   :  { %1036 = vmatmul.bf16.gmra.mxu2 %v904_v36  ;;  %v645_v44 = vadd.f32 %v644_v39, %v374_v23  ;;  %v381_v16 = vpop.f32.mrf.mxu0  ;;  %v113_v36 = vpack.c.bf16 %v68_v26, %v67_v25  ;;  %v2044_v25 = vld [vmem:[%s3315_s7 + $0x30] sm:$0xff] }
 0x185   :  { %1890 = vmatmul.msk.bf16.gmra.mxu1 %vm233_vm0, %v111_v37  ;;  %v786_v49 = vadd.f32 %v2432_v21, %v645_v44  ;;  %v2045_v37 = vld [vmem:[%s3315_s7 + $0x38] sm:$0xff] }
 0x186   :  { %1599 = vmatpush.bf16.msrb.mxu0 %v2045_v37  ;;  %2049 = vmatpush.bf16.msra.mxu3 %v2045_v37 }
 0x187   :  { %v849_v59 = vmax.f32 %v786_v49, 0.0 }
 0x18a   :  { %v646_v47 = vpop.f32.mrf.mxu1  ;;  %1600 = vmatpush.bf16.msrb.mxu0 %v2044_v25  ;;  %2050 = vmatpush.bf16.msra.mxu3 %v2044_v25 }
 0x18b   :  { %v647_v52 = vadd.f32 %v646_v47, %v376_v42 }
 0x18d   :  { %v787_v56 = vadd.f32 %v2432_v21, %v647_v52 }
 0x18f   :  { %v850_v61 = vmax.f32 %v787_v56, 0.0 }
 0x191   :  { %v905_v1 = vpack.c.bf16 %v850_v61, %v849_v59  ;;  %v69_v59 = vld [vmem:[%s3313_s0 + $0x120] sm:$0xff] }
 0x192   :  { %v649_v5 = vpop.f32.mrf.mxu1 }
 0x193   :  { %1041 = vmatmul.bf16.gmra.mxu2 %v905_v1  ;;  %v650_v14 = vadd.f32 %v649_v5, %v379_v63 }
 0x195   :  { %1891 = vmatmul.msk.bf16.gmra.mxu1 %vm233_vm0, %v112_v4  ;;  %v788_v18 = vadd.f32 %v2432_v21, %v650_v14  ;;  %v2626_v4 = vpop.f32.mrf.mxu3 }
 0x197   :  { %v851_v29 = vmax.f32 %v788_v18, 0.0 }
 0x19a   :  { %v651_v17 = vpop.f32.mrf.mxu1 }
 0x19b   :  { %v652_v20 = vadd.f32 %v651_v17, %v381_v16 }
 0x19d   :  { %v789_v23 = vadd.f32 %v2432_v21, %v652_v20  ;;  %v2633_v26 = vpop.f32.mrf.mxu3 }
 0x19f   :  { %v852_v30 = vmax.f32 %v789_v23, 0.0 }
 0x1a1   :  { %v906_v31 = vpack.c.bf16 %v852_v30, %v851_v29 }
 0x1a2   :  { %v654_v39 = vpop.f32.mrf.mxu1 }
 0x1a3   :  { %1046 = vmatmul.bf16.gmra.mxu2 %v906_v31  ;;  %v655_v44 = vadd.f32 %v654_v39, %v2203_v38  ;;  %v70_v38 = vld [vmem:[%s3313_s0 + $0x128] sm:$0xff] }
 0x1a4   :  { %v114_v16 = vpack.c.bf16 %v70_v38, %v69_v59 }
 0x1a5   :  { %1892 = vmatmul.msk.bf16.gmra.mxu1 %vm233_vm0, %v113_v36  ;;  %v790_v49 = vadd.f32 %v2432_v21, %v655_v44 }
 0x1a6   :  { %v1007_v42 = vpop.f32.mrf.mxu2 }
 0x1a7   :  { %v1008_v56 = vadd.f32 %v2613_v45, %v1007_v42  ;;  %v853_v61 = vmax.f32 %v790_v49, 0.0  ;;  %v72_v42 = vld [vmem:[%s3313_s0 + $0x138] sm:$0xff] }
 0x1aa   :  { %v656_v47 = vpop.f32.mrf.mxu1 }
 0x1ab   :  { %v657_v52 = vadd.f32 %v656_v47, %v2215_v43  ;;  %v1166_v43 = vmax.f32 %v1008_v56, 0.0 }
 0x1ad   :  { %v791_v57 = vadd.f32 %v2432_v21, %v657_v52  ;;  %v2646_v52 = vpop.f32.mrf.mxu3 }
 0x1ae   :  { %v1009_v58 = vpop.f32.mrf.mxu2 }
 0x1af   :  { %v854_v63 = vmax.f32 %v791_v57, 0.0  ;;  %v1010_v1 = vadd.f32 %v2613_v45, %v1009_v58 }
 0x1b1   :  { %v1167_v5 = vmax.f32 %v1010_v1, 0.0  ;;  %v907_v14 = vpack.c.bf16 %v854_v63, %v853_v61  ;;  %v2043_v1 = vld [vmem:[%s3315_s7 + $0x28] sm:$0xff] }
 0x1b2   :  { %v659_v17 = vpop.f32.mrf.mxu1  ;;  %1601 = vmatpush.bf16.msrb.mxu0 %v2043_v1  ;;  %2051 = vmatpush.bf16.msra.mxu3 %v2043_v1 }
 0x1b3   :  { %1051 = vmatmul.bf16.gmra.mxu2 %v907_v14  ;;  %v1229_v18 = vpack.c.bf16 %v1167_v5, %v1166_v43  ;;  %v660_v23 = vadd.f32 %v659_v17, %v2231_v50  ;;  %v71_v50 = vld [vmem:[%s3313_s0 + $0x130] sm:$0xff] }
 0x1b4   :  { %v115_v58 = vpack.c.bf16 %v72_v42, %v71_v50 }
 0x1b5   :  { %1893 = vmatmul.msk.bf16.gmra.mxu1 %vm233_vm0, %v114_v16  ;;  %1339 = vmatmul.bf16.vlgmr.msrb.gmra.mxu3 %v1229_v18  ;;  %v792_v30 = vadd.f32 %v2432_v21, %v660_v23  ;;  %v2653_v43 = vpop.f32.mrf.mxu3  ;;  %v74_v23 = vld [vmem:[%s3313_s0 + $0x148] sm:$0xff] }
 0x1b6   :  { %v1012_v20 = vpop.f32.mrf.mxu2 }
 0x1b7   :  { %v1013_v36 = vadd.f32 %v2613_v45, %v1012_v20  ;;  %v855_v44 = vmax.f32 %v792_v30, 0.0 }
 0x1ba   :  { %v661_v29 = vpop.f32.mrf.mxu1 }
 0x1bb   :  { %v662_v31 = vadd.f32 %v661_v29, %v2243_v55  ;;  %v1168_v55 = vmax.f32 %v1013_v36, 0.0 }
 0x1bd   :  { %v793_v37 = vadd.f32 %v2432_v21, %v662_v31  ;;  %v2666_v31 = vpop.f32.mrf.mxu3 }
 0x1be   :  { %v1014_v39 = vpop.f32.mrf.mxu2 }
 0x1bf   :  { %v856_v47 = vmax.f32 %v793_v37, 0.0  ;;  %v1015_v49 = vadd.f32 %v2613_v45, %v1014_v39 }
 0x1c1   :  { %v1169_v56 = vmax.f32 %v1015_v49, 0.0  ;;  %v908_v57 = vpack.c.bf16 %v856_v47, %v855_v44 }
 0x1c2   :  { %v664_v59 = vpop.f32.mrf.mxu1 }
 0x1c3   :  { %1056 = vmatmul.bf16.gmra.mxu2 %v908_v57  ;;  %v1230_v38 = vpack.c.bf16 %v1169_v56, %v1168_v55  ;;  %v665_v63 = vadd.f32 %v664_v59, %v2259_v62  ;;  %v73_v62 = vld [vmem:[%s3313_s0 + $0x140] sm:$0xff] }
 0x1c4   :  { %v116_v39 = vpack.c.bf16 %v74_v23, %v73_v62  ;;  %v2042_v55 = vld [vmem:[%s3315_s7 + $0x20] sm:$0xff] }
 0x1c5   :  { %1894 = vmatmul.msk.bf16.gmra.mxu1 %vm233_vm0, %v115_v58  ;;  %1344 = vmatmul.bf16.gmra.mxu3 %v1230_v38  ;;  %v794_v14 = vadd.f32 %v2432_v21, %v665_v63  ;;  %v2670_v49 = vpop.f32.mrf.mxu3  ;;  %v76_v63 = vld [vmem:[%s3313_s0 + $0x158] sm:$0xff] }
 0x1c6   :  { %v1017_v61 = vpop.f32.mrf.mxu2  ;;  %1602 = vmatpush.bf16.msrb.mxu0 %v2042_v55  ;;  %2052 = vmatpush.bf16.msra.mxu3 %v2042_v55 }
 0x1c7   :  { %v1018_v17 = vadd.f32 %v2613_v45, %v1017_v61  ;;  %v857_v25 = vmax.f32 %v794_v14, 0.0 }
 0x1ca   :  { %v666_v5 = vpop.f32.mrf.mxu1 }
 0x1cb   :  { %v667_v16 = vadd.f32 %v666_v5, %v2271_v3  ;;  %v1170_v3 = vmax.f32 %v1018_v17, 0.0 }
 0x1cd   :  { %v795_v18 = vadd.f32 %v2432_v21, %v667_v16 }
 0x1ce   :  { %v1019_v20 = vpop.f32.mrf.mxu2 }
 0x1cf   :  { %v858_v29 = vmax.f32 %v795_v18, 0.0  ;;  %v1020_v30 = vadd.f32 %v2613_v45, %v1019_v20 }
 0x1d1   :  { %v1171_v36 = vmax.f32 %v1020_v30, 0.0  ;;  %v909_v37 = vpack.c.bf16 %v858_v29, %v857_v25 }
 0x1d2   :  { %v669_v50 = vpop.f32.mrf.mxu1 }
 0x1d3   :  { %1061 = vmatmul.bf16.gmra.mxu2 %v909_v37  ;;  %v1231_v42 = vpack.c.bf16 %v1171_v36, %v1170_v3  ;;  %v670_v47 = vadd.f32 %v669_v50, %v2287_v10  ;;  %v75_v10 = vld [vmem:[%s3313_s0 + $0x150] sm:$0xff]  ;;  %v2041_v3 = vld [vmem:[%s3315_s7 + $0x18] sm:$0xff] }
 0x1d4   :  { %v117_v20 = vpack.c.bf16 %v76_v63, %v75_v10  ;;  %1603 = vmatpush.bf16.msrb.mxu0 %v2041_v3  ;;  %2053 = vmatpush.bf16.msra.mxu3 %v2041_v3 }
 0x1d5   :  { %1895 = vmatmul.msk.bf16.gmra.mxu1 %vm233_vm0, %v116_v39  ;;  %1349 = vmatmul.bf16.gmra.mxu3 %v1231_v42  ;;  %v796_v57 = vadd.f32 %v2432_v21, %v670_v47  ;;  %v78_v47 = vld [vmem:[%s3313_s0 + $0x168] sm:$0xff] }
 0x1d6   :  { %v1022_v44 = vpop.f32.mrf.mxu2 }
 0x1d7   :  { %v1023_v59 = vadd.f32 %v2613_v45, %v1022_v44  ;;  %v859_v1 = vmax.f32 %v796_v57, 0.0 }
 0x1d9   :  { %v1172_v16 = vmax.f32 %v1023_v59, 0.0 }
 0x1da   :  { %v671_v56 = vpop.f32.mrf.mxu1 }
 0x1db   :  { %v672_v58 = vadd.f32 %v671_v56, %v2299_v15  ;;  %v2686_v15 = vpop.f32.mrf.mxu3 }
 0x1dd   :  { %v797_v38 = vadd.f32 %v2432_v21, %v672_v58 }
 0x1de   :  { %v1024_v61 = vpop.f32.mrf.mxu2 }
 0x1df   :  { %v860_v5 = vmax.f32 %v797_v38, 0.0  ;;  %v1025_v14 = vadd.f32 %v2613_v45, %v1024_v61 }
 0x1e1   :  { %v1173_v17 = vmax.f32 %v1025_v14, 0.0  ;;  %v910_v18 = vpack.c.bf16 %v860_v5, %v859_v1 }
 0x1e2   :  { %v674_v62 = vpop.f32.mrf.mxu1 }
 0x1e3   :  { %1066 = vmatmul.bf16.gmra.mxu2 %v910_v18  ;;  %v1232_v23 = vpack.c.bf16 %v1173_v17, %v1172_v16  ;;  %v675_v29 = vadd.f32 %v674_v62, %v2315_v22  ;;  %v2690_v30 = vpop.f32.mrf.mxu3  ;;  %v77_v22 = vld [vmem:[%s3313_s0 + $0x160] sm:$0xff] }
 0x1e4   :  { %v118_v61 = vpack.c.bf16 %v78_v47, %v77_v22 }
 0x1e5   :  { %1896 = vmatmul.msk.bf16.gmra.mxu1 %vm233_vm0, %v117_v20  ;;  %1354 = vmatmul.bf16.gmra.mxu3 %v1232_v23  ;;  %v798_v37 = vadd.f32 %v2432_v21, %v675_v29 }
 0x1e6   :  { %v1027_v25 = vpop.f32.mrf.mxu2 }
 0x1e7   :  { %v1028_v50 = vadd.f32 %v2613_v45, %v1027_v25  ;;  %v861_v55 = vmax.f32 %v798_v37, 0.0  ;;  %v79_v25 = vld [vmem:[%s3313_s0 + $0x170] sm:$0xff] }
 0x1e9   :  { %v1174_v58 = vmax.f32 %v1028_v50, 0.0 }
 0x1ea   :  { %v676_v36 = vpop.f32.mrf.mxu1 }
 0x1eb   :  { %v677_v39 = vadd.f32 %v676_v36, %v2327_v27  ;;  %v2706_v27 = vpop.f32.mrf.mxu3 }
 0x1ed   :  { %v799_v42 = vadd.f32 %v2432_v21, %v677_v39 }
 0x1ee   :  { %v1029_v44 = vpop.f32.mrf.mxu2 }
 0x1ef   :  { %v862_v56 = vmax.f32 %v799_v42, 0.0  ;;  %v1030_v57 = vadd.f32 %v2613_v45, %v1029_v44 }
 0x1f1   :  { %v1175_v59 = vmax.f32 %v1030_v57, 0.0  ;;  %v911_v38 = vpack.c.bf16 %v862_v56, %v861_v55 }
 0x1f2   :  { %v679_v10 = vpop.f32.mrf.mxu1 }
 0x1f3   :  { %1071 = vmatmul.bf16.gmra.mxu2 %v911_v38  ;;  %v1233_v63 = vpack.c.bf16 %v1175_v59, %v1174_v58  ;;  %v680_v5 = vadd.f32 %v679_v10, %v2343_v34  ;;  %v2710_v14 = vpop.f32.mrf.mxu3  ;;  %v80_v34 = vld [vmem:[%s3313_s0 + $0x178] sm:$0xff] }
 0x1f4   :  { %v119_v44 = vpack.c.bf16 %v80_v34, %v79_v25 }
 0x1f5   :  { %1897 = vmatmul.msk.bf16.gmra.mxu1 %vm233_vm0, %v118_v61  ;;  %1359 = vmatmul.bf16.gmra.mxu3 %v1233_v63  ;;  %v800_v17 = vadd.f32 %v2432_v21, %v680_v5  ;;  %v82_v5 = vld [vmem:[%s3313_s0 + $0x188] sm:$0xff] }
 0x1f6   :  { %v1032_v1 = vpop.f32.mrf.mxu2 }
 0x1f7   :  { %v1033_v20 = vadd.f32 %v2613_v45, %v1032_v1  ;;  %v863_v29 = vmax.f32 %v800_v17, 0.0  ;;  %v81_v1 = vld [vmem:[%s3313_s0 + $0x180] sm:$0xff] }
 0x1f9   :  { %v1176_v39 = vmax.f32 %v1033_v20, 0.0 }
 0x1fa   :  { %v681_v16 = vpop.f32.mrf.mxu1 }
 0x1fb   :  { %v682_v18 = vadd.f32 %v681_v16, %v2355_v40  ;;  %v2040_v40 = vld [vmem:[%s3315_s7 + $0x10] sm:$0xff]  ;;  %v2726_v37 = vpop.f32.mrf.mxu3 }
 0x1fc   :  { %1604 = vmatpush.bf16.msrb.mxu0 %v2040_v40  ;;  %2054 = vmatpush.bf16.msra.mxu3 %v2040_v40 }
 0x1fd   :  { %v801_v62 = vadd.f32 %v2432_v21, %v682_v18 }
 0x1fe   :  { %v1034_v23 = vpop.f32.mrf.mxu2 }
 0x1ff   :  { %v864_v3 = vmax.f32 %v801_v62, 0.0  ;;  %v1035_v36 = vadd.f32 %v2613_v45, %v1034_v23  ;;  %v120_v23 = vpack.c.bf16 %v82_v5, %v81_v1 }
 0x201   :  { %v1177_v50 = vmax.f32 %v1035_v36, 0.0  ;;  %v912_v42 = vpack.c.bf16 %v864_v3, %v863_v29 }
 0x202   :  { %v684_v22 = vpop.f32.mrf.mxu1 }
 0x203   :  { %1076 = vmatmul.bf16.gmra.mxu2 %v912_v42  ;;  %v1234_v47 = vpack.c.bf16 %v1177_v50, %v1176_v39  ;;  %v685_v56 = vadd.f32 %v684_v22, %v2371_v48  ;;  %v496_v57 = vpop.f32.mrf.mxu3  ;;  %v83_v22 = vld [vmem:[%s3313_s0 + $0x190] sm:$0xff] }
 0x205   :  { %1898 = vmatmul.msk.bf16.gmra.mxu1 %vm233_vm0, %v119_v44  ;;  %1364 = vmatmul.bf16.gmra.mxu3 %v1234_v47  ;;  %v802_v59 = vadd.f32 %v2432_v21, %v685_v56  ;;  %v84_v47 = vld [vmem:[%s3313_s0 + $0x198] sm:$0xff] }
 0x206   :  { %v1037_v55 = vpop.f32.mrf.mxu2 }
 0x207   :  { %v1038_v61 = vadd.f32 %v2613_v45, %v1037_v55  ;;  %v865_v48 = vmax.f32 %v802_v59, 0.0 }
 0x209   :  { %v1178_v18 = vmax.f32 %v1038_v61, 0.0 }
 0x20a   :  { %v686_v58 = vpop.f32.mrf.mxu1 }
 0x20b   :  { %v687_v38 = vadd.f32 %v686_v58, %v2383_v54  ;;  %v2039_v54 = vld [vmem:[%s3315_s7 + $0x8] sm:$0xff] }
 0x20c   :  { %1605 = vmatpush.bf16.msrb.mxu0 %v2039_v54  ;;  %2055 = vmatpush.bf16.msra.mxu3 %v2039_v54 }
 0x20d   :  { %v803_v10 = vadd.f32 %v2432_v21, %v687_v38  ;;  %v121_v38 = vpack.c.bf16 %v84_v47, %v83_v22 }
 0x20e   :  { %v1039_v63 = vpop.f32.mrf.mxu2 }
 0x20f   :  { %v866_v16 = vmax.f32 %v803_v10, 0.0  ;;  %v1040_v17 = vadd.f32 %v2613_v45, %v1039_v63 }
 0x211   :  { %v1179_v20 = vmax.f32 %v1040_v17, 0.0  ;;  %v913_v62 = vpack.c.bf16 %v866_v16, %v865_v48 }
 0x212   :  { %v689_v25 = vpop.f32.mrf.mxu1 }
 0x213   :  { %1081 = vmatmul.bf16.gmra.mxu2 %v913_v62  ;;  %v1235_v34 = vpack.c.bf16 %v1179_v20, %v1178_v18  ;;  %v690_v3 = vadd.f32 %v689_v25, %v2399_v0  ;;  %v85_v20 = vld [vmem:[%s3313_s0 + $0x1a0] sm:$0xff]  ;;  %v86_v62 = vld [vmem:[%s3313_s0 + $0x1a8] sm:$0xff] }
 0x215   :  { %1899 = vmatmul.msk.bf16.gmra.mxu1 %vm233_vm0, %v120_v23  ;;  %1369 = vmatmul.bf16.gmra.mxu3 %v1235_v34  ;;  %v804_v40 = vadd.f32 %v2432_v21, %v690_v3  ;;  %v122_v3 = vpack.c.bf16 %v86_v62, %v85_v20 }
 0x216   :  { %v1042_v29 = vpop.f32.mrf.mxu2 }
 0x217   :  { %v1043_v50 = vadd.f32 %v2613_v45, %v1042_v29  ;;  %v867_v55 = vmax.f32 %v804_v40, 0.0 }
 0x219   :  { %v1180_v57 = vmax.f32 %v1043_v50, 0.0 }
 0x21a   :  { %v691_v36 = vpop.f32.mrf.mxu1 }
 0x21b   :  { %v692_v39 = vadd.f32 %v691_v36, %v2405_v2  ;;  %v2038_v2 = vld [vmem:[%s3315_s7] sm:$0xff] }
 0x21c   :  { %1606 = vmatpush.bf16.msrb.mxu0 %v2038_v2  ;;  %2056 = vmatpush.bf16.msra.mxu3 %v2038_v2  ;;  %v87_v2 = vld [vmem:[%s3313_s0 + $0x1b0] sm:$0xff] }
 0x21d   :  { %v805_v42 = vadd.f32 %v2432_v21, %v692_v39 }
 0x21e   :  { %v1044_v44 = vpop.f32.mrf.mxu2 }
 0x21f   :  { %v868_v0 = vmax.f32 %v805_v42, 0.0  ;;  %v1045_v56 = vadd.f32 %v2613_v45, %v1044_v44 }
 0x221   :  { %v1181_v58 = vmax.f32 %v1045_v56, 0.0  ;;  %v914_v59 = vpack.c.bf16 %v868_v0, %v867_v55  ;;  %v2781_v0 = vld [vmem:[%s3314_s6 + $0x1] ss:$0 sm:$0xff] }
 0x222   :  { %v694_v61 = vpop.f32.mrf.mxu1 }
 0x223   :  { %1086 = vmatmul.bf16.gmra.mxu2 %v914_v59  ;;  %v1236_v10 = vpack.c.bf16 %v1181_v58, %v1180_v57  ;;  %v695_v1 = vadd.f32 %v694_v61, %v2413_v8 }
 0x225   :  { %1900 = vmatmul.msk.bf16.gmra.mxu1 %vm233_vm0, %v121_v38  ;;  %1374 = vmatmul.bf16.gmra.mxu3 %v1236_v10  ;;  %v806_v48 = vadd.f32 %v2432_v21, %v695_v1 }
 0x226   :  { %v1047_v63 = vpop.f32.mrf.mxu2 }
 0x227   :  { %v1048_v17 = vadd.f32 %v2613_v45, %v1047_v63  ;;  %v869_v23 = vmax.f32 %v806_v48, 0.0 }
 0x229   :  { %v1182_v34 = vmax.f32 %v1048_v17, 0.0 }
 0x22a   :  { %v696_v5 = vpop.f32.mrf.mxu1 }
 0x22b   :  { %v697_v16 = vadd.f32 %v696_v5, %v2418_v12 }
 0x22d   :  { %v807_v54 = vadd.f32 %v2432_v21, %v697_v16 }
 0x22e   :  { %v1049_v18 = vpop.f32.mrf.mxu2 }
 0x22f   :  { %v870_v8 = vmax.f32 %v807_v54, 0.0  ;;  %v1050_v25 = vadd.f32 %v2613_v45, %v1049_v18 }
 0x231   :  { %v1183_v29 = vmax.f32 %v1050_v25, 0.0  ;;  %v915_v12 = vpack.c.bf16 %v870_v8, %v869_v23 }
 0x232   :  { %v699_v36 = vpop.f32.mrf.mxu1 }
 0x233   :  { %1091 = vmatmul.bf16.gmra.mxu2 %v915_v12  ;;  %v1237_v40 = vpack.c.bf16 %v1183_v29, %v1182_v34  ;;  %v700_v50 = vadd.f32 %v699_v36, %v2416_v11  ;;  %v88_v11 = vld [vmem:[%s3313_s0 + $0x1b8] sm:$0xff]  ;;  %v89_v12 = vld [vmem:[%s3313_s0 + $0x1c0] sm:$0xff] }
 0x234   :  { %v123_v10 = vpack.c.bf16 %v88_v11, %v87_v2 }
 0x235   :  { %1901 = vmatmul.msk.bf16.gmra.mxu1 %vm233_vm0, %v122_v3  ;;  %1379 = vmatmul.bf16.gmra.mxu3 %v1237_v40  ;;  %v808_v22 = vadd.f32 %v2432_v21, %v700_v50  ;;  %v90_v3 = vld [vmem:[%s3313_s0 + $0x1c8] sm:$0xff] }
 0x236   :  { %v1052_v39 = vpop.f32.mrf.mxu2 }
 0x237   :  { %v1053_v55 = vadd.f32 %v2613_v45, %v1052_v39  ;;  %v871_v58 = vmax.f32 %v808_v22, 0.0 }
 0x238   :  { %v1340_v42 = vpop.f32.mrf.mxu3 }
 0x239   :  { %v1184_v38 = vmax.f32 %v1053_v55, 0.0  ;;  %v1341_v63 = vadd.f32 %v2781_v0, %v1340_v42 }
 0x23a   :  { %v701_v44 = vpop.f32.mrf.mxu1 }
 0x23b   :  { %v702_v47 = vadd.f32 %v701_v44, %v2426_v19 }
 0x23d   :  { %v809_v56 = vadd.f32 %v2432_v21, %v702_v47 }
 0x23e   :  { %v1054_v57 = vpop.f32.mrf.mxu2 }
 0x23f   :  { %v872_v19 = vmax.f32 %v809_v56, 0.0  ;;  %v1055_v59 = vadd.f32 %v2613_v45, %v1054_v57 }
 0x240   :  { %v1342_v61 = vpop.f32.mrf.mxu3 }
 0x241   :  { %v1185_v1 = vmax.f32 %v1055_v59, 0.0  ;;  %v1343_v5 = vadd.f32 %v2781_v0, %v1342_v61  ;;  %v916_v48 = vpack.c.bf16 %v872_v19, %v871_v58 }
 0x242   :  { %v704_v16 = vpop.f32.mrf.mxu1 }
 0x243   :  { %v1499_v17 = vpack.c.bf16 %v1343_v5, %v1341_v63  ;;  %1096 = vmatmul.bf16.gmra.mxu2 %v916_v48  ;;  %v1238_v54 = vpack.c.bf16 %v1185_v1, %v1184_v38  ;;  %v705_v20 = vadd.f32 %v704_v16, %v2435_v28  ;;  %v91_v1 = vld [vmem:[%s3313_s0 + $0x1d0] sm:$0xff]  ;;  %v92_v5 = vld [vmem:[%s3313_s0 + $0x1d8] sm:$0xff] }
 0x245   :  { %1902 = vmatmul.msk.bf16.gmra.mxu1 %vm233_vm0, %v123_v10  ;;  %1384 = vmatmul.bf16.gmra.mxu3 %v1238_v54  ;;  %v810_v8 = vadd.f32 %v2432_v21, %v705_v20 }
 0x246   :  { %1607 = vmatmul.bf16.vlgmr.msrb.gmra.mxu0 %v1499_v17  ;;  %v1057_v18 = vpop.f32.mrf.mxu2 }
 0x247   :  { %v1058_v34 = vadd.f32 %v2613_v45, %v1057_v18  ;;  %v873_v28 = vmax.f32 %v810_v8, 0.0 }
 0x248   :  { %v1345_v62 = vpop.f32.mrf.mxu3 }
 0x249   :  { %v1186_v50 = vmax.f32 %v1058_v34, 0.0  ;;  %v1346_v44 = vadd.f32 %v2781_v0, %v1345_v62 }
 0x24a   :  { %v706_v23 = vpop.f32.mrf.mxu1 }
 0x24b   :  { %v707_v25 = vadd.f32 %v706_v23, %v2445_v41  ;;  %v124_v41 = vpack.c.bf16 %v90_v3, %v89_v12 }
 0x24d   :  { %v811_v29 = vadd.f32 %v2432_v21, %v707_v25 }
 0x24e   :  { %v1059_v36 = vpop.f32.mrf.mxu2 }
 0x24f   :  { %v874_v40 = vmax.f32 %v811_v29, 0.0  ;;  %v1060_v39 = vadd.f32 %v2613_v45, %v1059_v36 }
 0x250   :  { %v1347_v42 = vpop.f32.mrf.mxu3 }
 0x251   :  { %v1187_v22 = vmax.f32 %v1060_v39, 0.0  ;;  %v1348_v47 = vadd.f32 %v2781_v0, %v1347_v42  ;;  %v917_v55 = vpack.c.bf16 %v874_v40, %v873_v28  ;;  %v2828_v28 = vld [vmem:[%s3312_s4] ss:$0 sm:$0xff] }
 0x252   :  { %v709_v56 = vpop.f32.mrf.mxu1 }
 0x253   :  { %1101 = vmatmul.bf16.gmra.mxu2 %v917_v55  ;;  %v1239_v2 = vpack.c.bf16 %v1187_v22, %v1186_v50  ;;  %v1500_v11 = vpack.c.bf16 %v1348_v47, %v1346_v44  ;;  %v710_v58 = vadd.f32 %v709_v56, %v2462_v60 }
 0x255   :  { %1903 = vmatmul.msk.bf16.gmra.mxu1 %vm233_vm0, %v124_v41  ;;  %1389 = vmatmul.bf16.gmra.mxu3 %v1239_v2  ;;  %v812_v38 = vadd.f32 %v2432_v21, %v710_v58  ;;  %v93_v41 = vld [vmem:[%s3313_s0 + $0x1e0] sm:$0xff] }
 0x256   :  { %1612 = vmatmul.bf16.gmra.mxu0 %v1500_v11  ;;  %v1062_v57 = vpop.f32.mrf.mxu2 }
 0x257   :  { %v1063_v10 = vadd.f32 %v2613_v45, %v1062_v57  ;;  %v875_v60 = vmax.f32 %v812_v38, 0.0 }
 0x258   :  { %v1350_v19 = vpop.f32.mrf.mxu3 }
 0x259   :  { %v1188_v54 = vmax.f32 %v1063_v10, 0.0  ;;  %v1351_v20 = vadd.f32 %v2781_v0, %v1350_v19 }
 0x25a   :  { %v711_v59 = vpop.f32.mrf.mxu1 }
 0x25b   :  { %v712_v61 = vadd.f32 %v711_v59, %v2468_v9  ;;  %v125_v9 = vpack.c.bf16 %v92_v5, %v91_v1 }
 0x25d   :  { %v813_v63 = vadd.f32 %v2432_v21, %v712_v61 }
 0x25e   :  { %v1064_v48 = vpop.f32.mrf.mxu2 }
 0x25f   :  { %v876_v16 = vmax.f32 %v813_v63, 0.0  ;;  %v1065_v17 = vadd.f32 %v2613_v45, %v1064_v48 }
 0x260   :  { %v1352_v18 = vpop.f32.mrf.mxu3 }
 0x261   :  { %v1189_v62 = vmax.f32 %v1065_v17, 0.0  ;;  %v1353_v21 = vadd.f32 %v2781_v0, %v1352_v18  ;;  %v918_v23 = vpack.c.bf16 %v876_v16, %v875_v60 }
 0x262   :  { %v714_v8 = vpop.f32.mrf.mxu1 }
 0x263   :  { %1106 = vmatmul.bf16.gmra.mxu2 %v918_v23  ;;  %v1240_v25 = vpack.c.bf16 %v1189_v62, %v1188_v54  ;;  %v1501_v34 = vpack.c.bf16 %v1353_v21, %v1351_v20  ;;  %v715_v12 = vadd.f32 %v714_v8, %v2488_v35  ;;  %v94_v35 = vld [vmem:[%s3313_s0 + $0x1e8] sm:$0xff]  ;;  %v95_v54 = vld [vmem:[%s3313_s0 + $0x1f0] sm:$0xff] }
 0x264   :  { %v127_v23 = vpack.c.bf16 %v95_v54, %v95_v54 }
 0x265   :  { %1904 = vmatmul.msk.bf16.gmra.mxu1 %vm233_vm0, %v125_v9  ;;  %1394 = vmatmul.bf16.gmra.mxu3 %v1240_v25  ;;  %v814_v40 = vadd.f32 %v2828_v28, %v715_v12 }
 0x266   :  { %1617 = vmatmul.bf16.gmra.mxu0 %v1501_v34  ;;  %v1067_v29 = vpop.f32.mrf.mxu2 }
 0x267   :  { %v1068_v50 = vadd.f32 %v2613_v45, %v1067_v29  ;;  %v877_v22 = vmax.f32 %v814_v40, 0.0 }
 0x268   :  { %v1355_v3 = vpop.f32.mrf.mxu3 }
 0x269   :  { %v1190_v56 = vmax.f32 %v1068_v50, 0.0  ;;  %v1356_v11 = vadd.f32 %v2781_v0, %v1355_v3 }
 0x26a   :  { %v716_v36 = vpop.f32.mrf.mxu1 }
 0x26b   :  { %v717_v39 = vadd.f32 %v716_v36, %v2506_v53  ;;  %v126_v53 = vpack.c.bf16 %v94_v35, %v93_v41 }
 0x26d   :  { %v815_v42 = vadd.f32 %v2828_v28, %v717_v39 }
 0x26e   :  { %v1069_v44 = vpop.f32.mrf.mxu2 }
 0x26f   :  { %v878_v47 = vmax.f32 %v815_v42, 0.0  ;;  %v1070_v55 = vadd.f32 %v2613_v45, %v1069_v44 }
 0x270   :  { %v1357_v2 = vpop.f32.mrf.mxu3 }
 0x271   :  { %v1191_v57 = vmax.f32 %v1070_v55, 0.0  ;;  %v1358_v58 = vadd.f32 %v2781_v0, %v1357_v2  ;;  %v919_v19 = vpack.c.bf16 %v878_v47, %v877_v22 }
 0x272   :  { %v719_v59 = vpop.f32.mrf.mxu1 }
 0x273   :  { %v1502_v38 = vpack.c.bf16 %v1358_v58, %v1356_v11  ;;  %1111 = vmatmul.bf16.gmra.mxu2 %v919_v19  ;;  %v1241_v61 = vpack.c.bf16 %v1191_v57, %v1190_v56  ;;  %v720_v63 = vadd.f32 %v719_v59, %v2515_v6 }
 0x275   :  { %1905 = vmatmul.msk.bf16.gmra.mxu1 %vm233_vm0, %v126_v53  ;;  %1399 = vmatmul.bf16.gmra.mxu3 %v1241_v61  ;;  %v816_v48 = vadd.f32 %v2828_v28, %v720_v63 }
 0x276   :  { %1622 = vmatmul.bf16.gmra.mxu0 %v1502_v38  ;;  %v1072_v10 = vpop.f32.mrf.mxu2 }
 0x277   :  { %v1073_v16 = vadd.f32 %v2613_v45, %v1072_v10  ;;  %v879_v9 = vmax.f32 %v816_v48, 0.0 }
 0x278   :  { %v1360_v1 = vpop.f32.mrf.mxu3 }
 0x279   :  { %v1192_v6 = vmax.f32 %v1073_v16, 0.0  ;;  %v1361_v8 = vadd.f32 %v2781_v0, %v1360_v1 }
 0x27a   :  { %v721_v5 = vpop.f32.mrf.mxu1 }
 0x27b   :  { %v722_v60 = vadd.f32 %v721_v5, %v2532_v33 }
 0x27d   :  { %v817_v17 = vadd.f32 %v2828_v28, %v722_v60 }
 0x27e   :  { %v1074_v18 = vpop.f32.mrf.mxu2 }
 0x27f   :  { %v880_v20 = vmax.f32 %v817_v17, 0.0  ;;  %v1075_v62 = vadd.f32 %v2613_v45, %v1074_v18 }
 0x280   :  { %v1362_v21 = vpop.f32.mrf.mxu3 }
 0x281   :  { %v1193_v25 = vmax.f32 %v1075_v62, 0.0  ;;  %v1363_v33 = vadd.f32 %v2781_v0, %v1362_v21  ;;  %v920_v34 = vpack.c.bf16 %v880_v20, %v879_v9 }
 0x282   :  { %v724_v29 = vpop.f32.mrf.mxu1 }
 0x283   :  { %v1503_v12 = vpack.c.bf16 %v1363_v33, %v1361_v8  ;;  %1116 = vmatmul.bf16.gmra.mxu2 %v920_v34  ;;  %v1242_v3 = vpack.c.bf16 %v1193_v25, %v1192_v6  ;;  %v725_v40 = vadd.f32 %v724_v29, %v2545_v51 }
 0x285   :  { %1906 = vmatmul.msk.bf16.gmra.mxu1 %vm233_vm0, %v127_v23  ;;  %1404 = vmatmul.bf16.gmra.mxu3 %v1242_v3  ;;  %v818_v42 = vadd.f32 %v2828_v28, %v725_v40 }
 0x286   :  { %1627 = vmatmul.bf16.gmra.mxu0 %v1503_v12  ;;  %v1077_v36 = vpop.f32.mrf.mxu2 }
 0x287   :  { %v1078_v35 = vadd.f32 %v2613_v45, %v1077_v36  ;;  %v881_v47 = vmax.f32 %v818_v42, 0.0 }
 0x288   :  { %v1365_v39 = vpop.f32.mrf.mxu3 }
 0x289   :  { %v1194_v2 = vmax.f32 %v1078_v35, 0.0  ;;  %v1366_v11 = vadd.f32 %v2781_v0, %v1365_v39 }
 0x28a   :  { %v726_v50 = vpop.f32.mrf.mxu1 }
 0x28b   :  { %v727_v41 = vadd.f32 %v726_v50, %v2559_v7 }
 0x28d   :  { %v819_v44 = vadd.f32 %v2828_v28, %v727_v41 }
 0x28e   :  { %v1079_v22 = vpop.f32.mrf.mxu2 }
 0x28f   :  { %v882_v55 = vmax.f32 %v819_v44, 0.0  ;;  %v1080_v56 = vadd.f32 %v2613_v45, %v1079_v22 }
 0x290   :  { %v1367_v53 = vpop.f32.mrf.mxu3 }
 0x291   :  { %v1195_v51 = vmax.f32 %v1080_v56, 0.0  ;;  %v1368_v57 = vadd.f32 %v2781_v0, %v1367_v53  ;;  %v921_v58 = vpack.c.bf16 %v882_v55, %v881_v47 }
 0x292   :  { %v729_v19 = vpop.f32.mrf.mxu1 }
 0x293   :  { %v1504_v59 = vpack.c.bf16 %v1368_v57, %v1366_v11  ;;  %1121 = vmatmul.bf16.gmra.mxu2 %v921_v58  ;;  %v1243_v7 = vpack.c.bf16 %v1195_v51, %v1194_v2  ;;  %v730_v61 = vadd.f32 %v729_v19, %v2576_v32 }
 0x295   :  { %1409 = vmatmul.bf16.gmra.mxu3 %v1243_v7  ;;  %v820_v1 = vadd.f32 %v2828_v28, %v730_v61 }
 0x296   :  { %1632 = vmatmul.bf16.gmra.mxu0 %v1504_v59  ;;  %v1082_v38 = vpop.f32.mrf.mxu2 }
 0x297   :  { %v1083_v48 = vadd.f32 %v2613_v45, %v1082_v38  ;;  %v883_v17 = vmax.f32 %v820_v1, 0.0 }
 0x298   :  { %v1370_v10 = vpop.f32.mrf.mxu3 }
 0x299   :  { %v1196_v9 = vmax.f32 %v1083_v48, 0.0  ;;  %v1371_v62 = vadd.f32 %v2781_v0, %v1370_v10 }
 0x29a   :  { %v731_v63 = vpop.f32.mrf.mxu1 }
 0x29b   :  { %v732_v5 = vadd.f32 %v731_v63, %v2582_v46 }
 0x29d   :  { %v821_v60 = vadd.f32 %v2828_v28, %v732_v5 }
 0x29e   :  { %v1084_v16 = vpop.f32.mrf.mxu2 }
 0x29f   :  { %v884_v54 = vmax.f32 %v821_v60, 0.0  ;;  %v1085_v18 = vadd.f32 %v2613_v45, %v1084_v16 }
 0x2a0   :  { %v1372_v20 = vpop.f32.mrf.mxu3 }
 0x2a1   :  { %v1197_v32 = vmax.f32 %v1085_v18, 0.0  ;;  %v1373_v6 = vadd.f32 %v2781_v0, %v1372_v20  ;;  %v922_v21 = vpack.c.bf16 %v884_v54, %v883_v17 }
 0x2a2   :  { %v734_v23 = vpop.f32.mrf.mxu1 }
 0x2a3   :  { %v1505_v8 = vpack.c.bf16 %v1373_v6, %v1371_v62  ;;  %1126 = vmatmul.bf16.gmra.mxu2 %v922_v21  ;;  %v1244_v46 = vpack.c.bf16 %v1197_v32, %v1196_v9  ;;  %v735_v33 = vadd.f32 %v734_v23, %v2592_v13 }
 0x2a5   :  { %1414 = vmatmul.bf16.gmra.mxu3 %v1244_v46  ;;  %v822_v12 = vadd.f32 %v2828_v28, %v735_v33 }
 0x2a6   :  { %1637 = vmatmul.bf16.gmra.mxu0 %v1505_v8  ;;  %v1087_v25 = vpop.f32.mrf.mxu2 }
 0x2a7   :  { %v1088_v36 = vadd.f32 %v2613_v45, %v1087_v25  ;;  %v885_v50 = vmax.f32 %v822_v12, 0.0 }
 0x2a8   :  { %v1375_v34 = vpop.f32.mrf.mxu3 }
 0x2a9   :  { %v1198_v35 = vmax.f32 %v1088_v36, 0.0  ;;  %v1376_v22 = vadd.f32 %v2781_v0, %v1375_v34 }
 0x2aa   :  { %v736_v29 = vpop.f32.mrf.mxu1 }
 0x2ab   :  { %v737_v3 = vadd.f32 %v736_v29, %v2597_v24 }
 0x2ad   :  { %v823_v40 = vadd.f32 %v2828_v28, %v737_v3 }
 0x2ae   :  { %v1089_v39 = vpop.f32.mrf.mxu2 }
 0x2af   :  { %v886_v42 = vmax.f32 %v823_v40, 0.0  ;;  %v1090_v41 = vadd.f32 %v2613_v45, %v1089_v39 }
 0x2b0   :  { %v1377_v44 = vpop.f32.mrf.mxu3 }
 0x2b1   :  { %v1199_v13 = vmax.f32 %v1090_v41, 0.0  ;;  %v1378_v47 = vadd.f32 %v2781_v0, %v1377_v44  ;;  %v923_v55 = vpack.c.bf16 %v886_v42, %v885_v50 }
 0x2b2   :  { %v739_v56 = vpop.f32.mrf.mxu1 }
 0x2b3   :  { %v1506_v2 = vpack.c.bf16 %v1378_v47, %v1376_v22  ;;  %1131 = vmatmul.bf16.gmra.mxu2 %v923_v55  ;;  %v1245_v24 = vpack.c.bf16 %v1199_v13, %v1198_v35  ;;  %v740_v11 = vadd.f32 %v739_v56, %v2626_v4  ;;  %v2889_v4 = vld [vmem:[%s3316_s8] ss:$0 sm:$0xff] }
 0x2b5   :  { %1419 = vmatmul.bf16.gmra.mxu3 %v1245_v24  ;;  %v824_v58 = vadd.f32 %v2828_v28, %v740_v11 }
 0x2b6   :  { %1642 = vmatmul.bf16.gmra.mxu0 %v1506_v2  ;;  %v1092_v53 = vpop.f32.mrf.mxu2 }
 0x2b7   :  { %v1093_v59 = vadd.f32 %v2613_v45, %v1092_v53  ;;  %v887_v61 = vmax.f32 %v824_v58, 0.0 }
 0x2b8   :  { %v1380_v51 = vpop.f32.mrf.mxu3 }
 0x2b9   :  { %v1200_v1 = vmax.f32 %v1093_v59, 0.0  ;;  %v1381_v48 = vadd.f32 %v2781_v0, %v1380_v51 }
 0x2ba   :  { %v741_v57 = vpop.f32.mrf.mxu1 }
 0x2bb   :  { %v742_v19 = vadd.f32 %v741_v57, %v2633_v26 }
 0x2bd   :  { %v825_v7 = vadd.f32 %v2828_v28, %v742_v19 }
 0x2be   :  { %v1094_v38 = vpop.f32.mrf.mxu2 }
 0x2bf   :  { %v888_v10 = vmax.f32 %v825_v7, 0.0  ;;  %v1095_v63 = vadd.f32 %v2613_v45, %v1094_v38  ;;  %v2929_v7 = vld [vmem:[%s3314_s6] ss:$0 sm:$0xff] }
 0x2c0   :  { %v1382_v5 = vpop.f32.mrf.mxu3 }
 0x2c1   :  { %v1201_v60 = vmax.f32 %v1095_v63, 0.0  ;;  %v1383_v26 = vadd.f32 %v2781_v0, %v1382_v5  ;;  %v924_v16 = vpack.c.bf16 %v888_v10, %v887_v61 }
 0x2c2   :  { %v744_v17 = vpop.f32.mrf.mxu1 }
 0x2c3   :  { %v1507_v54 = vpack.c.bf16 %v1383_v26, %v1381_v48  ;;  %v1608_v18 = vpop.f32.mrf.mxu0  ;;  %1136 = vmatmul.bf16.gmra.mxu2 %v924_v16  ;;  %v1246_v9 = vpack.c.bf16 %v1201_v60, %v1200_v1  ;;  %v745_v32 = vadd.f32 %v744_v17, %v2646_v52 }
 0x2c4   :  { %v1609_v20 = vadd.f32 %v2889_v4, %v1608_v18 }
 0x2c5   :  { %1424 = vmatmul.bf16.gmra.mxu3 %v1246_v9  ;;  %v826_v23 = vadd.f32 %v2828_v28, %v745_v32 }
 0x2c6   :  { %1768 = vst.msk [vmem:[%s3317_s9] sm:$0xff] %vm1767_vm1, %v1609_v20  ;;  %1647 = vmatmul.bf16.gmra.mxu0 %v1507_v54  ;;  %v1097_v62 = vpop.f32.mrf.mxu2 }
 0x2c7   :  { %v1098_v25 = vadd.f32 %v2613_v45, %v1097_v62  ;;  %v889_v52 = vmax.f32 %v826_v23, 0.0 }
 0x2c8   :  { %v1385_v6 = vpop.f32.mrf.mxu3 }
 0x2c9   :  { %v1202_v36 = vmax.f32 %v1098_v25, 0.0 }
 0x2ca   :  { %v746_v21 = vpop.f32.mrf.mxu1 }
 0x2cb   :  { %v747_v8 = vadd.f32 %v746_v21, %v2653_v43  ;;  %v1610_v46 = vpop.f32.mrf.mxu0  ;;  %v1386_v43 = vadd.f32 %v2781_v0, %v1385_v6 }
 0x2cc   :  { %v1611_v33 = vadd.f32 %v2889_v4, %v1610_v46 }
 0x2cd   :  { %v827_v34 = vadd.f32 %v2828_v28, %v747_v8 }
 0x2ce   :  { %1769 = vst.msk [vmem:[%s3317_s9 + $0x8] sm:$0xff] %vm1767_vm1, %v1611_v33  ;;  %v1099_v29 = vpop.f32.mrf.mxu2 }
 0x2cf   :  { %v890_v12 = vmax.f32 %v827_v34, 0.0  ;;  %v1100_v3 = vadd.f32 %v2613_v45, %v1099_v29 }
 0x2d0   :  { %v1387_v40 = vpop.f32.mrf.mxu3 }
 0x2d1   :  { %v1203_v39 = vmax.f32 %v1100_v3, 0.0  ;;  %v1388_v50 = vadd.f32 %v2781_v0, %v1387_v40  ;;  %v925_v42 = vpack.c.bf16 %v890_v12, %v889_v52 }
 0x2d2   :  { %v749_v41 = vpop.f32.mrf.mxu1 }
 0x2d3   :  { %v1508_v35 = vpack.c.bf16 %v1388_v50, %v1386_v43  ;;  %v1613_v44 = vpop.f32.mrf.mxu0  ;;  %1141 = vmatmul.bf16.gmra.mxu2 %v925_v42  ;;  %v1247_v22 = vpack.c.bf16 %v1203_v39, %v1202_v36  ;;  %v750_v55 = vadd.f32 %v749_v41, %v2666_v31 }
 0x2d4   :  { %v1614_v13 = vadd.f32 %v2889_v4, %v1613_v44 }
 0x2d5   :  { %1429 = vmatmul.bf16.gmra.mxu3 %v1247_v22  ;;  %v828_v24 = vadd.f32 %v2828_v28, %v750_v55 }
 0x2d6   :  { %1770 = vst.msk [vmem:[%s3317_s9 + $0x10] sm:$0xff] %vm1767_vm1, %v1614_v13  ;;  %1652 = vmatmul.bf16.gmra.mxu0 %v1508_v35  ;;  %v1102_v47 = vpop.f32.mrf.mxu2 }
 0x2d7   :  { %v1103_v51 = vadd.f32 %v2613_v45, %v1102_v47  ;;  %v891_v31 = vmax.f32 %v828_v24, 0.0 }
 0x2d8   :  { %v1390_v56 = vpop.f32.mrf.mxu3 }
 0x2d9   :  { %v1204_v45 = vmax.f32 %v1103_v51, 0.0  ;;  %v1391_v61 = vadd.f32 %v2781_v0, %v1390_v56 }
 0x2da   :  { %v751_v2 = vpop.f32.mrf.mxu1 }
 0x2db   :  { %v752_v53 = vadd.f32 %v751_v2, %v2670_v49  ;;  %v1615_v11 = vpop.f32.mrf.mxu0 }
 0x2dc   :  { %v1616_v57 = vadd.f32 %v2889_v4, %v1615_v11 }
 0x2dd   :  { %v829_v58 = vadd.f32 %v2828_v28, %v752_v53 }
 0x2de   :  { %1771 = vst.msk [vmem:[%s3317_s9 + $0x18] sm:$0xff] %vm1767_vm1, %v1616_v57  ;;  %v1104_v19 = vpop.f32.mrf.mxu2 }
 0x2df   :  { %v892_v59 = vmax.f32 %v829_v58, 0.0  ;;  %v1105_v49 = vadd.f32 %v2929_v7, %v1104_v19 }
 0x2e0   :  { %v1392_v38 = vpop.f32.mrf.mxu3 }
 0x2e1   :  { %v1205_v10 = vmax.f32 %v1105_v49, 0.0  ;;  %v1393_v63 = vadd.f32 %v2781_v0, %v1392_v38  ;;  %v926_v1 = vpack.c.bf16 %v892_v59, %v891_v31 }
 0x2e2   :  { %v754_v5 = vpop.f32.mrf.mxu1 }
 0x2e3   :  { %v1509_v48 = vpack.c.bf16 %v1393_v63, %v1391_v61  ;;  %v1618_v60 = vpop.f32.mrf.mxu0  ;;  %1146 = vmatmul.bf16.gmra.mxu2 %v926_v1  ;;  %v1248_v26 = vpack.c.bf16 %v1205_v10, %v1204_v45  ;;  %v755_v54 = vadd.f32 %v754_v5, %v2686_v15 }
 0x2e4   :  { %v1619_v16 = vadd.f32 %v2889_v4, %v1618_v60 }
 0x2e5   :  { %1434 = vmatmul.bf16.gmra.mxu3 %v1248_v26  ;;  %v830_v20 = vadd.f32 %v2828_v28, %v755_v54 }
 0x2e6   :  { %1772 = vst.msk [vmem:[%s3317_s9 + $0x20] sm:$0xff] %vm1767_vm1, %v1619_v16  ;;  %1657 = vmatmul.bf16.gmra.mxu0 %v1509_v48  ;;  %v1107_v17 = vpop.f32.mrf.mxu2 }
 0x2e7   :  { %v1108_v6 = vadd.f32 %v2929_v7, %v1107_v17  ;;  %v893_v15 = vmax.f32 %v830_v20, 0.0 }
 0x2e8   :  { %v1395_v18 = vpop.f32.mrf.mxu3 }
 0x2e9   :  { %v1206_v33 = vmax.f32 %v1108_v6, 0.0 }
 0x2ea   :  { %v756_v9 = vpop.f32.mrf.mxu1 }
 0x2eb   :  { %v757_v62 = vadd.f32 %v756_v9, %v2690_v30  ;;  %v1620_v32 = vpop.f32.mrf.mxu0  ;;  %v1396_v30 = vadd.f32 %v2781_v0, %v1395_v18 }
 0x2ec   :  { %v1621_v21 = vadd.f32 %v2889_v4, %v1620_v32 }
 0x2ed   :  { %v831_v23 = vadd.f32 %v2828_v28, %v757_v62 }
 0x2ee   :  { %1773 = vst.msk [vmem:[%s3317_s9 + $0x28] sm:$0xff] %vm1767_vm1, %v1621_v21  ;;  %v1109_v8 = vpop.f32.mrf.mxu2 }
 0x2ef   :  { %v894_v46 = vmax.f32 %v831_v23, 0.0  ;;  %v1110_v25 = vadd.f32 %v2929_v7, %v1109_v8 }
 0x2f0   :  { %v1397_v34 = vpop.f32.mrf.mxu3 }
 0x2f1   :  { %v1207_v29 = vmax.f32 %v1110_v25, 0.0  ;;  %v1398_v52 = vadd.f32 %v2781_v0, %v1397_v34  ;;  %v927_v12 = vpack.c.bf16 %v894_v46, %v893_v15 }
 0x2f2   :  { %v759_v3 = vpop.f32.mrf.mxu1 }
 0x2f3   :  { %v1249_v36 = vpack.c.bf16 %v1207_v29, %v1206_v33  ;;  %v1510_v40 = vpack.c.bf16 %v1398_v52, %v1396_v30  ;;  %v1623_v43 = vpop.f32.mrf.mxu0  ;;  %1151 = vmatmul.bf16.gmra.mxu2 %v927_v12  ;;  %v760_v42 = vadd.f32 %v759_v3, %v2706_v27 }
 0x2f4   :  { %v1624_v39 = vadd.f32 %v2889_v4, %v1623_v43 }
 0x2f5   :  { %1439 = vmatmul.bf16.gmra.mxu3 %v1249_v36  ;;  %v832_v44 = vadd.f32 %v2828_v28, %v760_v42 }
 0x2f6   :  { %1774 = vst.msk [vmem:[%s3317_s9 + $0x30] sm:$0xff] %vm1767_vm1, %v1624_v39  ;;  %1662 = vmatmul.bf16.gmra.mxu0 %v1510_v40  ;;  %v1112_v50 = vpop.f32.mrf.mxu2 }
 0x2f7   :  { %v1113_v47 = vadd.f32 %v2929_v7, %v1112_v50  ;;  %v895_v27 = vmax.f32 %v832_v44, 0.0 }
 0x2f8   :  { %v1400_v41 = vpop.f32.mrf.mxu3 }
 0x2f9   :  { %v1208_v11 = vmax.f32 %v1113_v47, 0.0 }
 0x2fa   :  { %v761_v35 = vpop.f32.mrf.mxu1 }
 0x2fb   :  { %v762_v22 = vadd.f32 %v761_v35, %v2710_v14  ;;  %v1625_v13 = vpop.f32.mrf.mxu0  ;;  %v1401_v14 = vadd.f32 %v2781_v0, %v1400_v41 }
 0x2fc   :  { %v1626_v55 = vadd.f32 %v2889_v4, %v1625_v13 }
 0x2fd   :  { %v833_v56 = vadd.f32 %v2828_v28, %v762_v22 }
 0x2fe   :  { %1775 = vst.msk [vmem:[%s3317_s9 + $0x38] sm:$0xff] %vm1767_vm1, %v1626_v55  ;;  %v1114_v2 = vpop.f32.mrf.mxu2 }
 0x2ff   :  { %v896_v24 = vmax.f32 %v833_v56, 0.0  ;;  %v1115_v53 = vadd.f32 %v2929_v7, %v1114_v2 }
 0x300   :  { %v1402_v51 = vpop.f32.mrf.mxu3 }
 0x301   :  { %v1209_v57 = vmax.f32 %v1115_v53, 0.0  ;;  %v1403_v58 = vadd.f32 %v2781_v0, %v1402_v51  ;;  %v928_v19 = vpack.c.bf16 %v896_v24, %v895_v27 }
 0x302   :  { %v764_v31 = vpop.f32.mrf.mxu1 }
 0x303   :  { %v1250_v59 = vpack.c.bf16 %v1209_v57, %v1208_v11  ;;  %v1511_v49 = vpack.c.bf16 %v1403_v58, %v1401_v14  ;;  %v1628_v45 = vpop.f32.mrf.mxu0  ;;  %1156 = vmatmul.bf16.gmra.mxu2 %v928_v19  ;;  %v765_v38 = vadd.f32 %v764_v31, %v2726_v37 }
 0x304   :  { %v1629_v61 = vadd.f32 %v2889_v4, %v1628_v45 }
 0x305   :  { %1444 = vmatmul.bf16.gmra.mxu3 %v1250_v59  ;;  %v834_v63 = vadd.f32 %v2828_v28, %v765_v38 }
 0x306   :  { %1776 = vst.msk [vmem:[%s3317_s9 + $0x40] sm:$0xff] %vm1767_vm1, %v1629_v61  ;;  %1667 = vmatmul.bf16.gmra.mxu0 %v1511_v49  ;;  %v1117_v10 = vpop.f32.mrf.mxu2 }
 0x307   :  { %v897_v60 = vmax.f32 %v834_v63, 0.0  ;;  %v1118_v37 = vadd.f32 %v2929_v7, %v1117_v10 }
 0x308   :  { %v1405_v1 = vpop.f32.mrf.mxu3 }
 0x309   :  { %v929_v54 = vpack.c.bf16 %v897_v60, %v897_v60  ;;  %v1210_v9 = vmax.f32 %v1118_v37, 0.0  ;;  %v1406_v28 = vadd.f32 %v2781_v0, %v1405_v1 }
 0x30a   :  { %v766_v5 = vpop.f32.mrf.mxu1 }
 0x30b   :  { %v1630_v48 = vpop.f32.mrf.mxu0 }
 0x30c   :  { %v1631_v26 = vadd.f32 %v2889_v4, %v1630_v48 }
 0x30e   :  { %1777 = vst.msk [vmem:[%s3317_s9 + $0x48] sm:$0xff] %vm1767_vm1, %v1631_v26  ;;  %v1119_v16 = vpop.f32.mrf.mxu2 }
 0x30f   :  { %v1120_v17 = vadd.f32 %v2929_v7, %v1119_v16 }
 0x310   :  { %v1407_v18 = vpop.f32.mrf.mxu3 }
 0x311   :  { %v1211_v20 = vmax.f32 %v1120_v17, 0.0  ;;  %v1408_v62 = vadd.f32 %v2781_v0, %v1407_v18 }
 0x313   :  { %v1251_v32 = vpack.c.bf16 %v1211_v20, %v1210_v9  ;;  %v1512_v6 = vpack.c.bf16 %v1408_v62, %v1406_v28  ;;  %v1633_v21 = vpop.f32.mrf.mxu0  ;;  %1161 = vmatmul.bf16.gmra.mxu2 %v929_v54 }
 0x314   :  { %v1634_v23 = vadd.f32 %v2889_v4, %v1633_v21 }
 0x315   :  { %1449 = vmatmul.bf16.gmra.mxu3 %v1251_v32 }
 0x316   :  { %1778 = vst.msk [vmem:[%s3317_s9 + $0x50] sm:$0xff] %vm1767_vm1, %v1634_v23  ;;  %1672 = vmatmul.bf16.gmra.mxu0 %v1512_v6  ;;  %v1122_v8 = vpop.f32.mrf.mxu2 }
 0x317   :  { %v1123_v33 = vadd.f32 %v2929_v7, %v1122_v8 }
 0x318   :  { %v1410_v15 = vpop.f32.mrf.mxu3 }
 0x319   :  { %v1212_v52 = vmax.f32 %v1123_v33, 0.0  ;;  %v1411_v12 = vadd.f32 %v2781_v0, %v1410_v15 }
 0x31b   :  { %v1635_v46 = vpop.f32.mrf.mxu0 }
 0x31c   :  { %v1636_v25 = vadd.f32 %v2889_v4, %v1635_v46 }
 0x31e   :  { %1779 = vst.msk [vmem:[%s3317_s9 + $0x58] sm:$0xff] %vm1767_vm1, %v1636_v25  ;;  %v1124_v34 = vpop.f32.mrf.mxu2 }
 0x31f   :  { %v1125_v30 = vadd.f32 %v2929_v7, %v1124_v34 }
 0x320   :  { %v1412_v29 = vpop.f32.mrf.mxu3 }
 0x321   :  { %v1213_v3 = vmax.f32 %v1125_v30, 0.0  ;;  %v1413_v36 = vadd.f32 %v2781_v0, %v1412_v29 }
 0x323   :  { %v1252_v40 = vpack.c.bf16 %v1213_v3, %v1212_v52  ;;  %v1513_v43 = vpack.c.bf16 %v1413_v36, %v1411_v12  ;;  %v1638_v39 = vpop.f32.mrf.mxu0 }
 0x324   :  { %v1639_v50 = vadd.f32 %v2889_v4, %v1638_v39 }
 0x325   :  { %1454 = vmatmul.bf16.gmra.mxu3 %v1252_v40 }
 0x326   :  { %1780 = vst.msk [vmem:[%s3317_s9 + $0x60] sm:$0xff] %vm1767_vm1, %v1639_v50  ;;  %1677 = vmatmul.bf16.gmra.mxu0 %v1513_v43  ;;  %v1127_v42 = vpop.f32.mrf.mxu2 }
 0x327   :  { %v1128_v22 = vadd.f32 %v2929_v7, %v1127_v42 }
 0x328   :  { %v1415_v41 = vpop.f32.mrf.mxu3 }
 0x329   :  { %v1214_v56 = vmax.f32 %v1128_v22, 0.0  ;;  %v1416_v2 = vadd.f32 %v2781_v0, %v1415_v41 }
 0x32b   :  { %v1640_v35 = vpop.f32.mrf.mxu0 }
 0x32c   :  { %v1641_v44 = vadd.f32 %v2889_v4, %v1640_v35 }
 0x32e   :  { %1781 = vst.msk [vmem:[%s3317_s9 + $0x68] sm:$0xff] %vm1767_vm1, %v1641_v44  ;;  %v1129_v13 = vpop.f32.mrf.mxu2 }
 0x32f   :  { %v1130_v47 = vadd.f32 %v2929_v7, %v1129_v13 }
 0x330   :  { %v1417_v55 = vpop.f32.mrf.mxu3 }
 0x331   :  { %v1215_v27 = vmax.f32 %v1130_v47, 0.0  ;;  %v1418_v24 = vadd.f32 %v2781_v0, %v1417_v55 }
 0x333   :  { %v1253_v53 = vpack.c.bf16 %v1215_v27, %v1214_v56  ;;  %v1514_v11 = vpack.c.bf16 %v1418_v24, %v1416_v2  ;;  %v1643_v51 = vpop.f32.mrf.mxu0 }
 0x334   :  { %v1644_v14 = vadd.f32 %v2889_v4, %v1643_v51 }
 0x335   :  { %1459 = vmatmul.bf16.gmra.mxu3 %v1253_v53 }
 0x336   :  { %1782 = vst.msk [vmem:[%s3317_s9 + $0x70] sm:$0xff] %vm1767_vm1, %v1644_v14  ;;  %1682 = vmatmul.bf16.gmra.mxu0 %v1514_v11  ;;  %v1132_v57 = vpop.f32.mrf.mxu2 }
 0x337   :  { %v1133_v59 = vadd.f32 %v2929_v7, %v1132_v57 }
 0x338   :  { %v1420_v58 = vpop.f32.mrf.mxu3 }
 0x339   :  { %v1216_v61 = vmax.f32 %v1133_v59, 0.0  ;;  %v1421_v10 = vadd.f32 %v2781_v0, %v1420_v58 }
 0x33b   :  { %v1645_v19 = vpop.f32.mrf.mxu0 }
 0x33c   :  { %v1646_v31 = vadd.f32 %v2889_v4, %v1645_v19 }
 0x33e   :  { %1783 = vst.msk [vmem:[%s3317_s9 + $0x78] sm:$0xff] %vm1767_vm1, %v1646_v31  ;;  %v1134_v49 = vpop.f32.mrf.mxu2 }
 0x33f   :  { %v1135_v45 = vadd.f32 %v2929_v7, %v1134_v49 }
 0x340   :  { %v1422_v38 = vpop.f32.mrf.mxu3 }
 0x341   :  { %v1217_v63 = vmax.f32 %v1135_v45, 0.0  ;;  %v1423_v1 = vadd.f32 %v2781_v0, %v1422_v38 }
 0x343   :  { %v1254_v5 = vpack.c.bf16 %v1217_v63, %v1216_v61  ;;  %v1515_v48 = vpack.c.bf16 %v1423_v1, %v1421_v10  ;;  %v1648_v60 = vpop.f32.mrf.mxu0  ;;  %v3085_v1 = vld [vmem:[%s3314_s6 + $0x1] ss:$0 sm:$0xff] }
 0x344   :  { %v1649_v26 = vadd.f32 %v2889_v4, %v1648_v60 }
 0x345   :  { %1464 = vmatmul.bf16.gmra.mxu3 %v1254_v5 }
 0x346   :  { %1784 = vst.msk [vmem:[%s3317_s9 + $0x80] sm:$0xff] %vm1767_vm1, %v1649_v26  ;;  %1687 = vmatmul.bf16.gmra.mxu0 %v1515_v48  ;;  %v1137_v37 = vpop.f32.mrf.mxu2 }
 0x347   :  { %v1138_v18 = vadd.f32 %v2929_v7, %v1137_v37 }
 0x348   :  { %v1425_v16 = vpop.f32.mrf.mxu3 }
 0x349   :  { %v1218_v62 = vmax.f32 %v1138_v18, 0.0  ;;  %v1426_v32 = vadd.f32 %v2781_v0, %v1425_v16 }
 0x34b   :  { %v1650_v17 = vpop.f32.mrf.mxu0 }
 0x34c   :  { %v1651_v54 = vadd.f32 %v2889_v4, %v1650_v17 }
 0x34e   :  { %1785 = vst.msk [vmem:[%s3317_s9 + $0x88] sm:$0xff] %vm1767_vm1, %v1651_v54  ;;  %v1139_v9 = vpop.f32.mrf.mxu2 }
 0x34f   :  { %v1140_v28 = vadd.f32 %v2929_v7, %v1139_v9 }
 0x350   :  { %v1427_v20 = vpop.f32.mrf.mxu3 }
 0x351   :  { %v1219_v6 = vmax.f32 %v1140_v28, 0.0  ;;  %v1428_v21 = vadd.f32 %v2781_v0, %v1427_v20 }
 0x353   :  { %v1255_v23 = vpack.c.bf16 %v1219_v6, %v1218_v62  ;;  %v1516_v8 = vpack.c.bf16 %v1428_v21, %v1426_v32  ;;  %v1653_v15 = vpop.f32.mrf.mxu0 }
 0x354   :  { %v1654_v46 = vadd.f32 %v2889_v4, %v1653_v15 }
 0x355   :  { %1469 = vmatmul.bf16.gmra.mxu3 %v1255_v23 }
 0x356   :  { %1786 = vst.msk [vmem:[%s3317_s9 + $0x90] sm:$0xff] %vm1767_vm1, %v1654_v46  ;;  %1692 = vmatmul.bf16.gmra.mxu0 %v1516_v8  ;;  %v1142_v25 = vpop.f32.mrf.mxu2 }
 0x357   :  { %v1143_v29 = vadd.f32 %v2929_v7, %v1142_v25 }
 0x358   :  { %v1430_v33 = vpop.f32.mrf.mxu3 }
 0x359   :  { %v1220_v36 = vmax.f32 %v1143_v29, 0.0  ;;  %v1431_v40 = vadd.f32 %v2781_v0, %v1430_v33 }
 0x35b   :  { %v1655_v34 = vpop.f32.mrf.mxu0 }
 0x35c   :  { %v1656_v30 = vadd.f32 %v2889_v4, %v1655_v34 }
 0x35e   :  { %1787 = vst.msk [vmem:[%s3317_s9 + $0x98] sm:$0xff] %vm1767_vm1, %v1656_v30  ;;  %v1144_v52 = vpop.f32.mrf.mxu2 }
 0x35f   :  { %v1145_v12 = vadd.f32 %v2929_v7, %v1144_v52 }
 0x360   :  { %v1432_v3 = vpop.f32.mrf.mxu3 }
 0x361   :  { %v1221_v43 = vmax.f32 %v1145_v12, 0.0  ;;  %v1433_v39 = vadd.f32 %v2781_v0, %v1432_v3 }
 0x363   :  { %v1256_v50 = vpack.c.bf16 %v1221_v43, %v1220_v36  ;;  %v1517_v42 = vpack.c.bf16 %v1433_v39, %v1431_v40  ;;  %v1658_v41 = vpop.f32.mrf.mxu0 }
 0x364   :  { %v1659_v35 = vadd.f32 %v2889_v4, %v1658_v41 }
 0x365   :  { %1474 = vmatmul.bf16.gmra.mxu3 %v1256_v50 }
 0x366   :  { %1788 = vst.msk [vmem:[%s3317_s9 + $0xa0] sm:$0xff] %vm1767_vm1, %v1659_v35  ;;  %1697 = vmatmul.bf16.gmra.mxu0 %v1517_v42  ;;  %v1147_v44 = vpop.f32.mrf.mxu2 }
 0x367   :  { %v1148_v55 = vadd.f32 %v2929_v7, %v1147_v44 }
 0x368   :  { %v1435_v22 = vpop.f32.mrf.mxu3 }
 0x369   :  { %v1222_v24 = vmax.f32 %v1148_v55, 0.0  ;;  %v1436_v53 = vadd.f32 %v2781_v0, %v1435_v22 }
 0x36b   :  { %v1660_v13 = vpop.f32.mrf.mxu0 }
 0x36c   :  { %v1661_v47 = vadd.f32 %v2889_v4, %v1660_v13 }
 0x36e   :  { %1789 = vst.msk [vmem:[%s3317_s9 + $0xa8] sm:$0xff] %vm1767_vm1, %v1661_v47  ;;  %v1149_v56 = vpop.f32.mrf.mxu2 }
 0x36f   :  { %v1150_v2 = vadd.f32 %v2929_v7, %v1149_v56 }
 0x370   :  { %v1437_v27 = vpop.f32.mrf.mxu3 }
 0x371   :  { %v1223_v11 = vmax.f32 %v1150_v2, 0.0  ;;  %v1438_v51 = vadd.f32 %v2781_v0, %v1437_v27 }
 0x373   :  { %v1257_v14 = vpack.c.bf16 %v1223_v11, %v1222_v24  ;;  %v1518_v57 = vpack.c.bf16 %v1438_v51, %v1436_v53  ;;  %v1663_v58 = vpop.f32.mrf.mxu0 }
 0x374   :  { %v1664_v19 = vadd.f32 %v2889_v4, %v1663_v58 }
 0x375   :  { %1479 = vmatmul.bf16.gmra.mxu3 %v1257_v14 }
 0x376   :  { %1790 = vst.msk [vmem:[%s3317_s9 + $0xb0] sm:$0xff] %vm1767_vm1, %v1664_v19  ;;  %1702 = vmatmul.bf16.gmra.mxu0 %v1518_v57  ;;  %v1152_v31 = vpop.f32.mrf.mxu2 }
 0x377   :  { %v1153_v38 = vadd.f32 %v2929_v7, %v1152_v31 }
 0x378   :  { %v1440_v59 = vpop.f32.mrf.mxu3 }
 0x379   :  { %v1224_v63 = vmax.f32 %v1153_v38, 0.0  ;;  %v1441_v5 = vadd.f32 %v3085_v1, %v1440_v59 }
 0x37b   :  { %v1665_v49 = vpop.f32.mrf.mxu0 }
 0x37c   :  { %v1666_v45 = vadd.f32 %v2889_v4, %v1665_v49 }
 0x37e   :  { %1791 = vst.msk [vmem:[%s3317_s9 + $0xb8] sm:$0xff] %vm1767_vm1, %v1666_v45  ;;  %v1154_v0 = vpop.f32.mrf.mxu2 }
 0x37f   :  { %v1155_v61 = vadd.f32 %v2929_v7, %v1154_v0 }
 0x380   :  { %v1442_v10 = vpop.f32.mrf.mxu3 }
 0x381   :  { %v1225_v48 = vmax.f32 %v1155_v61, 0.0  ;;  %v1443_v60 = vadd.f32 %v3085_v1, %v1442_v10 }
 0x383   :  { %v1258_v26 = vpack.c.bf16 %v1225_v48, %v1224_v63  ;;  %v1519_v37 = vpack.c.bf16 %v1443_v60, %v1441_v5  ;;  %v1668_v16 = vpop.f32.mrf.mxu0 }
 0x384   :  { %v1669_v17 = vadd.f32 %v2889_v4, %v1668_v16 }
 0x385   :  { %1484 = vmatmul.bf16.gmra.mxu3 %v1258_v26 }
 0x386   :  { %1792 = vst.msk [vmem:[%s3317_s9 + $0xc0] sm:$0xff] %vm1767_vm1, %v1669_v17  ;;  %1707 = vmatmul.bf16.gmra.mxu0 %v1519_v37  ;;  %v1157_v54 = vpop.f32.mrf.mxu2 }
 0x387   :  { %v1158_v20 = vadd.f32 %v2929_v7, %v1157_v54 }
 0x388   :  { %v1445_v18 = vpop.f32.mrf.mxu3 }
 0x389   :  { %v1226_v21 = vmax.f32 %v1158_v20, 0.0  ;;  %v1446_v23 = vadd.f32 %v3085_v1, %v1445_v18 }
 0x38b   :  { %v1670_v9 = vpop.f32.mrf.mxu0 }
 0x38c   :  { %v1671_v28 = vadd.f32 %v2889_v4, %v1670_v9 }
 0x38e   :  { %1793 = vst.msk [vmem:[%s3317_s9 + $0xc8] sm:$0xff] %vm1767_vm1, %v1671_v28  ;;  %v1159_v62 = vpop.f32.mrf.mxu2 }
 0x38f   :  { %v1160_v32 = vadd.f32 %v2929_v7, %v1159_v62 }
 0x390   :  { %v1447_v6 = vpop.f32.mrf.mxu3 }
 0x391   :  { %v1227_v8 = vmax.f32 %v1160_v32, 0.0  ;;  %v1448_v15 = vadd.f32 %v3085_v1, %v1447_v6 }
 0x393   :  { %v1259_v46 = vpack.c.bf16 %v1227_v8, %v1226_v21  ;;  %v1520_v25 = vpack.c.bf16 %v1448_v15, %v1446_v23  ;;  %v1673_v33 = vpop.f32.mrf.mxu0 }
 0x394   :  { %v1674_v34 = vadd.f32 %v2889_v4, %v1673_v33 }
 0x395   :  { %1489 = vmatmul.bf16.gmra.mxu3 %v1259_v46 }
 0x396   :  { %1794 = vst.msk [vmem:[%s3317_s9 + $0xd0] sm:$0xff] %vm1767_vm1, %v1674_v34  ;;  %1712 = vmatmul.bf16.gmra.mxu0 %v1520_v25  ;;  %v1162_v30 = vpop.f32.mrf.mxu2 }
 0x397   :  { %v1163_v52 = vadd.f32 %v2929_v7, %v1162_v30 }
 0x398   :  { %v1450_v29 = vpop.f32.mrf.mxu3 }
 0x399   :  { %v1228_v40 = vmax.f32 %v1163_v52, 0.0  ;;  %v1451_v39 = vadd.f32 %v3085_v1, %v1450_v29 }
 0x39b   :  { %v1675_v12 = vpop.f32.mrf.mxu0  ;;  %v1260_v42 = vpack.c.bf16 %v1228_v40, %v1228_v40 }
 0x39c   :  { %v1676_v3 = vadd.f32 %v2889_v4, %v1675_v12 }
 0x39e   :  { %1795 = vst.msk [vmem:[%s3317_s9 + $0xd8] sm:$0xff] %vm1767_vm1, %v1676_v3  ;;  %v1164_v36 = vpop.f32.mrf.mxu2 }
 0x3a0   :  { %v1452_v43 = vpop.f32.mrf.mxu3 }
 0x3a1   :  { %v1453_v50 = vadd.f32 %v3085_v1, %v1452_v43 }
 0x3a3   :  { %v1521_v41 = vpack.c.bf16 %v1453_v50, %v1451_v39  ;;  %v1678_v35 = vpop.f32.mrf.mxu0 }
 0x3a4   :  { %v1679_v7 = vadd.f32 %v2889_v4, %v1678_v35 }
 0x3a5   :  { %1494 = vmatmul.bf16.gmra.mxu3 %v1260_v42 }
 0x3a6   :  { %1796 = vst.msk [vmem:[%s3317_s9 + $0xe0] sm:$0xff] %vm1767_vm1, %v1679_v7  ;;  %1717 = vmatmul.bf16.gmra.mxu0 %v1521_v41 }
 0x3a8   :  { %v1455_v44 = vpop.f32.mrf.mxu3 }
 0x3a9   :  { %v1456_v55 = vadd.f32 %v3085_v1, %v1455_v44 }
 0x3ab   :  { %v1680_v22 = vpop.f32.mrf.mxu0 }
 0x3ac   :  { %v1681_v13 = vadd.f32 %v2889_v4, %v1680_v22 }
 0x3ae   :  { %1797 = vst.msk [vmem:[%s3317_s9 + $0xe8] sm:$0xff] %vm1767_vm1, %v1681_v13 }
 0x3b0   :  { %v1457_v47 = vpop.f32.mrf.mxu3 }
 0x3b1   :  { %v1458_v56 = vadd.f32 %v3085_v1, %v1457_v47 }
 0x3b3   :  { %v1522_v2 = vpack.c.bf16 %v1458_v56, %v1456_v55  ;;  %v1683_v27 = vpop.f32.mrf.mxu0 }
 0x3b4   :  { %v1684_v24 = vadd.f32 %v2889_v4, %v1683_v27 }
 0x3b6   :  { %1798 = vst.msk [vmem:[%s3317_s9 + $0xf0] sm:$0xff] %vm1767_vm1, %v1684_v24  ;;  %1722 = vmatmul.bf16.gmra.mxu0 %v1522_v2 }
 0x3b8   :  { %v1460_v53 = vpop.f32.mrf.mxu3 }
 0x3b9   :  { %v1461_v57 = vadd.f32 %v3085_v1, %v1460_v53 }
 0x3bb   :  { %v1685_v11 = vpop.f32.mrf.mxu0 }
 0x3bc   :  { %v1686_v51 = vadd.f32 %v2889_v4, %v1685_v11 }
 0x3be   :  { %1799 = vst.msk [vmem:[%s3317_s9 + $0xf8] sm:$0xff] %vm1767_vm1, %v1686_v51 }
 0x3c0   :  { %v1462_v14 = vpop.f32.mrf.mxu3 }
 0x3c1   :  { %v1463_v58 = vadd.f32 %v3085_v1, %v1462_v14 }
 0x3c3   :  { %v1523_v19 = vpack.c.bf16 %v1463_v58, %v1461_v57  ;;  %v1688_v31 = vpop.f32.mrf.mxu0 }
 0x3c4   :  { %v1689_v59 = vadd.f32 %v2889_v4, %v1688_v31 }
 0x3c6   :  { %1800 = vst.msk [vmem:[%s3317_s9 + $0x100] sm:$0xff] %vm1767_vm1, %v1689_v59  ;;  %1727 = vmatmul.bf16.gmra.mxu0 %v1523_v19 }
 0x3c8   :  { %v1465_v49 = vpop.f32.mrf.mxu3 }
 0x3c9   :  { %v1466_v61 = vadd.f32 %v3085_v1, %v1465_v49 }
 0x3cb   :  { %v1690_v45 = vpop.f32.mrf.mxu0 }
 0x3cc   :  { %v1691_v38 = vadd.f32 %v2889_v4, %v1690_v45 }
 0x3ce   :  { %1801 = vst.msk [vmem:[%s3317_s9 + $0x108] sm:$0xff] %vm1767_vm1, %v1691_v38 }
 0x3d0   :  { %v1467_v0 = vpop.f32.mrf.mxu3 }
 0x3d1   :  { %v1468_v10 = vadd.f32 %v3085_v1, %v1467_v0 }
 0x3d3   :  { %v1524_v63 = vpack.c.bf16 %v1468_v10, %v1466_v61  ;;  %v1693_v5 = vpop.f32.mrf.mxu0 }
 0x3d4   :  { %v1694_v48 = vadd.f32 %v2889_v4, %v1693_v5 }
 0x3d6   :  { %1802 = vst.msk [vmem:[%s3317_s9 + $0x110] sm:$0xff] %vm1767_vm1, %v1694_v48  ;;  %1732 = vmatmul.bf16.gmra.mxu0 %v1524_v63 }
 0x3d8   :  { %v1470_v60 = vpop.f32.mrf.mxu3 }
 0x3d9   :  { %v1471_v17 = vadd.f32 %v3085_v1, %v1470_v60 }
 0x3db   :  { %v1695_v26 = vpop.f32.mrf.mxu0 }
 0x3dc   :  { %v1696_v37 = vadd.f32 %v2889_v4, %v1695_v26 }
 0x3de   :  { %1803 = vst.msk [vmem:[%s3317_s9 + $0x118] sm:$0xff] %vm1767_vm1, %v1696_v37 }
 0x3e0   :  { %v1472_v16 = vpop.f32.mrf.mxu3 }
 0x3e1   :  { %v1473_v54 = vadd.f32 %v3085_v1, %v1472_v16 }
 0x3e3   :  { %v1525_v18 = vpack.c.bf16 %v1473_v54, %v1471_v17  ;;  %v1698_v9 = vpop.f32.mrf.mxu0 }
 0x3e4   :  { %v1699_v28 = vadd.f32 %v2889_v4, %v1698_v9 }
 0x3e6   :  { %1804 = vst.msk [vmem:[%s3317_s9 + $0x120] sm:$0xff] %vm1767_vm1, %v1699_v28  ;;  %1737 = vmatmul.bf16.gmra.mxu0 %v1525_v18 }
 0x3e8   :  { %v1475_v20 = vpop.f32.mrf.mxu3 }
 0x3e9   :  { %v1476_v21 = vadd.f32 %v3085_v1, %v1475_v20 }
 0x3eb   :  { %v1700_v62 = vpop.f32.mrf.mxu0 }
 0x3ec   :  { %v1701_v32 = vadd.f32 %v2889_v4, %v1700_v62 }
 0x3ee   :  { %1805 = vst.msk [vmem:[%s3317_s9 + $0x128] sm:$0xff] %vm1767_vm1, %v1701_v32 }
 0x3f0   :  { %v1477_v6 = vpop.f32.mrf.mxu3 }
 0x3f1   :  { %v1478_v23 = vadd.f32 %v3085_v1, %v1477_v6 }
 0x3f3   :  { %v1526_v8 = vpack.c.bf16 %v1478_v23, %v1476_v21  ;;  %v1703_v15 = vpop.f32.mrf.mxu0 }
 0x3f4   :  { %v1704_v46 = vadd.f32 %v2889_v4, %v1703_v15 }
 0x3f6   :  { %1806 = vst.msk [vmem:[%s3317_s9 + $0x130] sm:$0xff] %vm1767_vm1, %v1704_v46  ;;  %1742 = vmatmul.bf16.gmra.mxu0 %v1526_v8 }
 0x3f8   :  { %v1480_v25 = vpop.f32.mrf.mxu3 }
 0x3f9   :  { %v1481_v29 = vadd.f32 %v3085_v1, %v1480_v25 }
 0x3fb   :  { %v1705_v33 = vpop.f32.mrf.mxu0 }
 0x3fc   :  { %v1706_v34 = vadd.f32 %v2889_v4, %v1705_v33 }
 0x3fe   :  { %1807 = vst.msk [vmem:[%s3317_s9 + $0x138] sm:$0xff] %vm1767_vm1, %v1706_v34 }
 0x400   :  { %v1482_v30 = vpop.f32.mrf.mxu3 }
 0x401   :  { %v1483_v52 = vadd.f32 %v3085_v1, %v1482_v30 }
 0x403   :  { %v1527_v12 = vpack.c.bf16 %v1483_v52, %v1481_v29  ;;  %v1708_v3 = vpop.f32.mrf.mxu0 }
 0x404   :  { %v1709_v36 = vadd.f32 %v2889_v4, %v1708_v3 }
 0x406   :  { %1808 = vst.msk [vmem:[%s3317_s9 + $0x140] sm:$0xff] %vm1767_vm1, %v1709_v36  ;;  %1747 = vmatmul.bf16.gmra.mxu0 %v1527_v12 }
 0x408   :  { %v1485_v40 = vpop.f32.mrf.mxu3 }
 0x409   :  { %v1486_v42 = vadd.f32 %v3085_v1, %v1485_v40 }
 0x40b   :  { %v1710_v43 = vpop.f32.mrf.mxu0 }
 0x40c   :  { %v1711_v39 = vadd.f32 %v2889_v4, %v1710_v43 }
 0x40e   :  { %1809 = vst.msk [vmem:[%s3317_s9 + $0x148] sm:$0xff] %vm1767_vm1, %v1711_v39 }
 0x410   :  { %v1487_v50 = vpop.f32.mrf.mxu3 }
 0x411   :  { %v1488_v41 = vadd.f32 %v3085_v1, %v1487_v50 }
 0x413   :  { %v1528_v35 = vpack.c.bf16 %v1488_v41, %v1486_v42  ;;  %v1713_v7 = vpop.f32.mrf.mxu0 }
 0x414   :  { %v1714_v44 = vadd.f32 %v2889_v4, %v1713_v7 }
 0x416   :  { %1810 = vst.msk [vmem:[%s3317_s9 + $0x150] sm:$0xff] %vm1767_vm1, %v1714_v44  ;;  %1752 = vmatmul.bf16.gmra.mxu0 %v1528_v35 }
 0x418   :  { %v1490_v22 = vpop.f32.mrf.mxu3 }
 0x419   :  { %v1491_v56 = vadd.f32 %v3085_v1, %v1490_v22 }
 0x41b   :  { %v1715_v13 = vpop.f32.mrf.mxu0 }
 0x41c   :  { %v1716_v47 = vadd.f32 %v2889_v4, %v1715_v13 }
 0x41e   :  { %1811 = vst.msk [vmem:[%s3317_s9 + $0x158] sm:$0xff] %vm1767_vm1, %v1716_v47 }
 0x420   :  { %v1492_v55 = vpop.f32.mrf.mxu3 }
 0x421   :  { %v1493_v2 = vadd.f32 %v3085_v1, %v1492_v55 }
 0x423   :  { %v1529_v27 = vpack.c.bf16 %v1493_v2, %v1491_v56  ;;  %v1718_v24 = vpop.f32.mrf.mxu0 }
 0x424   :  { %v1719_v53 = vadd.f32 %v2889_v4, %v1718_v24 }
 0x426   :  { %1812 = vst.msk [vmem:[%s3317_s9 + $0x160] sm:$0xff] %vm1767_vm1, %v1719_v53  ;;  %1757 = vmatmul.bf16.gmra.mxu0 %v1529_v27 }
 0x428   :  { %v1495_v11 = vpop.f32.mrf.mxu3 }
 0x429   :  { %v1496_v51 = vadd.f32 %v3085_v1, %v1495_v11 }
 0x42b   :  { %v1530_v14 = vpack.c.bf16 %v1496_v51, %v1496_v51  ;;  %v1720_v57 = vpop.f32.mrf.mxu0 }
 0x42c   :  { %v1721_v58 = vadd.f32 %v2889_v4, %v1720_v57 }
 0x42d   :  { %1762 = vmatmul.bf16.vlgmr.msra.gmra.mxu3 %v1530_v14 }
 0x42e   :  { %1813 = vst.msk [vmem:[%s3317_s9 + $0x168] sm:$0xff] %vm1767_vm1, %v1721_v58 }
 0x430   :  { %v1497_v19 = vpop.f32.mrf.mxu3 }
 0x433   :  { %v1723_v31 = vpop.f32.mrf.mxu0 }
 0x434   :  { %v1724_v59 = vadd.f32 %v2889_v4, %v1723_v31 }
 0x436   :  { %1814 = vst.msk [vmem:[%s3317_s9 + $0x170] sm:$0xff] %vm1767_vm1, %v1724_v59 }
 0x43b   :  { %v1725_v1 = vpop.f32.mrf.mxu0 }
 0x43c   :  { %v1726_v49 = vadd.f32 %v2889_v4, %v1725_v1 }
 0x43e   :  { %1815 = vst.msk [vmem:[%s3317_s9 + $0x178] sm:$0xff] %vm1767_vm1, %v1726_v49 }
 0x443   :  { %v1728_v45 = vpop.f32.mrf.mxu0 }
 0x444   :  { %v1729_v38 = vadd.f32 %v2889_v4, %v1728_v45 }
 0x446   :  { %1816 = vst.msk [vmem:[%s3317_s9 + $0x180] sm:$0xff] %vm1767_vm1, %v1729_v38 }
 0x44b   :  { %v1730_v0 = vpop.f32.mrf.mxu0 }
 0x44c   :  { %v1731_v61 = vadd.f32 %v2889_v4, %v1730_v0 }
 0x44e   :  { %1817 = vst.msk [vmem:[%s3317_s9 + $0x188] sm:$0xff] %vm1767_vm1, %v1731_v61 }
 0x453   :  { %v1733_v10 = vpop.f32.mrf.mxu0 }
 0x454   :  { %v1734_v63 = vadd.f32 %v2889_v4, %v1733_v10 }
 0x456   :  { %1818 = vst.msk [vmem:[%s3317_s9 + $0x190] sm:$0xff] %vm1767_vm1, %v1734_v63 }
 0x45b   :  { %v1735_v5 = vpop.f32.mrf.mxu0 }
 0x45c   :  { %v1736_v48 = vadd.f32 %v2889_v4, %v1735_v5 }
 0x45e   :  { %1819 = vst.msk [vmem:[%s3317_s9 + $0x198] sm:$0xff] %vm1767_vm1, %v1736_v48 }
 0x463   :  { %v1738_v60 = vpop.f32.mrf.mxu0 }
 0x464   :  { %v1739_v26 = vadd.f32 %v2889_v4, %v1738_v60 }
 0x466   :  { %1820 = vst.msk [vmem:[%s3317_s9 + $0x1a0] sm:$0xff] %vm1767_vm1, %v1739_v26 }
 0x46b   :  { %v1740_v37 = vpop.f32.mrf.mxu0 }
 0x46c   :  { %v1741_v16 = vadd.f32 %v2889_v4, %v1740_v37 }
 0x46e   :  { %1821 = vst.msk [vmem:[%s3317_s9 + $0x1a8] sm:$0xff] %vm1767_vm1, %v1741_v16 }
 0x473   :  { %v1743_v17 = vpop.f32.mrf.mxu0 }
 0x474   :  { %v1744_v54 = vadd.f32 %v2889_v4, %v1743_v17 }
 0x476   :  { %1822 = vst.msk [vmem:[%s3317_s9 + $0x1b0] sm:$0xff] %vm1767_vm1, %v1744_v54 }
 0x47b   :  { %v1745_v18 = vpop.f32.mrf.mxu0 }
 0x47c   :  { %v1746_v9 = vadd.f32 %v2889_v4, %v1745_v18 }
 0x47e   :  { %1823 = vst.msk [vmem:[%s3317_s9 + $0x1b8] sm:$0xff] %vm1767_vm1, %v1746_v9 }
 0x483   :  { %v1748_v28 = vpop.f32.mrf.mxu0 }
 0x484   :  { %v1749_v20 = vadd.f32 %v2889_v4, %v1748_v28 }
 0x486   :  { %1824 = vst.msk [vmem:[%s3317_s9 + $0x1c0] sm:$0xff] %vm1767_vm1, %v1749_v20 }
 0x48b   :  { %v1750_v62 = vpop.f32.mrf.mxu0 }
 0x48c   :  { %v1751_v32 = vadd.f32 %v2889_v4, %v1750_v62 }
 0x48e   :  { %1825 = vst.msk [vmem:[%s3317_s9 + $0x1c8] sm:$0xff] %vm1767_vm1, %v1751_v32 }
 0x493   :  { %v1753_v6 = vpop.f32.mrf.mxu0 }
 0x494   :  { %v1754_v21 = vadd.f32 %v2889_v4, %v1753_v6 }
 0x496   :  { %1826 = vst.msk [vmem:[%s3317_s9 + $0x1d0] sm:$0xff] %vm1767_vm1, %v1754_v21 }
 0x49b   :  { %v1755_v23 = vpop.f32.mrf.mxu0 }
 0x49c   :  { %v1756_v8 = vadd.f32 %v2889_v4, %v1755_v23 }
 0x49e   :  { %1827 = vst.msk [vmem:[%s3317_s9 + $0x1d8] sm:$0xff] %vm1767_vm1, %v1756_v8 }
 0x4a3   :  { %v1758_v15 = vpop.f32.mrf.mxu0 }
 0x4a4   :  { %v1759_v46 = vadd.f32 %v2889_v4, %v1758_v15 }
 0x4a6   :  { %1828 = vst.msk [vmem:[%s3317_s9 + $0x1e0] sm:$0xff] %vm1767_vm1, %v1759_v46 }
 0x4ab   :  { %v1760_v25 = vpop.f32.mrf.mxu0 }
 0x4ac   :  { %v1761_v33 = vadd.f32 %v2889_v4, %v1760_v25 }
 0x4ae   :  { %1829 = vst.msk [vmem:[%s3317_s9 + $0x1e8] sm:$0xff] %vm1767_vm1, %v1761_v33 }
 0x4b0   :  { %v1763_v34 = vpop.f32.mrf.mxu3 }
 0x4b1   :  { %v1764_v30 = vadd.f32 %v2889_v4, %v1763_v34 }
 0x4b3   :  { %1830 = vst.msk [vmem:[%s3317_s9 + $0x1f0] sm:$0xff] %vm1767_vm1, %v1764_v30 }
 0x4b8   :  { %v1765_v29 = vpop.f32.mrf.mxu3 }

</bundles_post_ra>
